<compile_context>
chip_gen: v7x
topology: tpu7x:2x2x1
jax: 0.10.0
libtpu: 0.0.40
codegen_flags: <defaults>
</compile_context>

<pallas_src>
import jax
import jax.numpy as jnp
from jax.experimental import pallas as pl
from jax.experimental.pallas import tpu as pltpu

LN_EPS = 1e-5
COMPUTE_DTYPE = jnp.bfloat16   # MXU input dtype; accumulation & LN stats in f32
LANE = 128
SUBLANE = 8
_MIB = 1024 * 1024


def _round_up(x, m):
    return (x + m - 1) // m * m


# ----------------------------- kernel body ---------------------------------


def _relu_ln(h, gamma, beta):
    """ReLU -> LayerNorm over the last dim (f32 statistics).

    Variance as E[h^2] - mean^2: two independent lane reductions that can
    overlap on the XLUs instead of the serial mean -> center -> square chain.
    Clamped at 0 to guard against rounding (and all-zero padded batch rows).
    """
    h = jnp.maximum(h, 0.0)
    mu = jnp.mean(h, axis=-1, keepdims=True)
    ms = jnp.mean(h * h, axis=-1, keepdims=True)
    var = jnp.maximum(ms - mu * mu, 0.0)
    return (h - mu) * jax.lax.rsqrt(var + LN_EPS) * gamma + beta


def fusion_kernel(
    text_ref, audio_ref, video_ref,
    wt_ref, bt_ref, gt_ref, bet_ref,
    wa_ref, ba_ref, ga_ref, bea_ref,
    wv_ref, bv_ref, gv_ref, bev_ref,
    wft_ref, wfa_ref, wfv_ref, bf_ref, gf_ref, bef_ref,
    wc_ref, bc_ref,
    out_ref,
):
    cd = wt_ref.dtype   # bf16 matmul inputs; f32 MXU accumulation everywhere

    def proj(x_ref, w_ref, b_ref, g_ref, be_ref):
        # Inputs stream in f32; cast to bf16 right before the dot (saves a
        # standalone wrapper-side pad/cast HBM pass).
        h = jnp.dot(x_ref[...].astype(cd), w_ref[...],
                    preferred_element_type=jnp.float32) + b_ref[...]
        return _relu_ln(h, g_ref[...], be_ref[...])

    # concat([t, a, v]) @ Wf == t @ Wf_t + a @ Wf_a + v @ Wf_v.
    # Each modality is projected and folded into the running accumulator
    # immediately, so at most two [TB, H] f32 buffers are live at once (less
    # spill scratch; acc-+= maps to in-place MXU accumulation on v7x's MRB).
    t = proj(text_ref, wt_ref, bt_ref, gt_ref, bet_ref)
    pre = jnp.dot(t.astype(cd), wft_ref[...], preferred_element_type=jnp.float32)

    a = proj(audio_ref, wa_ref, ba_ref, ga_ref, bea_ref)
    pre += jnp.dot(a.astype(cd), wfa_ref[...], preferred_element_type=jnp.float32)

    v = proj(video_ref, wv_ref, bv_ref, gv_ref, bev_ref)
    pre += jnp.dot(v.astype(cd), wfv_ref[...], preferred_element_type=jnp.float32)

    f = _relu_ln(pre + bf_ref[...], gf_ref[...], bef_ref[...])

    # Classifier: lane-dense output (num_classes zero-padded to 128 lanes in
    # the wrapper) -> unmasked vst stores.
    out_ref[...] = jnp.dot(f.astype(cd), wc_ref[...],
                           preferred_element_type=jnp.float32) + bc_ref[...]


# ----------------------------- JAX wrapper ----------------------------------


def _vmem_capacity_bytes():
    try:
        return int(pltpu.get_tpu_info().vmem_capacity_bytes)
    except Exception:
        return 64 * _MIB   # conservative: v7x per-TensorCore VMEM


def _resident_bytes(ops):
    """Upper-bound VMEM footprint of the grid-resident params (assume the
    default 2 buffers in case single-buffering is unavailable)."""
    total = 0
    for a in ops:
        rows = _round_up(a.shape[0], SUBLANE)
        cols = _round_up(a.shape[-1], LANE)
        total += rows * cols * a.dtype.itemsize
    return 2 * total


def _plan_tiling(batch, in_dims, hidden, out_dim, resident_bytes):
    """Pick (batch tile, vmem_limit_bytes) from the chip's VMEM capacity.

    The per-row budget covers the double-buffered f32 streamed tiles plus an
    estimate of the kernel's live f32 [TB, hidden] intermediates; the resident
    weights are subtracted from the overall budget.
    """
    vmem_cap = _vmem_capacity_bytes()
    # ~96 MiB on v5e/v6e (128 MiB physical), ~48 MiB on v7x (64 MiB physical).
    vmem_limit = min(int(0.75 * vmem_cap), 100 * _MIB)

    lane = lambda d: _round_up(d, LANE)
    stream_bpr = 2 * 4 * (sum(lane(d) for d in in_dims) + lane(out_dim))
    scratch_bpr = 6 * 4 * lane(hidden)          # live f32 [TB, H] intermediates
    bytes_per_row = stream_bpr + scratch_bpr

    budget = int(0.7 * vmem_limit) - resident_bytes
    tb_cap = 2048 if vmem_cap >= 96 * _MIB else 1024
    tb = (max(budget, 0) // bytes_per_row) // SUBLANE * SUBLANE
    tb = max(SUBLANE, min(tb_cap, tb))
    tb = min(tb, _round_up(batch, SUBLANE))

    # Keep >=2 grid steps whenever the batch allows it so the "parallel" batch
    # axis can shard across both v7x TensorCores (one extra ~0.35us grid step
    # on single-TC v5e/v6e -- negligible).
    if batch > SUBLANE and _round_up(batch, SUBLANE) <= tb:
        tb = _round_up(-(-batch // 2), SUBLANE)
    return tb, vmem_limit


def cross_modal_fusion(text, audio, video, params):
    if audio.ndim == 3 and audio.shape[1] == 1:
        audio = jnp.squeeze(audio, axis=1)

    batch = text.shape[0]
    hidden = params["wt"].shape[1]
    num_classes = params["wc"].shape[1]
    cd = COMPUTE_DTYPE
    f32 = jnp.float32

    # Inputs stream in native f32 with native feature dims (full-dim blocks
    # satisfy the (8,128) rule); they are cast to bf16 inside the kernel.
    text = text.astype(f32)
    audio = audio.astype(f32)
    video = video.astype(f32)

    # Weights as bf16 MXU inputs. Fusion weight split into three [H, H] blocks
    # so the kernel never concatenates along the lane axis.
    wt = params["wt"].astype(cd)
    wa = params["wa"].astype(cd)
    wv = params["wv"].astype(cd)
    wf = params["wf"]
    wft = wf[0 * hidden:1 * hidden].astype(cd)
    wfa = wf[1 * hidden:2 * hidden].astype(cd)
    wfv = wf[2 * hidden:3 * hidden].astype(cd)

    # Lane-dense classifier output: zero-pad num_classes to a multiple of 128.
    c_pad = _round_up(num_classes, LANE)
    wc = jnp.pad(params["wc"], ((0, 0), (0, c_pad - num_classes))).astype(cd)
    bc = jnp.pad(params["bc"], ((0, 0), (0, c_pad - num_classes))).astype(f32)

    const_ops = (
        wt, params["bt"].astype(f32), params["gt"].astype(f32), params["bet"].astype(f32),
        wa, params["ba"].astype(f32), params["ga"].astype(f32), params["bea"].astype(f32),
        wv, params["bv"].astype(f32), params["gv"].astype(f32), params["bev"].astype(f32),
        wft, wfa, wfv,
        params["bf"].astype(f32), params["gf"].astype(f32), params["bef"].astype(f32),
        wc, bc,
    )

    in_dims = (text.shape[1], audio.shape[1], video.shape[1])
    tb, vmem_limit = _plan_tiling(batch, in_dims, hidden, c_pad,
                                  _resident_bytes(const_ops))

    b_pad = _round_up(batch, tb)
    if b_pad != batch:
        pad = [(0, b_pad - batch), (0, 0)]
        text = jnp.pad(text, pad)
        audio = jnp.pad(audio, pad)
        video = jnp.pad(video, pad)

    grid = (b_pad // tb,)

    def act_spec(d):
        return pl.BlockSpec((tb, d), lambda i: (i, 0))

    def const_spec(arr, single_buffer):
        index_map = lambda i: (0,) * arr.ndim
        if single_buffer:
            # Same block every grid step -> DMA'd once, VMEM-resident; a single
            # buffer (vs default 2) reclaims roughly half their VMEM.
            return pl.BlockSpec(arr.shape, index_map, pipeline_mode=pl.Buffered(1))
        return pl.BlockSpec(arr.shape, index_map)

    def run(single_buffer_consts):
        in_specs = [act_spec(d) for d in in_dims] + [
            const_spec(op, single_buffer_consts) for op in const_ops
        ]
        call = pl.pallas_call(
            fusion_kernel,
            out_shape=jax.ShapeDtypeStruct((b_pad, c_pad), jnp.float32),
            grid=grid,
            in_specs=in_specs,
            out_specs=pl.BlockSpec((tb, c_pad), lambda i: (i, 0)),
            compiler_params=pltpu.CompilerParams(
                dimension_semantics=("parallel",),
                vmem_limit_bytes=int(vmem_limit),
            ),
        )
        return call(text, audio, video, *const_ops)

    single_buffer = hasattr(pl, "Buffered")
    try:
        out = run(single_buffer)
    except Exception:
        if not single_buffer:
            raise
        # Fallback for jax versions where pipeline_mode=pl.Buffered(1) is not
        # supported by the top-level pallas_call pipeline.
        out = run(False)

    return out[:batch, :num_classes]


# ------------------------- params & pure-JAX reference ----------------------


def init_params(key, text_dim, audio_dim, video_dim, hidden_dim, num_classes):
    """Deterministic synthetic parameters. Linear weights stored as [in, out];
    biases / LayerNorm params stored as [1, dim] for clean broadcasting."""
    keys = jax.random.split(key, 5)

    def lin(k, d_in, d_out, scale=0.05):
        kw, kb = jax.random.split(k)
        w = jax.random.normal(kw, (d_in, d_out), jnp.float32) * scale
        b = jax.random.normal(kb, (1, d_out), jnp.float32) * scale
        return w, b

    def ln(dim):
        return jnp.ones((1, dim), jnp.float32), jnp.zeros((1, dim), jnp.float32)

    wt, bt = lin(keys[0], text_dim, hidden_dim)
    gt, bet = ln(hidden_dim)
    wa, ba = lin(keys[1], audio_dim, hidden_dim)
    ga, bea = ln(hidden_dim)
    wv, bv = lin(keys[2], video_dim, hidden_dim)
    gv, bev = ln(hidden_dim)
    wf, bf = lin(keys[3], 3 * hidden_dim, hidden_dim)
    gf, bef = ln(hidden_dim)
    wc, bc = lin(keys[4], hidden_dim, num_classes)

    return dict(
        wt=wt, bt=bt, gt=gt, bet=bet,
        wa=wa, ba=ba, ga=ga, bea=bea,
        wv=wv, bv=bv, gv=gv, bev=bev,
        wf=wf, bf=bf, gf=gf, bef=bef,
        wc=wc, bc=bc,
    )


def reference_forward(text, audio, video, p, compute_dtype=jnp.float32):
    """Pure-JAX reference; `compute_dtype` mimics the kernel's matmul dtype."""
    if audio.ndim == 3 and audio.shape[1] == 1:
        audio = jnp.squeeze(audio, axis=1)
    cd = compute_dtype

    def dot(x, w):
        return jnp.dot(x.astype(cd), w.astype(cd), preferred_element_type=jnp.float32)

    def proj(x, w, b, g, be):
        h = jnp.maximum(dot(x, w) + b, 0.0)
        mu = h.mean(-1, keepdims=True)
        var = ((h - mu) ** 2).mean(-1, keepdims=True)
        return ((h - mu) * jax.lax.rsqrt(var + LN_EPS)) * g + be

    t = proj(text, p["wt"], p["bt"], p["gt"], p["bet"])
    a = proj(audio, p["wa"], p["ba"], p["ga"], p["bea"])
    v = proj(video, p["wv"], p["bv"], p["gv"], p["bev"])
    f = proj(jnp.concatenate([t, a, v], axis=-1), p["wf"], p["bf"], p["gf"], p["bef"])
    return dot(f, p["wc"]) + p["bc"]


if __name__ == "__main__":
    # Small shapes consistent with the module's forward (hidden kept at a
    # lane-aligned 128; real config is 768/768/23 -> 256 -> 2).
    batch = 8
    text_dim, audio_dim, video_dim = 64, 64, 23
    hidden_dim, num_classes = 128, 2

    key = jax.random.PRNGKey(0)
    k_text, k_audio, k_video, k_params = jax.random.split(key, 4)

    text = jax.random.normal(k_text, (batch, text_dim), jnp.float32)
    audio = jax.random.normal(k_audio, (batch, 1, audio_dim), jnp.float32)  # 3-D path
    video = jax.random.normal(k_video, (batch, video_dim), jnp.float32)

    params = init_params(k_params, text_dim, audio_dim, video_dim, hidden_dim, num_classes)

    out = jax.block_until_ready(cross_modal_fusion(text, audio, video, params))
    assert out.shape == (batch, num_classes), out.shape

    # Tight check against a reference using the same bf16 matmul inputs.
    ref_bf16 = reference_forward(text, audio, video, params, compute_dtype=COMPUTE_DTYPE)
    assert jnp.allclose(out, ref_bf16, atol=5e-3, rtol=5e-3), \
        float(jnp.abs(out - ref_bf16).max())

    # Loose sanity check against the pure-f32 reference (bf16 drift only).
    ref_f32 = reference_forward(text, audio, video, params, compute_dtype=jnp.float32)
    assert jnp.allclose(out, ref_f32, atol=1.5e-1, rtol=5e-2), \
        float(jnp.abs(out - ref_f32).max())

    print("KERNEL_OK")
</pallas_src>

<mosaic_0001>
module attributes {stable_mosaic.version = 11 : i64} {
  func.func @fusion_kernel(%arg0: i32, %arg1: memref<8x64xf32, #tpu.memory_space<vmem>>, %arg2: memref<8x64xf32, #tpu.memory_space<vmem>>, %arg3: memref<8x23xf32, #tpu.memory_space<vmem>>, %arg4: memref<64x128xbf16, #tpu.memory_space<vmem>>, %arg5: memref<1x128xf32, #tpu.memory_space<vmem>>, %arg6: memref<1x128xf32, #tpu.memory_space<vmem>>, %arg7: memref<1x128xf32, #tpu.memory_space<vmem>>, %arg8: memref<64x128xbf16, #tpu.memory_space<vmem>>, %arg9: memref<1x128xf32, #tpu.memory_space<vmem>>, %arg10: memref<1x128xf32, #tpu.memory_space<vmem>>, %arg11: memref<1x128xf32, #tpu.memory_space<vmem>>, %arg12: memref<23x128xbf16, #tpu.memory_space<vmem>>, %arg13: memref<1x128xf32, #tpu.memory_space<vmem>>, %arg14: memref<1x128xf32, #tpu.memory_space<vmem>>, %arg15: memref<1x128xf32, #tpu.memory_space<vmem>>, %arg16: memref<128x128xbf16, #tpu.memory_space<vmem>>, %arg17: memref<128x128xbf16, #tpu.memory_space<vmem>>, %arg18: memref<128x128xbf16, #tpu.memory_space<vmem>>, %arg19: memref<1x128xf32, #tpu.memory_space<vmem>>, %arg20: memref<1x128xf32, #tpu.memory_space<vmem>>, %arg21: memref<1x128xf32, #tpu.memory_space<vmem>>, %arg22: memref<128x128xbf16, #tpu.memory_space<vmem>>, %arg23: memref<1x128xf32, #tpu.memory_space<vmem>>, %arg24: memref<8x128xf32, #tpu.memory_space<vmem>>) attributes {dimension_semantics = [#tpu.dimension_semantics<parallel>], iteration_bounds = array<i64: 1>, scalar_prefetch = 0 : i64, scratch_operands = 0 : i64, tpu.core_type = #tpu.core_type<tc>, window_params = [{transform_indices = @transform_0, window_bounds = array<i64: 8, 64>}, {transform_indices = @transform_1, window_bounds = array<i64: 8, 64>}, {transform_indices = @transform_2, window_bounds = array<i64: 8, 23>}, {pipeline_mode = #tpu.pipeline_mode<synchronous>, transform_indices = @transform_3, window_bounds = array<i64: 64, 128>}, {pipeline_mode = #tpu.pipeline_mode<synchronous>, transform_indices = @transform_4, window_bounds = array<i64: 1, 128>}, {pipeline_mode = #tpu.pipeline_mode<synchronous>, transform_indices = @transform_5, window_bounds = array<i64: 1, 128>}, {pipeline_mode = #tpu.pipeline_mode<synchronous>, transform_indices = @transform_6, window_bounds = array<i64: 1, 128>}, {pipeline_mode = #tpu.pipeline_mode<synchronous>, transform_indices = @transform_7, window_bounds = array<i64: 64, 128>}, {pipeline_mode = #tpu.pipeline_mode<synchronous>, transform_indices = @transform_8, window_bounds = array<i64: 1, 128>}, {pipeline_mode = #tpu.pipeline_mode<synchronous>, transform_indices = @transform_9, window_bounds = array<i64: 1, 128>}, {pipeline_mode = #tpu.pipeline_mode<synchronous>, transform_indices = @transform_10, window_bounds = array<i64: 1, 128>}, {pipeline_mode = #tpu.pipeline_mode<synchronous>, transform_indices = @transform_11, window_bounds = array<i64: 23, 128>}, {pipeline_mode = #tpu.pipeline_mode<synchronous>, transform_indices = @transform_12, window_bounds = array<i64: 1, 128>}, {pipeline_mode = #tpu.pipeline_mode<synchronous>, transform_indices = @transform_13, window_bounds = array<i64: 1, 128>}, {pipeline_mode = #tpu.pipeline_mode<synchronous>, transform_indices = @transform_14, window_bounds = array<i64: 1, 128>}, {pipeline_mode = #tpu.pipeline_mode<synchronous>, transform_indices = @transform_15, window_bounds = array<i64: 128, 128>}, {pipeline_mode = #tpu.pipeline_mode<synchronous>, transform_indices = @transform_16, window_bounds = array<i64: 128, 128>}, {pipeline_mode = #tpu.pipeline_mode<synchronous>, transform_indices = @transform_17, window_bounds = array<i64: 128, 128>}, {pipeline_mode = #tpu.pipeline_mode<synchronous>, transform_indices = @transform_18, window_bounds = array<i64: 1, 128>}, {pipeline_mode = #tpu.pipeline_mode<synchronous>, transform_indices = @transform_19, window_bounds = array<i64: 1, 128>}, {pipeline_mode = #tpu.pipeline_mode<synchronous>, transform_indices = @transform_20, window_bounds = array<i64: 1, 128>}, {pipeline_mode = #tpu.pipeline_mode<synchronous>, transform_indices = @transform_21, window_bounds = array<i64: 128, 128>}, {pipeline_mode = #tpu.pipeline_mode<synchronous>, transform_indices = @transform_22, window_bounds = array<i64: 1, 128>}, {transform_indices = @transform_23, window_bounds = array<i64: 8, 128>}]} {
    %c0 = arith.constant 0 : index
    %c0_0 = arith.constant 0 : index
    %0 = vector.load %arg1[%c0, %c0_0] : memref<8x64xf32, #tpu.memory_space<vmem>>, vector<8x64xf32>
    %1 = arith.truncf %0 : vector<8x64xf32> to vector<8x64xbf16>
    %c0_1 = arith.constant 0 : index
    %c0_2 = arith.constant 0 : index
    %2 = vector.load %arg4[%c0_1, %c0_2] : memref<64x128xbf16, #tpu.memory_space<vmem>>, vector<64x128xbf16>
    %cst = arith.constant dense<0.000000e+00> : vector<8x128xf32>
    %3 = tpu.matmul %1, %2, %cst {dimension_numbers = #tpu.dot_dimension_numbers<[1], [0], [0], [1], [0, 0, 1, 1], [], []>} : vector<8x64xbf16>, vector<64x128xbf16>, vector<8x128xf32> -> vector<8x128xf32>
    %c0_3 = arith.constant 0 : index
    %c0_4 = arith.constant 0 : index
    %4 = vector.load %arg5[%c0_3, %c0_4] : memref<1x128xf32, #tpu.memory_space<vmem>>, vector<1x128xf32>
    %5 = vector.broadcast %4 : vector<1x128xf32> to vector<8x128xf32>
    %6 = arith.addf %3, %5 : vector<8x128xf32>
    %c0_5 = arith.constant 0 : index
    %c0_6 = arith.constant 0 : index
    %7 = vector.load %arg6[%c0_5, %c0_6] : memref<1x128xf32, #tpu.memory_space<vmem>>, vector<1x128xf32>
    %c0_7 = arith.constant 0 : index
    %c0_8 = arith.constant 0 : index
    %8 = vector.load %arg7[%c0_7, %c0_8] : memref<1x128xf32, #tpu.memory_space<vmem>>, vector<1x128xf32>
    %cst_9 = arith.constant 0.000000e+00 : f32
    %9 = vector.broadcast %cst_9 : f32 to vector<8x128xf32>
    %10 = arith.maximumf %6, %9 : vector<8x128xf32>
    %cst_10 = arith.constant dense<0.000000e+00> : vector<8xf32>
    %11 = vector.multi_reduction <add>, %10, %cst_10 [1] : vector<8x128xf32> to vector<8xf32>
    %12 = vector.shape_cast %11 : vector<8xf32> to vector<8x1xf32>
    %cst_11 = arith.constant 1.280000e+02 : f32
    %13 = vector.broadcast %cst_11 : f32 to vector<8x1xf32>
    %14 = arith.divf %12, %13 : vector<8x1xf32>
    %15 = arith.mulf %10, %10 : vector<8x128xf32>
    %cst_12 = arith.constant dense<0.000000e+00> : vector<8xf32>
    %16 = vector.multi_reduction <add>, %15, %cst_12 [1] : vector<8x128xf32> to vector<8xf32>
    %17 = vector.shape_cast %16 : vector<8xf32> to vector<8x1xf32>
    %cst_13 = arith.constant 1.280000e+02 : f32
    %18 = vector.broadcast %cst_13 : f32 to vector<8x1xf32>
    %19 = arith.divf %17, %18 : vector<8x1xf32>
    %20 = arith.mulf %14, %14 : vector<8x1xf32>
    %21 = arith.subf %19, %20 : vector<8x1xf32>
    %cst_14 = arith.constant 0.000000e+00 : f32
    %22 = vector.broadcast %cst_14 : f32 to vector<8x1xf32>
    %23 = arith.maximumf %21, %22 : vector<8x1xf32>
    %24 = vector.broadcast %14 : vector<8x1xf32> to vector<8x128xf32>
    %25 = arith.subf %10, %24 : vector<8x128xf32>
    %cst_15 = arith.constant 9.99999974E-6 : f32
    %26 = vector.broadcast %cst_15 : f32 to vector<8x1xf32>
    %27 = arith.addf %23, %26 : vector<8x1xf32>
    %28 = math.rsqrt %27 : vector<8x1xf32>
    %29 = vector.broadcast %28 : vector<8x1xf32> to vector<8x128xf32>
    %30 = arith.mulf %25, %29 : vector<8x128xf32>
    %31 = vector.broadcast %7 : vector<1x128xf32> to vector<8x128xf32>
    %32 = arith.mulf %30, %31 : vector<8x128xf32>
    %33 = vector.broadcast %8 : vector<1x128xf32> to vector<8x128xf32>
    %34 = arith.addf %32, %33 : vector<8x128xf32>
    %35 = arith.truncf %34 : vector<8x128xf32> to vector<8x128xbf16>
    %c0_16 = arith.constant 0 : index
    %c0_17 = arith.constant 0 : index
    %36 = vector.load %arg16[%c0_16, %c0_17] : memref<128x128xbf16, #tpu.memory_space<vmem>>, vector<128x128xbf16>
    %cst_18 = arith.constant dense<0.000000e+00> : vector<8x128xf32>
    %37 = tpu.matmul %35, %36, %cst_18 {dimension_numbers = #tpu.dot_dimension_numbers<[1], [0], [0], [1], [0, 0, 1, 1], [], []>} : vector<8x128xbf16>, vector<128x128xbf16>, vector<8x128xf32> -> vector<8x128xf32>
    %c0_19 = arith.constant 0 : index
    %c0_20 = arith.constant 0 : index
    %38 = vector.load %arg2[%c0_19, %c0_20] : memref<8x64xf32, #tpu.memory_space<vmem>>, vector<8x64xf32>
    %39 = arith.truncf %38 : vector<8x64xf32> to vector<8x64xbf16>
    %c0_21 = arith.constant 0 : index
    %c0_22 = arith.constant 0 : index
    %40 = vector.load %arg8[%c0_21, %c0_22] : memref<64x128xbf16, #tpu.memory_space<vmem>>, vector<64x128xbf16>
    %cst_23 = arith.constant dense<0.000000e+00> : vector<8x128xf32>
    %41 = tpu.matmul %39, %40, %cst_23 {dimension_numbers = #tpu.dot_dimension_numbers<[1], [0], [0], [1], [0, 0, 1, 1], [], []>} : vector<8x64xbf16>, vector<64x128xbf16>, vector<8x128xf32> -> vector<8x128xf32>
    %c0_24 = arith.constant 0 : index
    %c0_25 = arith.constant 0 : index
    %42 = vector.load %arg9[%c0_24, %c0_25] : memref<1x128xf32, #tpu.memory_space<vmem>>, vector<1x128xf32>
    %43 = vector.broadcast %42 : vector<1x128xf32> to vector<8x128xf32>
    %44 = arith.addf %41, %43 : vector<8x128xf32>
    %c0_26 = arith.constant 0 : index
    %c0_27 = arith.constant 0 : index
    %45 = vector.load %arg10[%c0_26, %c0_27] : memref<1x128xf32, #tpu.memory_space<vmem>>, vector<1x128xf32>
    %c0_28 = arith.constant 0 : index
    %c0_29 = arith.constant 0 : index
    %46 = vector.load %arg11[%c0_28, %c0_29] : memref<1x128xf32, #tpu.memory_space<vmem>>, vector<1x128xf32>
    %cst_30 = arith.constant 0.000000e+00 : f32
    %47 = vector.broadcast %cst_30 : f32 to vector<8x128xf32>
    %48 = arith.maximumf %44, %47 : vector<8x128xf32>
    %cst_31 = arith.constant dense<0.000000e+00> : vector<8xf32>
    %49 = vector.multi_reduction <add>, %48, %cst_31 [1] : vector<8x128xf32> to vector<8xf32>
    %50 = vector.shape_cast %49 : vector<8xf32> to vector<8x1xf32>
    %cst_32 = arith.constant 1.280000e+02 : f32
    %51 = vector.broadcast %cst_32 : f32 to vector<8x1xf32>
    %52 = arith.divf %50, %51 : vector<8x1xf32>
    %53 = arith.mulf %48, %48 : vector<8x128xf32>
    %cst_33 = arith.constant dense<0.000000e+00> : vector<8xf32>
    %54 = vector.multi_reduction <add>, %53, %cst_33 [1] : vector<8x128xf32> to vector<8xf32>
    %55 = vector.shape_cast %54 : vector<8xf32> to vector<8x1xf32>
    %cst_34 = arith.constant 1.280000e+02 : f32
    %56 = vector.broadcast %cst_34 : f32 to vector<8x1xf32>
    %57 = arith.divf %55, %56 : vector<8x1xf32>
    %58 = arith.mulf %52, %52 : vector<8x1xf32>
    %59 = arith.subf %57, %58 : vector<8x1xf32>
    %cst_35 = arith.constant 0.000000e+00 : f32
    %60 = vector.broadcast %cst_35 : f32 to vector<8x1xf32>
    %61 = arith.maximumf %59, %60 : vector<8x1xf32>
    %62 = vector.broadcast %52 : vector<8x1xf32> to vector<8x128xf32>
    %63 = arith.subf %48, %62 : vector<8x128xf32>
    %cst_36 = arith.constant 9.99999974E-6 : f32
    %64 = vector.broadcast %cst_36 : f32 to vector<8x1xf32>
    %65 = arith.addf %61, %64 : vector<8x1xf32>
    %66 = math.rsqrt %65 : vector<8x1xf32>
    %67 = vector.broadcast %66 : vector<8x1xf32> to vector<8x128xf32>
    %68 = arith.mulf %63, %67 : vector<8x128xf32>
    %69 = vector.broadcast %45 : vector<1x128xf32> to vector<8x128xf32>
    %70 = arith.mulf %68, %69 : vector<8x128xf32>
    %71 = vector.broadcast %46 : vector<1x128xf32> to vector<8x128xf32>
    %72 = arith.addf %70, %71 : vector<8x128xf32>
    %73 = arith.truncf %72 : vector<8x128xf32> to vector<8x128xbf16>
    %c0_37 = arith.constant 0 : index
    %c0_38 = arith.constant 0 : index
    %74 = vector.load %arg17[%c0_37, %c0_38] : memref<128x128xbf16, #tpu.memory_space<vmem>>, vector<128x128xbf16>
    %cst_39 = arith.constant dense<0.000000e+00> : vector<8x128xf32>
    %75 = tpu.matmul %73, %74, %cst_39 {dimension_numbers = #tpu.dot_dimension_numbers<[1], [0], [0], [1], [0, 0, 1, 1], [], []>} : vector<8x128xbf16>, vector<128x128xbf16>, vector<8x128xf32> -> vector<8x128xf32>
    %76 = arith.addf %37, %75 : vector<8x128xf32>
    %c0_40 = arith.constant 0 : index
    %c0_41 = arith.constant 0 : index
    %77 = vector.load %arg3[%c0_40, %c0_41] : memref<8x23xf32, #tpu.memory_space<vmem>>, vector<8x23xf32>
    %78 = arith.truncf %77 : vector<8x23xf32> to vector<8x23xbf16>
    %c0_42 = arith.constant 0 : index
    %c0_43 = arith.constant 0 : index
    %79 = vector.load %arg12[%c0_42, %c0_43] : memref<23x128xbf16, #tpu.memory_space<vmem>>, vector<23x128xbf16>
    %cst_44 = arith.constant dense<0.000000e+00> : vector<8x128xf32>
    %80 = tpu.matmul %78, %79, %cst_44 {dimension_numbers = #tpu.dot_dimension_numbers<[1], [0], [0], [1], [0, 0, 1, 1], [], []>} : vector<8x23xbf16>, vector<23x128xbf16>, vector<8x128xf32> -> vector<8x128xf32>
    %c0_45 = arith.constant 0 : index
    %c0_46 = arith.constant 0 : index
    %81 = vector.load %arg13[%c0_45, %c0_46] : memref<1x128xf32, #tpu.memory_space<vmem>>, vector<1x128xf32>
    %82 = vector.broadcast %81 : vector<1x128xf32> to vector<8x128xf32>
    %83 = arith.addf %80, %82 : vector<8x128xf32>
    %c0_47 = arith.constant 0 : index
    %c0_48 = arith.constant 0 : index
    %84 = vector.load %arg14[%c0_47, %c0_48] : memref<1x128xf32, #tpu.memory_space<vmem>>, vector<1x128xf32>
    %c0_49 = arith.constant 0 : index
    %c0_50 = arith.constant 0 : index
    %85 = vector.load %arg15[%c0_49, %c0_50] : memref<1x128xf32, #tpu.memory_space<vmem>>, vector<1x128xf32>
    %cst_51 = arith.constant 0.000000e+00 : f32
    %86 = vector.broadcast %cst_51 : f32 to vector<8x128xf32>
    %87 = arith.maximumf %83, %86 : vector<8x128xf32>
    %cst_52 = arith.constant dense<0.000000e+00> : vector<8xf32>
    %88 = vector.multi_reduction <add>, %87, %cst_52 [1] : vector<8x128xf32> to vector<8xf32>
    %89 = vector.shape_cast %88 : vector<8xf32> to vector<8x1xf32>
    %cst_53 = arith.constant 1.280000e+02 : f32
    %90 = vector.broadcast %cst_53 : f32 to vector<8x1xf32>
    %91 = arith.divf %89, %90 : vector<8x1xf32>
    %92 = arith.mulf %87, %87 : vector<8x128xf32>
    %cst_54 = arith.constant dense<0.000000e+00> : vector<8xf32>
    %93 = vector.multi_reduction <add>, %92, %cst_54 [1] : vector<8x128xf32> to vector<8xf32>
    %94 = vector.shape_cast %93 : vector<8xf32> to vector<8x1xf32>
    %cst_55 = arith.constant 1.280000e+02 : f32
    %95 = vector.broadcast %cst_55 : f32 to vector<8x1xf32>
    %96 = arith.divf %94, %95 : vector<8x1xf32>
    %97 = arith.mulf %91, %91 : vector<8x1xf32>
    %98 = arith.subf %96, %97 : vector<8x1xf32>
    %cst_56 = arith.constant 0.000000e+00 : f32
    %99 = vector.broadcast %cst_56 : f32 to vector<8x1xf32>
    %100 = arith.maximumf %98, %99 : vector<8x1xf32>
    %101 = vector.broadcast %91 : vector<8x1xf32> to vector<8x128xf32>
    %102 = arith.subf %87, %101 : vector<8x128xf32>
    %cst_57 = arith.constant 9.99999974E-6 : f32
    %103 = vector.broadcast %cst_57 : f32 to vector<8x1xf32>
    %104 = arith.addf %100, %103 : vector<8x1xf32>
    %105 = math.rsqrt %104 : vector<8x1xf32>
    %106 = vector.broadcast %105 : vector<8x1xf32> to vector<8x128xf32>
    %107 = arith.mulf %102, %106 : vector<8x128xf32>
    %108 = vector.broadcast %84 : vector<1x128xf32> to vector<8x128xf32>
    %109 = arith.mulf %107, %108 : vector<8x128xf32>
    %110 = vector.broadcast %85 : vector<1x128xf32> to vector<8x128xf32>
    %111 = arith.addf %109, %110 : vector<8x128xf32>
    %112 = arith.truncf %111 : vector<8x128xf32> to vector<8x128xbf16>
    %c0_58 = arith.constant 0 : index
    %c0_59 = arith.constant 0 : index
    %113 = vector.load %arg18[%c0_58, %c0_59] : memref<128x128xbf16, #tpu.memory_space<vmem>>, vector<128x128xbf16>
    %cst_60 = arith.constant dense<0.000000e+00> : vector<8x128xf32>
    %114 = tpu.matmul %112, %113, %cst_60 {dimension_numbers = #tpu.dot_dimension_numbers<[1], [0], [0], [1], [0, 0, 1, 1], [], []>} : vector<8x128xbf16>, vector<128x128xbf16>, vector<8x128xf32> -> vector<8x128xf32>
    %115 = arith.addf %76, %114 : vector<8x128xf32>
    %c0_61 = arith.constant 0 : index
    %c0_62 = arith.constant 0 : index
    %116 = vector.load %arg19[%c0_61, %c0_62] : memref<1x128xf32, #tpu.memory_space<vmem>>, vector<1x128xf32>
    %117 = vector.broadcast %116 : vector<1x128xf32> to vector<8x128xf32>
    %118 = arith.addf %115, %117 : vector<8x128xf32>
    %c0_63 = arith.constant 0 : index
    %c0_64 = arith.constant 0 : index
    %119 = vector.load %arg20[%c0_63, %c0_64] : memref<1x128xf32, #tpu.memory_space<vmem>>, vector<1x128xf32>
    %c0_65 = arith.constant 0 : index
    %c0_66 = arith.constant 0 : index
    %120 = vector.load %arg21[%c0_65, %c0_66] : memref<1x128xf32, #tpu.memory_space<vmem>>, vector<1x128xf32>
    %cst_67 = arith.constant 0.000000e+00 : f32
    %121 = vector.broadcast %cst_67 : f32 to vector<8x128xf32>
    %122 = arith.maximumf %118, %121 : vector<8x128xf32>
    %cst_68 = arith.constant dense<0.000000e+00> : vector<8xf32>
    %123 = vector.multi_reduction <add>, %122, %cst_68 [1] : vector<8x128xf32> to vector<8xf32>
    %124 = vector.shape_cast %123 : vector<8xf32> to vector<8x1xf32>
    %cst_69 = arith.constant 1.280000e+02 : f32
    %125 = vector.broadcast %cst_69 : f32 to vector<8x1xf32>
    %126 = arith.divf %124, %125 : vector<8x1xf32>
    %127 = arith.mulf %122, %122 : vector<8x128xf32>
    %cst_70 = arith.constant dense<0.000000e+00> : vector<8xf32>
    %128 = vector.multi_reduction <add>, %127, %cst_70 [1] : vector<8x128xf32> to vector<8xf32>
    %129 = vector.shape_cast %128 : vector<8xf32> to vector<8x1xf32>
    %cst_71 = arith.constant 1.280000e+02 : f32
    %130 = vector.broadcast %cst_71 : f32 to vector<8x1xf32>
    %131 = arith.divf %129, %130 : vector<8x1xf32>
    %132 = arith.mulf %126, %126 : vector<8x1xf32>
    %133 = arith.subf %131, %132 : vector<8x1xf32>
    %cst_72 = arith.constant 0.000000e+00 : f32
    %134 = vector.broadcast %cst_72 : f32 to vector<8x1xf32>
    %135 = arith.maximumf %133, %134 : vector<8x1xf32>
    %136 = vector.broadcast %126 : vector<8x1xf32> to vector<8x128xf32>
    %137 = arith.subf %122, %136 : vector<8x128xf32>
    %cst_73 = arith.constant 9.99999974E-6 : f32
    %138 = vector.broadcast %cst_73 : f32 to vector<8x1xf32>
    %139 = arith.addf %135, %138 : vector<8x1xf32>
    %140 = math.rsqrt %139 : vector<8x1xf32>
    %141 = vector.broadcast %140 : vector<8x1xf32> to vector<8x128xf32>
    %142 = arith.mulf %137, %141 : vector<8x128xf32>
    %143 = vector.broadcast %119 : vector<1x128xf32> to vector<8x128xf32>
    %144 = arith.mulf %142, %143 : vector<8x128xf32>
    %145 = vector.broadcast %120 : vector<1x128xf32> to vector<8x128xf32>
    %146 = arith.addf %144, %145 : vector<8x128xf32>
    %147 = arith.truncf %146 : vector<8x128xf32> to vector<8x128xbf16>
    %c0_74 = arith.constant 0 : index
    %c0_75 = arith.constant 0 : index
    %148 = vector.load %arg22[%c0_74, %c0_75] : memref<128x128xbf16, #tpu.memory_space<vmem>>, vector<128x128xbf16>
    %cst_76 = arith.constant dense<0.000000e+00> : vector<8x128xf32>
    %149 = tpu.matmul %147, %148, %cst_76 {dimension_numbers = #tpu.dot_dimension_numbers<[1], [0], [0], [1], [0, 0, 1, 1], [], []>} : vector<8x128xbf16>, vector<128x128xbf16>, vector<8x128xf32> -> vector<8x128xf32>
    %c0_77 = arith.constant 0 : index
    %c0_78 = arith.constant 0 : index
    %150 = vector.load %arg23[%c0_77, %c0_78] : memref<1x128xf32, #tpu.memory_space<vmem>>, vector<1x128xf32>
    %151 = vector.broadcast %150 : vector<1x128xf32> to vector<8x128xf32>
    %152 = arith.addf %149, %151 : vector<8x128xf32>
    %c0_79 = arith.constant 0 : index
    %c0_80 = arith.constant 0 : index
    %153 = vector.load %arg24[%c0_79, %c0_80] : memref<8x128xf32, #tpu.memory_space<vmem>>, vector<8x128xf32>
    tpu.vector_store %arg24[%c0_79, %c0_80], %152 {strides = array<i32>} : memref<8x128xf32, #tpu.memory_space<vmem>>, vector<8x128xf32>,
    return
  }
  func.func @transform_0(%arg0: i32) -> (i32, i32) {
    %c0_i32 = arith.constant 0 : i32
    %c0_i32_0 = arith.constant 0 : i32
    return %arg0, %c0_i32 : i32, i32
  }
  func.func @transform_1(%arg0: i32) -> (i32, i32) {
    %c0_i32 = arith.constant 0 : i32
    %c0_i32_0 = arith.constant 0 : i32
    return %arg0, %c0_i32 : i32, i32
  }
  func.func @transform_2(%arg0: i32) -> (i32, i32) {
    %c0_i32 = arith.constant 0 : i32
    %c0_i32_0 = arith.constant 0 : i32
    return %arg0, %c0_i32 : i32, i32
  }
  func.func @transform_3(%arg0: i32) -> (i32, i32) {
    %c0_i32 = arith.constant 0 : i32
    %c0_i32_0 = arith.constant 0 : i32
    %c0_i32_1 = arith.constant 0 : i32
    return %c0_i32, %c0_i32_0 : i32, i32
  }
  func.func @transform_4(%arg0: i32) -> (i32, i32) {
    %c0_i32 = arith.constant 0 : i32
    %c0_i32_0 = arith.constant 0 : i32
    %c0_i32_1 = arith.constant 0 : i32
    return %c0_i32, %c0_i32_0 : i32, i32
  }
  func.func @transform_5(%arg0: i32) -> (i32, i32) {
    %c0_i32 = arith.constant 0 : i32
    %c0_i32_0 = arith.constant 0 : i32
    %c0_i32_1 = arith.constant 0 : i32
    return %c0_i32, %c0_i32_0 : i32, i32
  }
  func.func @transform_6(%arg0: i32) -> (i32, i32) {
    %c0_i32 = arith.constant 0 : i32
    %c0_i32_0 = arith.constant 0 : i32
    %c0_i32_1 = arith.constant 0 : i32
    return %c0_i32, %c0_i32_0 : i32, i32
  }
  func.func @transform_7(%arg0: i32) -> (i32, i32) {
    %c0_i32 = arith.constant 0 : i32
    %c0_i32_0 = arith.constant 0 : i32
    %c0_i32_1 = arith.constant 0 : i32
    return %c0_i32, %c0_i32_0 : i32, i32
  }
  func.func @transform_8(%arg0: i32) -> (i32, i32) {
    %c0_i32 = arith.constant 0 : i32
    %c0_i32_0 = arith.constant 0 : i32
    %c0_i32_1 = arith.constant 0 : i32
    return %c0_i32, %c0_i32_0 : i32, i32
  }
  func.func @transform_9(%arg0: i32) -> (i32, i32) {
    %c0_i32 = arith.constant 0 : i32
    %c0_i32_0 = arith.constant 0 : i32
    %c0_i32_1 = arith.constant 0 : i32
    return %c0_i32, %c0_i32_0 : i32, i32
  }
  func.func @transform_10(%arg0: i32) -> (i32, i32) {
    %c0_i32 = arith.constant 0 : i32
    %c0_i32_0 = arith.constant 0 : i32
    %c0_i32_1 = arith.constant 0 : i32
    return %c0_i32, %c0_i32_0 : i32, i32
  }
  func.func @transform_11(%arg0: i32) -> (i32, i32) {
    %c0_i32 = arith.constant 0 : i32
    %c0_i32_0 = arith.constant 0 : i32
    %c0_i32_1 = arith.constant 0 : i32
    return %c0_i32, %c0_i32_0 : i32, i32
  }
  func.func @transform_12(%arg0: i32) -> (i32, i32) {
    %c0_i32 = arith.constant 0 : i32
    %c0_i32_0 = arith.constant 0 : i32
    %c0_i32_1 = arith.constant 0 : i32
    return %c0_i32, %c0_i32_0 : i32, i32
  }
  func.func @transform_13(%arg0: i32) -> (i32, i32) {
    %c0_i32 = arith.constant 0 : i32
    %c0_i32_0 = arith.constant 0 : i32
    %c0_i32_1 = arith.constant 0 : i32
    return %c0_i32, %c0_i32_0 : i32, i32
  }
  func.func @transform_14(%arg0: i32) -> (i32, i32) {
    %c0_i32 = arith.constant 0 : i32
    %c0_i32_0 = arith.constant 0 : i32
    %c0_i32_1 = arith.constant 0 : i32
    return %c0_i32, %c0_i32_0 : i32, i32
  }
  func.func @transform_15(%arg0: i32) -> (i32, i32) {
    %c0_i32 = arith.constant 0 : i32
    %c0_i32_0 = arith.constant 0 : i32
    %c0_i32_1 = arith.constant 0 : i32
    return %c0_i32, %c0_i32_0 : i32, i32
  }
  func.func @transform_16(%arg0: i32) -> (i32, i32) {
    %c0_i32 = arith.constant 0 : i32
    %c0_i32_0 = arith.constant 0 : i32
    %c0_i32_1 = arith.constant 0 : i32
    return %c0_i32, %c0_i32_0 : i32, i32
  }
  func.func @transform_17(%arg0: i32) -> (i32, i32) {
    %c0_i32 = arith.constant 0 : i32
    %c0_i32_0 = arith.constant 0 : i32
    %c0_i32_1 = arith.constant 0 : i32
    return %c0_i32, %c0_i32_0 : i32, i32
  }
  func.func @transform_18(%arg0: i32) -> (i32, i32) {
    %c0_i32 = arith.constant 0 : i32
    %c0_i32_0 = arith.constant 0 : i32
    %c0_i32_1 = arith.constant 0 : i32
    return %c0_i32, %c0_i32_0 : i32, i32
  }
  func.func @transform_19(%arg0: i32) -> (i32, i32) {
    %c0_i32 = arith.constant 0 : i32
    %c0_i32_0 = arith.constant 0 : i32
    %c0_i32_1 = arith.constant 0 : i32
    return %c0_i32, %c0_i32_0 : i32, i32
  }
  func.func @transform_20(%arg0: i32) -> (i32, i32) {
    %c0_i32 = arith.constant 0 : i32
    %c0_i32_0 = arith.constant 0 : i32
    %c0_i32_1 = arith.constant 0 : i32
    return %c0_i32, %c0_i32_0 : i32, i32
  }
  func.func @transform_21(%arg0: i32) -> (i32, i32) {
    %c0_i32 = arith.constant 0 : i32
    %c0_i32_0 = arith.constant 0 : i32
    %c0_i32_1 = arith.constant 0 : i32
    return %c0_i32, %c0_i32_0 : i32, i32
  }
  func.func @transform_22(%arg0: i32) -> (i32, i32) {
    %c0_i32 = arith.constant 0 : i32
    %c0_i32_0 = arith.constant 0 : i32
    %c0_i32_1 = arith.constant 0 : i32
    return %c0_i32, %c0_i32_0 : i32, i32
  }
  func.func @transform_23(%arg0: i32) -> (i32, i32) {
    %c0_i32 = arith.constant 0 : i32
    %c0_i32_0 = arith.constant 0 : i32
    return %arg0, %c0_i32 : i32, i32
  }
}

module attributes {stable_mosaic.version = 11 : i64} {
  func.func @fusion_kernel(%arg0: i32, %arg1: memref<8x64xf32, #tpu.memory_space<vmem>>, %arg2: memref<8x64xf32, #tpu.memory_space<vmem>>, %arg3: memref<8x23xf32, #tpu.memory_space<vmem>>, %arg4: memref<64x128xbf16, #tpu.memory_space<vmem>>, %arg5: memref<1x128xf32, #tpu.memory_space<vmem>>, %arg6: memref<1x128xf32, #tpu.memory_space<vmem>>, %arg7: memref<1x128xf32, #tpu.memory_space<vmem>>, %arg8: memref<64x128xbf16, #tpu.memory_space<vmem>>, %arg9: memref<1x128xf32, #tpu.memory_space<vmem>>, %arg10: memref<1x128xf32, #tpu.memory_space<vmem>>, %arg11: memref<1x128xf32, #tpu.memory_space<vmem>>, %arg12: memref<23x128xbf16, #tpu.memory_space<vmem>>, %arg13: memref<1x128xf32, #tpu.memory_space<vmem>>, %arg14: memref<1x128xf32, #tpu.memory_space<vmem>>, %arg15: memref<1x128xf32, #tpu.memory_space<vmem>>, %arg16: memref<128x128xbf16, #tpu.memory_space<vmem>>, %arg17: memref<128x128xbf16, #tpu.memory_space<vmem>>, %arg18: memref<128x128xbf16, #tpu.memory_space<vmem>>, %arg19: memref<1x128xf32, #tpu.memory_space<vmem>>, %arg20: memref<1x128xf32, #tpu.memory_space<vmem>>, %arg21: memref<1x128xf32, #tpu.memory_space<vmem>>, %arg22: memref<128x128xbf16, #tpu.memory_space<vmem>>, %arg23: memref<1x128xf32, #tpu.memory_space<vmem>>, %arg24: memref<8x128xf32, #tpu.memory_space<vmem>>) attributes {dimension_semantics = [#tpu.dimension_semantics<parallel>], iteration_bounds = array<i64: 1>, scalar_prefetch = 0 : i64, scratch_operands = 0 : i64, tpu.core_type = #tpu.core_type<tc>, window_params = [{transform_indices = @transform_0, window_bounds = array<i64: 8, 64>}, {transform_indices = @transform_1, window_bounds = array<i64: 8, 64>}, {transform_indices = @transform_2, window_bounds = array<i64: 8, 23>}, {pipeline_mode = #tpu.pipeline_mode<synchronous>, transform_indices = @transform_3, window_bounds = array<i64: 64, 128>}, {pipeline_mode = #tpu.pipeline_mode<synchronous>, transform_indices = @transform_4, window_bounds = array<i64: 1, 128>}, {pipeline_mode = #tpu.pipeline_mode<synchronous>, transform_indices = @transform_5, window_bounds = array<i64: 1, 128>}, {pipeline_mode = #tpu.pipeline_mode<synchronous>, transform_indices = @transform_6, window_bounds = array<i64: 1, 128>}, {pipeline_mode = #tpu.pipeline_mode<synchronous>, transform_indices = @transform_7, window_bounds = array<i64: 64, 128>}, {pipeline_mode = #tpu.pipeline_mode<synchronous>, transform_indices = @transform_8, window_bounds = array<i64: 1, 128>}, {pipeline_mode = #tpu.pipeline_mode<synchronous>, transform_indices = @transform_9, window_bounds = array<i64: 1, 128>}, {pipeline_mode = #tpu.pipeline_mode<synchronous>, transform_indices = @transform_10, window_bounds = array<i64: 1, 128>}, {pipeline_mode = #tpu.pipeline_mode<synchronous>, transform_indices = @transform_11, window_bounds = array<i64: 23, 128>}, {pipeline_mode = #tpu.pipeline_mode<synchronous>, transform_indices = @transform_12, window_bounds = array<i64: 1, 128>}, {pipeline_mode = #tpu.pipeline_mode<synchronous>, transform_indices = @transform_13, window_bounds = array<i64: 1, 128>}, {pipeline_mode = #tpu.pipeline_mode<synchronous>, transform_indices = @transform_14, window_bounds = array<i64: 1, 128>}, {pipeline_mode = #tpu.pipeline_mode<synchronous>, transform_indices = @transform_15, window_bounds = array<i64: 128, 128>}, {pipeline_mode = #tpu.pipeline_mode<synchronous>, transform_indices = @transform_16, window_bounds = array<i64: 128, 128>}, {pipeline_mode = #tpu.pipeline_mode<synchronous>, transform_indices = @transform_17, window_bounds = array<i64: 128, 128>}, {pipeline_mode = #tpu.pipeline_mode<synchronous>, transform_indices = @transform_18, window_bounds = array<i64: 1, 128>}, {pipeline_mode = #tpu.pipeline_mode<synchronous>, transform_indices = @transform_19, window_bounds = array<i64: 1, 128>}, {pipeline_mode = #tpu.pipeline_mode<synchronous>, transform_indices = @transform_20, window_bounds = array<i64: 1, 128>}, {pipeline_mode = #tpu.pipeline_mode<synchronous>, transform_indices = @transform_21, window_bounds = array<i64: 128, 128>}, {pipeline_mode = #tpu.pipeline_mode<synchronous>, transform_indices = @transform_22, window_bounds = array<i64: 1, 128>}, {transform_indices = @transform_23, window_bounds = array<i64: 8, 128>}]} {
    %c0 = arith.constant 0 : index
    %c0_0 = arith.constant 0 : index
    %0 = vector.load %arg1[%c0, %c0_0] : memref<8x64xf32, #tpu.memory_space<vmem>>, vector<8x64xf32>
    %1 = arith.truncf %0 : vector<8x64xf32> to vector<8x64xbf16>
    %c0_1 = arith.constant 0 : index
    %c0_2 = arith.constant 0 : index
    %2 = vector.load %arg4[%c0_1, %c0_2] : memref<64x128xbf16, #tpu.memory_space<vmem>>, vector<64x128xbf16>
    %cst = arith.constant dense<0.000000e+00> : vector<8x128xf32>
    %3 = tpu.matmul %1, %2, %cst {dimension_numbers = #tpu.dot_dimension_numbers<[1], [0], [0], [1], [0, 0, 1, 1], [], []>} : vector<8x64xbf16>, vector<64x128xbf16>, vector<8x128xf32> -> vector<8x128xf32>
    %c0_3 = arith.constant 0 : index
    %c0_4 = arith.constant 0 : index
    %4 = vector.load %arg5[%c0_3, %c0_4] : memref<1x128xf32, #tpu.memory_space<vmem>>, vector<1x128xf32>
    %5 = vector.broadcast %4 : vector<1x128xf32> to vector<8x128xf32>
    %6 = arith.addf %3, %5 : vector<8x128xf32>
    %c0_5 = arith.constant 0 : index
    %c0_6 = arith.constant 0 : index
    %7 = vector.load %arg6[%c0_5, %c0_6] : memref<1x128xf32, #tpu.memory_space<vmem>>, vector<1x128xf32>
    %c0_7 = arith.constant 0 : index
    %c0_8 = arith.constant 0 : index
    %8 = vector.load %arg7[%c0_7, %c0_8] : memref<1x128xf32, #tpu.memory_space<vmem>>, vector<1x128xf32>
    %cst_9 = arith.constant 0.000000e+00 : f32
    %9 = vector.broadcast %cst_9 : f32 to vector<8x128xf32>
    %10 = arith.maximumf %6, %9 : vector<8x128xf32>
    %cst_10 = arith.constant dense<0.000000e+00> : vector<8xf32>
    %11 = vector.multi_reduction <add>, %10, %cst_10 [1] : vector<8x128xf32> to vector<8xf32>
    %12 = vector.shape_cast %11 : vector<8xf32> to vector<8x1xf32>
    %cst_11 = arith.constant 1.280000e+02 : f32
    %13 = vector.broadcast %cst_11 : f32 to vector<8x1xf32>
    %14 = arith.divf %12, %13 : vector<8x1xf32>
    %15 = arith.mulf %10, %10 : vector<8x128xf32>
    %cst_12 = arith.constant dense<0.000000e+00> : vector<8xf32>
    %16 = vector.multi_reduction <add>, %15, %cst_12 [1] : vector<8x128xf32> to vector<8xf32>
    %17 = vector.shape_cast %16 : vector<8xf32> to vector<8x1xf32>
    %cst_13 = arith.constant 1.280000e+02 : f32
    %18 = vector.broadcast %cst_13 : f32 to vector<8x1xf32>
    %19 = arith.divf %17, %18 : vector<8x1xf32>
    %20 = arith.mulf %14, %14 : vector<8x1xf32>
    %21 = arith.subf %19, %20 : vector<8x1xf32>
    %cst_14 = arith.constant 0.000000e+00 : f32
    %22 = vector.broadcast %cst_14 : f32 to vector<8x1xf32>
    %23 = arith.maximumf %21, %22 : vector<8x1xf32>
    %24 = vector.broadcast %14 : vector<8x1xf32> to vector<8x128xf32>
    %25 = arith.subf %10, %24 : vector<8x128xf32>
    %cst_15 = arith.constant 9.99999974E-6 : f32
    %26 = vector.broadcast %cst_15 : f32 to vector<8x1xf32>
    %27 = arith.addf %23, %26 : vector<8x1xf32>
    %28 = math.rsqrt %27 : vector<8x1xf32>
    %29 = vector.broadcast %28 : vector<8x1xf32> to vector<8x128xf32>
    %30 = arith.mulf %25, %29 : vector<8x128xf32>
    %31 = vector.broadcast %7 : vector<1x128xf32> to vector<8x128xf32>
    %32 = arith.mulf %30, %31 : vector<8x128xf32>
    %33 = vector.broadcast %8 : vector<1x128xf32> to vector<8x128xf32>
    %34 = arith.addf %32, %33 : vector<8x128xf32>
    %35 = arith.truncf %34 : vector<8x128xf32> to vector<8x128xbf16>
    %c0_16 = arith.constant 0 : index
    %c0_17 = arith.constant 0 : index
    %36 = vector.load %arg16[%c0_16, %c0_17] : memref<128x128xbf16, #tpu.memory_space<vmem>>, vector<128x128xbf16>
    %cst_18 = arith.constant dense<0.000000e+00> : vector<8x128xf32>
    %37 = tpu.matmul %35, %36, %cst_18 {dimension_numbers = #tpu.dot_dimension_numbers<[1], [0], [0], [1], [0, 0, 1, 1], [], []>} : vector<8x128xbf16>, vector<128x128xbf16>, vector<8x128xf32> -> vector<8x128xf32>
    %c0_19 = arith.constant 0 : index
    %c0_20 = arith.constant 0 : index
    %38 = vector.load %arg2[%c0_19, %c0_20] : memref<8x64xf32, #tpu.memory_space<vmem>>, vector<8x64xf32>
    %39 = arith.truncf %38 : vector<8x64xf32> to vector<8x64xbf16>
    %c0_21 = arith.constant 0 : index
    %c0_22 = arith.constant 0 : index
    %40 = vector.load %arg8[%c0_21, %c0_22] : memref<64x128xbf16, #tpu.memory_space<vmem>>, vector<64x128xbf16>
    %cst_23 = arith.constant dense<0.000000e+00> : vector<8x128xf32>
    %41 = tpu.matmul %39, %40, %cst_23 {dimension_numbers = #tpu.dot_dimension_numbers<[1], [0], [0], [1], [0, 0, 1, 1], [], []>} : vector<8x64xbf16>, vector<64x128xbf16>, vector<8x128xf32> -> vector<8x128xf32>
    %c0_24 = arith.constant 0 : index
    %c0_25 = arith.constant 0 : index
    %42 = vector.load %arg9[%c0_24, %c0_25] : memref<1x128xf32, #tpu.memory_space<vmem>>, vector<1x128xf32>
    %43 = vector.broadcast %42 : vector<1x128xf32> to vector<8x128xf32>
    %44 = arith.addf %41, %43 : vector<8x128xf32>
    %c0_26 = arith.constant 0 : index
    %c0_27 = arith.constant 0 : index
    %45 = vector.load %arg10[%c0_26, %c0_27] : memref<1x128xf32, #tpu.memory_space<vmem>>, vector<1x128xf32>
    %c0_28 = arith.constant 0 : index
    %c0_29 = arith.constant 0 : index
    %46 = vector.load %arg11[%c0_28, %c0_29] : memref<1x128xf32, #tpu.memory_space<vmem>>, vector<1x128xf32>
    %cst_30 = arith.constant 0.000000e+00 : f32
    %47 = vector.broadcast %cst_30 : f32 to vector<8x128xf32>
    %48 = arith.maximumf %44, %47 : vector<8x128xf32>
    %cst_31 = arith.constant dense<0.000000e+00> : vector<8xf32>
    %49 = vector.multi_reduction <add>, %48, %cst_31 [1] : vector<8x128xf32> to vector<8xf32>
    %50 = vector.shape_cast %49 : vector<8xf32> to vector<8x1xf32>
    %cst_32 = arith.constant 1.280000e+02 : f32
    %51 = vector.broadcast %cst_32 : f32 to vector<8x1xf32>
    %52 = arith.divf %50, %51 : vector<8x1xf32>
    %53 = arith.mulf %48, %48 : vector<8x128xf32>
    %cst_33 = arith.constant dense<0.000000e+00> : vector<8xf32>
    %54 = vector.multi_reduction <add>, %53, %cst_33 [1] : vector<8x128xf32> to vector<8xf32>
    %55 = vector.shape_cast %54 : vector<8xf32> to vector<8x1xf32>
    %cst_34 = arith.constant 1.280000e+02 : f32
    %56 = vector.broadcast %cst_34 : f32 to vector<8x1xf32>
    %57 = arith.divf %55, %56 : vector<8x1xf32>
    %58 = arith.mulf %52, %52 : vector<8x1xf32>
    %59 = arith.subf %57, %58 : vector<8x1xf32>
    %cst_35 = arith.constant 0.000000e+00 : f32
    %60 = vector.broadcast %cst_35 : f32 to vector<8x1xf32>
    %61 = arith.maximumf %59, %60 : vector<8x1xf32>
    %62 = vector.broadcast %52 : vector<8x1xf32> to vector<8x128xf32>
    %63 = arith.subf %48, %62 : vector<8x128xf32>
    %cst_36 = arith.constant 9.99999974E-6 : f32
    %64 = vector.broadcast %cst_36 : f32 to vector<8x1xf32>
    %65 = arith.addf %61, %64 : vector<8x1xf32>
    %66 = math.rsqrt %65 : vector<8x1xf32>
    %67 = vector.broadcast %66 : vector<8x1xf32> to vector<8x128xf32>
    %68 = arith.mulf %63, %67 : vector<8x128xf32>
    %69 = vector.broadcast %45 : vector<1x128xf32> to vector<8x128xf32>
    %70 = arith.mulf %68, %69 : vector<8x128xf32>
    %71 = vector.broadcast %46 : vector<1x128xf32> to vector<8x128xf32>
    %72 = arith.addf %70, %71 : vector<8x128xf32>
    %73 = arith.truncf %72 : vector<8x128xf32> to vector<8x128xbf16>
    %c0_37 = arith.constant 0 : index
    %c0_38 = arith.constant 0 : index
    %74 = vector.load %arg17[%c0_37, %c0_38] : memref<128x128xbf16, #tpu.memory_space<vmem>>, vector<128x128xbf16>
    %cst_39 = arith.constant dense<0.000000e+00> : vector<8x128xf32>
    %75 = tpu.matmul %73, %74, %cst_39 {dimension_numbers = #tpu.dot_dimension_numbers<[1], [0], [0], [1], [0, 0, 1, 1], [], []>} : vector<8x128xbf16>, vector<128x128xbf16>, vector<8x128xf32> -> vector<8x128xf32>
    %76 = arith.addf %37, %75 : vector<8x128xf32>
    %c0_40 = arith.constant 0 : index
    %c0_41 = arith.constant 0 : index
    %77 = vector.load %arg3[%c0_40, %c0_41] : memref<8x23xf32, #tpu.memory_space<vmem>>, vector<8x23xf32>
    %78 = arith.truncf %77 : vector<8x23xf32> to vector<8x23xbf16>
    %c0_42 = arith.constant 0 : index
    %c0_43 = arith.constant 0 : index
    %79 = vector.load %arg12[%c0_42, %c0_43] : memref<23x128xbf16, #tpu.memory_space<vmem>>, vector<23x128xbf16>
    %cst_44 = arith.constant dense<0.000000e+00> : vector<8x128xf32>
    %80 = tpu.matmul %78, %79, %cst_44 {dimension_numbers = #tpu.dot_dimension_numbers<[1], [0], [0], [1], [0, 0, 1, 1], [], []>} : vector<8x23xbf16>, vector<23x128xbf16>, vector<8x128xf32> -> vector<8x128xf32>
    %c0_45 = arith.constant 0 : index
    %c0_46 = arith.constant 0 : index
    %81 = vector.load %arg13[%c0_45, %c0_46] : memref<1x128xf32, #tpu.memory_space<vmem>>, vector<1x128xf32>
    %82 = vector.broadcast %81 : vector<1x128xf32> to vector<8x128xf32>
    %83 = arith.addf %80, %82 : vector<8x128xf32>
    %c0_47 = arith.constant 0 : index
    %c0_48 = arith.constant 0 : index
    %84 = vector.load %arg14[%c0_47, %c0_48] : memref<1x128xf32, #tpu.memory_space<vmem>>, vector<1x128xf32>
    %c0_49 = arith.constant 0 : index
    %c0_50 = arith.constant 0 : index
    %85 = vector.load %arg15[%c0_49, %c0_50] : memref<1x128xf32, #tpu.memory_space<vmem>>, vector<1x128xf32>
    %cst_51 = arith.constant 0.000000e+00 : f32
    %86 = vector.broadcast %cst_51 : f32 to vector<8x128xf32>
    %87 = arith.maximumf %83, %86 : vector<8x128xf32>
    %cst_52 = arith.constant dense<0.000000e+00> : vector<8xf32>
    %88 = vector.multi_reduction <add>, %87, %cst_52 [1] : vector<8x128xf32> to vector<8xf32>
    %89 = vector.shape_cast %88 : vector<8xf32> to vector<8x1xf32>
    %cst_53 = arith.constant 1.280000e+02 : f32
    %90 = vector.broadcast %cst_53 : f32 to vector<8x1xf32>
    %91 = arith.divf %89, %90 : vector<8x1xf32>
    %92 = arith.mulf %87, %87 : vector<8x128xf32>
    %cst_54 = arith.constant dense<0.000000e+00> : vector<8xf32>
    %93 = vector.multi_reduction <add>, %92, %cst_54 [1] : vector<8x128xf32> to vector<8xf32>
    %94 = vector.shape_cast %93 : vector<8xf32> to vector<8x1xf32>
    %cst_55 = arith.constant 1.280000e+02 : f32
    %95 = vector.broadcast %cst_55 : f32 to vector<8x1xf32>
    %96 = arith.divf %94, %95 : vector<8x1xf32>
    %97 = arith.mulf %91, %91 : vector<8x1xf32>
    %98 = arith.subf %96, %97 : vector<8x1xf32>
    %cst_56 = arith.constant 0.000000e+00 : f32
    %99 = vector.broadcast %cst_56 : f32 to vector<8x1xf32>
    %100 = arith.maximumf %98, %99 : vector<8x1xf32>
    %101 = vector.broadcast %91 : vector<8x1xf32> to vector<8x128xf32>
    %102 = arith.subf %87, %101 : vector<8x128xf32>
    %cst_57 = arith.constant 9.99999974E-6 : f32
    %103 = vector.broadcast %cst_57 : f32 to vector<8x1xf32>
    %104 = arith.addf %100, %103 : vector<8x1xf32>
    %105 = math.rsqrt %104 : vector<8x1xf32>
    %106 = vector.broadcast %105 : vector<8x1xf32> to vector<8x128xf32>
    %107 = arith.mulf %102, %106 : vector<8x128xf32>
    %108 = vector.broadcast %84 : vector<1x128xf32> to vector<8x128xf32>
    %109 = arith.mulf %107, %108 : vector<8x128xf32>
    %110 = vector.broadcast %85 : vector<1x128xf32> to vector<8x128xf32>
    %111 = arith.addf %109, %110 : vector<8x128xf32>
    %112 = arith.truncf %111 : vector<8x128xf32> to vector<8x128xbf16>
    %c0_58 = arith.constant 0 : index
    %c0_59 = arith.constant 0 : index
    %113 = vector.load %arg18[%c0_58, %c0_59] : memref<128x128xbf16, #tpu.memory_space<vmem>>, vector<128x128xbf16>
    %cst_60 = arith.constant dense<0.000000e+00> : vector<8x128xf32>
    %114 = tpu.matmul %112, %113, %cst_60 {dimension_numbers = #tpu.dot_dimension_numbers<[1], [0], [0], [1], [0, 0, 1, 1], [], []>} : vector<8x128xbf16>, vector<128x128xbf16>, vector<8x128xf32> -> vector<8x128xf32>
    %115 = arith.addf %76, %114 : vector<8x128xf32>
    %c0_61 = arith.constant 0 : index
    %c0_62 = arith.constant 0 : index
    %116 = vector.load %arg19[%c0_61, %c0_62] : memref<1x128xf32, #tpu.memory_space<vmem>>, vector<1x128xf32>
    %117 = vector.broadcast %116 : vector<1x128xf32> to vector<8x128xf32>
    %118 = arith.addf %115, %117 : vector<8x128xf32>
    %c0_63 = arith.constant 0 : index
    %c0_64 = arith.constant 0 : index
    %119 = vector.load %arg20[%c0_63, %c0_64] : memref<1x128xf32, #tpu.memory_space<vmem>>, vector<1x128xf32>
    %c0_65 = arith.constant 0 : index
    %c0_66 = arith.constant 0 : index
    %120 = vector.load %arg21[%c0_65, %c0_66] : memref<1x128xf32, #tpu.memory_space<vmem>>, vector<1x128xf32>
    %cst_67 = arith.constant 0.000000e+00 : f32
    %121 = vector.broadcast %cst_67 : f32 to vector<8x128xf32>
    %122 = arith.maximumf %118, %121 : vector<8x128xf32>
    %cst_68 = arith.constant dense<0.000000e+00> : vector<8xf32>
    %123 = vector.multi_reduction <add>, %122, %cst_68 [1] : vector<8x128xf32> to vector<8xf32>
    %124 = vector.shape_cast %123 : vector<8xf32> to vector<8x1xf32>
    %cst_69 = arith.constant 1.280000e+02 : f32
    %125 = vector.broadcast %cst_69 : f32 to vector<8x1xf32>
    %126 = arith.divf %124, %125 : vector<8x1xf32>
    %127 = arith.mulf %122, %122 : vector<8x128xf32>
    %cst_70 = arith.constant dense<0.000000e+00> : vector<8xf32>
    %128 = vector.multi_reduction <add>, %127, %cst_70 [1] : vector<8x128xf32> to vector<8xf32>
    %129 = vector.shape_cast %128 : vector<8xf32> to vector<8x1xf32>
    %cst_71 = arith.constant 1.280000e+02 : f32
    %130 = vector.broadcast %cst_71 : f32 to vector<8x1xf32>
    %131 = arith.divf %129, %130 : vector<8x1xf32>
    %132 = arith.mulf %126, %126 : vector<8x1xf32>
    %133 = arith.subf %131, %132 : vector<8x1xf32>
    %cst_72 = arith.constant 0.000000e+00 : f32
    %134 = vector.broadcast %cst_72 : f32 to vector<8x1xf32>
    %135 = arith.maximumf %133, %134 : vector<8x1xf32>
    %136 = vector.broadcast %126 : vector<8x1xf32> to vector<8x128xf32>
    %137 = arith.subf %122, %136 : vector<8x128xf32>
    %cst_73 = arith.constant 9.99999974E-6 : f32
    %138 = vector.broadcast %cst_73 : f32 to vector<8x1xf32>
    %139 = arith.addf %135, %138 : vector<8x1xf32>
    %140 = math.rsqrt %139 : vector<8x1xf32>
    %141 = vector.broadcast %140 : vector<8x1xf32> to vector<8x128xf32>
    %142 = arith.mulf %137, %141 : vector<8x128xf32>
    %143 = vector.broadcast %119 : vector<1x128xf32> to vector<8x128xf32>
    %144 = arith.mulf %142, %143 : vector<8x128xf32>
    %145 = vector.broadcast %120 : vector<1x128xf32> to vector<8x128xf32>
    %146 = arith.addf %144, %145 : vector<8x128xf32>
    %147 = arith.truncf %146 : vector<8x128xf32> to vector<8x128xbf16>
    %c0_74 = arith.constant 0 : index
    %c0_75 = arith.constant 0 : index
    %148 = vector.load %arg22[%c0_74, %c0_75] : memref<128x128xbf16, #tpu.memory_space<vmem>>, vector<128x128xbf16>
    %cst_76 = arith.constant dense<0.000000e+00> : vector<8x128xf32>
    %149 = tpu.matmul %147, %148, %cst_76 {dimension_numbers = #tpu.dot_dimension_numbers<[1], [0], [0], [1], [0, 0, 1, 1], [], []>} : vector<8x128xbf16>, vector<128x128xbf16>, vector<8x128xf32> -> vector<8x128xf32>
    %c0_77 = arith.constant 0 : index
    %c0_78 = arith.constant 0 : index
    %150 = vector.load %arg23[%c0_77, %c0_78] : memref<1x128xf32, #tpu.memory_space<vmem>>, vector<1x128xf32>
    %151 = vector.broadcast %150 : vector<1x128xf32> to vector<8x128xf32>
    %152 = arith.addf %149, %151 : vector<8x128xf32>
    %c0_79 = arith.constant 0 : index
    %c0_80 = arith.constant 0 : index
    %153 = vector.load %arg24[%c0_79, %c0_80] : memref<8x128xf32, #tpu.memory_space<vmem>>, vector<8x128xf32>
    tpu.vector_store %arg24[%c0_79, %c0_80], %152 {strides = array<i32>} : memref<8x128xf32, #tpu.memory_space<vmem>>, vector<8x128xf32>,
    return
  }
  func.func @transform_0(%arg0: i32) -> (i32, i32) {
    %c0_i32 = arith.constant 0 : i32
    %c0_i32_0 = arith.constant 0 : i32
    return %arg0, %c0_i32 : i32, i32
  }
  func.func @transform_1(%arg0: i32) -> (i32, i32) {
    %c0_i32 = arith.constant 0 : i32
    %c0_i32_0 = arith.constant 0 : i32
    return %arg0, %c0_i32 : i32, i32
  }
  func.func @transform_2(%arg0: i32) -> (i32, i32) {
    %c0_i32 = arith.constant 0 : i32
    %c0_i32_0 = arith.constant 0 : i32
    return %arg0, %c0_i32 : i32, i32
  }
  func.func @transform_3(%arg0: i32) -> (i32, i32) {
    %c0_i32 = arith.constant 0 : i32
    %c0_i32_0 = arith.constant 0 : i32
    %c0_i32_1 = arith.constant 0 : i32
    return %c0_i32, %c0_i32_0 : i32, i32
  }
  func.func @transform_4(%arg0: i32) -> (i32, i32) {
    %c0_i32 = arith.constant 0 : i32
    %c0_i32_0 = arith.constant 0 : i32
    %c0_i32_1 = arith.constant 0 : i32
    return %c0_i32, %c0_i32_0 : i32, i32
  }
  func.func @transform_5(%arg0: i32) -> (i32, i32) {
    %c0_i32 = arith.constant 0 : i32
    %c0_i32_0 = arith.constant 0 : i32
    %c0_i32_1 = arith.constant 0 : i32
    return %c0_i32, %c0_i32_0 : i32, i32
  }
  func.func @transform_6(%arg0: i32) -> (i32, i32) {
    %c0_i32 = arith.constant 0 : i32
    %c0_i32_0 = arith.constant 0 : i32
    %c0_i32_1 = arith.constant 0 : i32
    return %c0_i32, %c0_i32_0 : i32, i32
  }
  func.func @transform_7(%arg0: i32) -> (i32, i32) {
    %c0_i32 = arith.constant 0 : i32
    %c0_i32_0 = arith.constant 0 : i32
    %c0_i32_1 = arith.constant 0 : i32
    return %c0_i32, %c0_i32_0 : i32, i32
  }
  func.func @transform_8(%arg0: i32) -> (i32, i32) {
    %c0_i32 = arith.constant 0 : i32
    %c0_i32_0 = arith.constant 0 : i32
    %c0_i32_1 = arith.constant 0 : i32
    return %c0_i32, %c0_i32_0 : i32, i32
  }
  func.func @transform_9(%arg0: i32) -> (i32, i32) {
    %c0_i32 = arith.constant 0 : i32
    %c0_i32_0 = arith.constant 0 : i32
    %c0_i32_1 = arith.constant 0 : i32
    return %c0_i32, %c0_i32_0 : i32, i32
  }
  func.func @transform_10(%arg0: i32) -> (i32, i32) {
    %c0_i32 = arith.constant 0 : i32
    %c0_i32_0 = arith.constant 0 : i32
    %c0_i32_1 = arith.constant 0 : i32
    return %c0_i32, %c0_i32_0 : i32, i32
  }
  func.func @transform_11(%arg0: i32) -> (i32, i32) {
    %c0_i32 = arith.constant 0 : i32
    %c0_i32_0 = arith.constant 0 : i32
    %c0_i32_1 = arith.constant 0 : i32
    return %c0_i32, %c0_i32_0 : i32, i32
  }
  func.func @transform_12(%arg0: i32) -> (i32, i32) {
    %c0_i32 = arith.constant 0 : i32
    %c0_i32_0 = arith.constant 0 : i32
    %c0_i32_1 = arith.constant 0 : i32
    return %c0_i32, %c0_i32_0 : i32, i32
  }
  func.func @transform_13(%arg0: i32) -> (i32, i32) {
    %c0_i32 = arith.constant 0 : i32
    %c0_i32_0 = arith.constant 0 : i32
    %c0_i32_1 = arith.constant 0 : i32
    return %c0_i32, %c0_i32_0 : i32, i32
  }
  func.func @transform_14(%arg0: i32) -> (i32, i32) {
    %c0_i32 = arith.constant 0 : i32
    %c0_i32_0 = arith.constant 0 : i32
    %c0_i32_1 = arith.constant 0 : i32
    return %c0_i32, %c0_i32_0 : i32, i32
  }
  func.func @transform_15(%arg0: i32) -> (i32, i32) {
    %c0_i32 = arith.constant 0 : i32
    %c0_i32_0 = arith.constant 0 : i32
    %c0_i32_1 = arith.constant 0 : i32
    return %c0_i32, %c0_i32_0 : i32, i32
  }
  func.func @transform_16(%arg0: i32) -> (i32, i32) {
    %c0_i32 = arith.constant 0 : i32
    %c0_i32_0 = arith.constant 0 : i32
    %c0_i32_1 = arith.constant 0 : i32
    return %c0_i32, %c0_i32_0 : i32, i32
  }
  func.func @transform_17(%arg0: i32) -> (i32, i32) {
    %c0_i32 = arith.constant 0 : i32
    %c0_i32_0 = arith.constant 0 : i32
    %c0_i32_1 = arith.constant 0 : i32
    return %c0_i32, %c0_i32_0 : i32, i32
  }
  func.func @transform_18(%arg0: i32) -> (i32, i32) {
    %c0_i32 = arith.constant 0 : i32
    %c0_i32_0 = arith.constant 0 : i32
    %c0_i32_1 = arith.constant 0 : i32
    return %c0_i32, %c0_i32_0 : i32, i32
  }
  func.func @transform_19(%arg0: i32) -> (i32, i32) {
    %c0_i32 = arith.constant 0 : i32
    %c0_i32_0 = arith.constant 0 : i32
    %c0_i32_1 = arith.constant 0 : i32
    return %c0_i32, %c0_i32_0 : i32, i32
  }
  func.func @transform_20(%arg0: i32) -> (i32, i32) {
    %c0_i32 = arith.constant 0 : i32
    %c0_i32_0 = arith.constant 0 : i32
    %c0_i32_1 = arith.constant 0 : i32
    return %c0_i32, %c0_i32_0 : i32, i32
  }
  func.func @transform_21(%arg0: i32) -> (i32, i32) {
    %c0_i32 = arith.constant 0 : i32
    %c0_i32_0 = arith.constant 0 : i32
    %c0_i32_1 = arith.constant 0 : i32
    return %c0_i32, %c0_i32_0 : i32, i32
  }
  func.func @transform_22(%arg0: i32) -> (i32, i32) {
    %c0_i32 = arith.constant 0 : i32
    %c0_i32_0 = arith.constant 0 : i32
    %c0_i32_1 = arith.constant 0 : i32
    return %c0_i32, %c0_i32_0 : i32, i32
  }
  func.func @transform_23(%arg0: i32) -> (i32, i32) {
    %c0_i32 = arith.constant 0 : i32
    %c0_i32_0 = arith.constant 0 : i32
    return %arg0, %c0_i32 : i32, i32
  }
}

</mosaic_0001>

<bundles_post_ra>
// kernel: tpu_custom_call.1
= control target key start
LH: loop header
LB: loop body
LE: loop exit
PB: predicated region body
PF: predicated region fallthrough
CT: control target
= control target key end

     0   :  { %s2385_s0 = inlined_call_operand.hbm [shape: f32[8,64], index: 0, kind: input, shape index: {}]   ;;  %s2386_s1 = inlined_call_operand.hbm [shape: f32[8,64], index: 1, kind: input, shape index: {}]   ;;  %s2387_s2 = inlined_call_operand.hbm [shape: f32[8,23], index: 2, kind: input, shape index: {}]   ;;  %s2388_s3 = inlined_call_operand.hbm [shape: bf16[64,128], index: 3, kind: input, shape index: {}]   ;;  %s2389_s4 = inlined_call_operand.hbm [shape: f32[1,128], index: 4, kind: input, shape index: {}]   ;;  %s2390_s5 = inlined_call_operand.hbm [shape: f32[1,128], index: 5, kind: input, shape index: {}]   ;;  %s2391_s6 = inlined_call_operand.hbm [shape: f32[1,128], index: 6, kind: input, shape index: {}]   ;;  %s2392_s7 = inlined_call_operand.hbm [shape: bf16[64,128], index: 7, kind: input, shape index: {}]   ;;  %s2393_s8 = inlined_call_operand.hbm [shape: f32[1,128], index: 8, kind: input, shape index: {}]   ;;  %s2394_s9 = inlined_call_operand.hbm [shape: f32[1,128], index: 9, kind: input, shape index: {}]   ;;  %s2395_s10 = inlined_call_operand.hbm [shape: f32[1,128], index: 10, kind: input, shape index: {}]   ;;  %s2396_s11 = inlined_call_operand.hbm [shape: bf16[23,128], index: 11, kind: input, shape index: {}]   ;;  %s2397_s12 = inlined_call_operand.hbm [shape: f32[1,128], index: 12, kind: input, shape index: {}]   ;;  %s2398_s13 = inlined_call_operand.hbm [shape: f32[1,128], index: 13, kind: input, shape index: {}]   ;;  %s2399_s14 = inlined_call_operand.hbm [shape: f32[1,128], index: 14, kind: input, shape index: {}]   ;;  %s2400_s15 = inlined_call_operand.hbm [shape: bf16[128,128], index: 15, kind: input, shape index: {}]   ;;  %s2401_s16 = inlined_call_operand.hbm [shape: bf16[128,128], index: 16, kind: input, shape index: {}]   ;;  %s2402_s17 = inlined_call_operand.vmem [shape: bf16[128,128], index: 17, kind: input, shape index: {}]   ;;  %s2403_s18 = inlined_call_operand.vmem [shape: f32[1,128], index: 18, kind: input, shape index: {}]   ;;  %s2404_s19 = inlined_call_operand.vmem [shape: f32[1,128], index: 19, kind: input, shape index: {}]   ;;  %s2405_s20 = inlined_call_operand.vmem [shape: f32[1,128], index: 20, kind: input, shape index: {}]   ;;  %s2406_s21 = inlined_call_operand.hbm [shape: bf16[128,128], index: 21, kind: input, shape index: {}]   ;;  %s2407_s22 = inlined_call_operand.vmem [shape: f32[1,128], index: 22, kind: input, shape index: {}]   ;;  %s2408_s23 = inlined_call_operand.hbm [shape: f32[8,128], index: 23, kind: output, shape index: {}]  }
   0x1   :  { %2418 = sst [smem:[#allocation43_spill]] %s2385_s0 }
   0x2   :  { %2419 = sst [smem:[#allocation44_spill]] %s2386_s1 }
   0x3   :  { %2420 = sst [smem:[#allocation45_spill]] %s2387_s2 }
   0x4   :  { %2421 = sst [smem:[#allocation46_spill]] %s2388_s3 }
   0x5   :  { %2422 = sst [smem:[#allocation47_spill]] %s2389_s4 }
   0x6   :  { %2423 = sst [smem:[#allocation48_spill]] %s2390_s5 }
   0x7   :  { %2424 = sst [smem:[#allocation49_spill]] %s2391_s6 }
   0x8   :  { %2425 = sst [smem:[#allocation50_spill]] %s2392_s7 }
   0x9   :  { %2426 = sst [smem:[#allocation51_spill]] %s2405_s20 }
   0xa   :  { %2427 = sst [smem:[#allocation52_spill]] %s2407_s22 }
   0xb   :  { %2428 = sst [smem:[#allocation53_spill]] %s2408_s23 }
   0xc   :  { %28 = vsyncpa [#allocation3], 0 }
   0xd   :  { %29 = vsyncpa [#allocation6], 0 }
   0xe   :  { %30 = vsyncpa [#allocation9], 0 }
   0xf   :  { %31 = vsyncpa [#allocation12], 0 }
  0x10   :  { %32 = vsyncpa [#allocation15], 0 }
  0x11   :  { %33 = vsyncpa [#allocation18], 0 }
  0x12   :  { %34 = vsyncpa [#allocation21], 0 }
  0x13   :  { %35 = vsyncpa [#allocation24], 0 }
  0x14   :  { %36 = vsyncpa [#allocation27], 0 }
  0x15   :  { %37 = vsyncpa [#allocation30], 0 }
  0x16   :  { %38 = vsyncpa [#allocation4], 0  ;;  %s1856_s4 = smov [#allocation5]   ;;  %s1857_s24 = smov [#allocation8]  }
  0x17   :  { %s55_s30 = sshll.u32 %s1856_s4, 4  ;;  %s74_s25 = sshll.u32 %s1857_s24, 4  ;;  %s56_s30 = int_to_ptr.vmem [resolvable:$true] %s55_s30  ;;  %s2000_s25 = int_to_ptr.vmem [resolvable:$true] %s74_s25 }
  0x18   :  { %s2429_s26 = sld [smem:[#allocation44_spill]] }
  0x1e   :  { %s1416_s2 = scalar_lea.hbm %s2429_s26, 128 }
  0x1f   :  { %p1417_p0 = scmp.ne.s32.totalorder %s2429_s26, %s1416_s2  ;;  %p1420_p1 = scmp.lt.u32.totalorder %s1416_s2, %s2429_s26 }
  0x21   :  { %p1422_p2 = pnand %p1420_p1, %p1417_p0 }
  0x23   :  { %1425 = shalt.err (!%p1422_p2)
}
  0x24   :  { %s1426_s29 = scalar_lea.vmem %s56_s30, 128  ;;  %p1431_p4 = scmp.lt.s32.totalorder %s56_s30, %s56_s30 }
  0x25   :  { %p1427_p3 = scmp.ne.s32.totalorder %s56_s30, %s1426_s29  ;;  %p1432_p5 = scmp.lt.s32.totalorder %s1426_s29, %s1426_s29 }
  0x27   :  { %p1433_p6 = por %p1432_p5, %p1431_p4 }
  0x29   :  { %p1434_p7 = pnand %p1433_p6, %p1427_p3 }
  0x2b   :  { %1437 = shalt.err (!%p1434_p7)
}
  0x2c   :  { %58 = dma.hbm_to_vmem [thread:$0]  %s2429_s26, 128, %s56_s30, [#allocation6]  }
  0x2d   :  { %s2430_s5 = sld [smem:[#allocation46_spill]] }
  0x33   :  { %s1438_s1 = scalar_lea.hbm %s2430_s5, 512 }
  0x34   :  { %p1439_p8 = scmp.ne.s32.totalorder %s2430_s5, %s1438_s1  ;;  %p1442_p9 = scmp.lt.u32.totalorder %s1438_s1, %s2430_s5 }
  0x36   :  { %p1444_p10 = pnand %p1442_p9, %p1439_p8 }
  0x38   :  { %1447 = shalt.err (!%p1444_p10)
}
  0x39   :  { %s1448_s28 = scalar_lea.vmem %s2000_s25, 512  ;;  %p1453_p12 = scmp.lt.s32.totalorder %s2000_s25, %s2000_s25 }
  0x3a   :  { %p1449_p11 = scmp.ne.s32.totalorder %s2000_s25, %s1448_s28  ;;  %p1454_p13 = scmp.lt.s32.totalorder %s1448_s28, %s1448_s28 }
  0x3c   :  { %p1455_p0 = por %p1454_p13, %p1453_p12 }
  0x3e   :  { %p1456_p1 = pnand %p1455_p0, %p1449_p11 }
  0x40   :  { %1459 = shalt.err (!%p1456_p1)
}
  0x41   :  { %s1858_s30 = smov 64   ;;  %s1859_s26 = smov 4  }
  0x42   :  { %80 = dma.hbm_to_vmem [thread:$0]  %s2430_s5, 512, %s2000_s25, [#allocation9], %s1858_s30, %s1858_s30, %s1859_s26  }
  0x43   :  { %s1860_s0 = smov [#allocation11]   ;;  %s1861_s24 = smov [#allocation14]  }
  0x44   :  { %s97_s4 = sshll.u32 %s1860_s0, 4  ;;  %s116_s1 = sshll.u32 %s1861_s24, 4  ;;  %s98_s4 = int_to_ptr.vmem [resolvable:$true] %s97_s4  ;;  %s2034_s1 = int_to_ptr.vmem [resolvable:$true] %s116_s1 }
  0x45   :  { %s2431_s2 = sld [smem:[#allocation48_spill]] }
  0x4b   :  { %s1460_s7 = scalar_lea.hbm %s2431_s2, 16 }
  0x4c   :  { %p1461_p2 = scmp.ne.s32.totalorder %s2431_s2, %s1460_s7  ;;  %p1464_p3 = scmp.lt.u32.totalorder %s1460_s7, %s2431_s2 }
  0x4e   :  { %p1466_p4 = pnand %p1464_p3, %p1461_p2 }
  0x50   :  { %1469 = shalt.err (!%p1466_p4)
}
  0x51   :  { %s1470_s25 = scalar_lea.vmem %s98_s4, 16  ;;  %s1474_s5 = scalar_lea.vmem %s98_s4, 32 }
  0x52   :  { %p1471_p5 = scmp.ne.s32.totalorder %s98_s4, %s1470_s25  ;;  %p1475_p6 = scmp.lt.s32.totalorder %s98_s4, %s98_s4 }
  0x53   :  { %p1476_p7 = scmp.lt.s32.totalorder %s1474_s5, %s1470_s25 }
  0x55   :  { %p1477_p8 = por %p1476_p7, %p1475_p6 }
  0x57   :  { %p1478_p9 = pnand %p1477_p8, %p1471_p5 }
  0x59   :  { %1481 = shalt.err (!%p1478_p9)
}
  0x5a   :  { %100 = dma.hbm_to_vmem [thread:$0]  %s2431_s2, 16, %s98_s4, [#allocation12]  }
  0x5b   :  { %s2432_s24 = sld [smem:[#allocation50_spill]] }
  0x61   :  { %s1482_s6 = scalar_lea.hbm %s2432_s24, 512 }
  0x62   :  { %p1483_p10 = scmp.ne.s32.totalorder %s2432_s24, %s1482_s6  ;;  %p1486_p11 = scmp.lt.u32.totalorder %s1482_s6, %s2432_s24 }
  0x64   :  { %p1488_p12 = pnand %p1486_p11, %p1483_p10 }
  0x66   :  { %1491 = shalt.err (!%p1488_p12)
}
  0x67   :  { %s1492_s28 = scalar_lea.vmem %s2034_s1, 512  ;;  %p1497_p0 = scmp.lt.s32.totalorder %s2034_s1, %s2034_s1 }
  0x68   :  { %p1493_p13 = scmp.ne.s32.totalorder %s2034_s1, %s1492_s28  ;;  %p1498_p1 = scmp.lt.s32.totalorder %s1492_s28, %s1492_s28 }
  0x6a   :  { %p1499_p2 = por %p1498_p1, %p1497_p0 }
  0x6c   :  { %p1500_p3 = pnand %p1499_p2, %p1493_p13 }
  0x6e   :  { %1503 = shalt.err (!%p1500_p3)
}
  0x6f   :  { %122 = dma.hbm_to_vmem [thread:$0]  %s2432_s24, 512, %s2034_s1, [#allocation15], %s1858_s30, %s1858_s30, %s1859_s26  }
  0x70   :  { %s1862_s25 = smov [#allocation17]   ;;  %s1863_s29 = smov [#allocation20]  }
  0x71   :  { %s139_s5 = sshll.u32 %s1862_s25, 4  ;;  %s158_s3 = sshll.u32 %s1863_s29, 4  ;;  %s140_s5 = int_to_ptr.vmem [resolvable:$true] %s139_s5  ;;  %s2068_s3 = int_to_ptr.vmem [resolvable:$true] %s158_s3 }
  0x72   :  { %s1504_s6 = scalar_lea.hbm %s2394_s9, 16 }
  0x73   :  { %p1505_p4 = scmp.ne.s32.totalorder %s2394_s9, %s1504_s6  ;;  %p1508_p5 = scmp.lt.u32.totalorder %s1504_s6, %s2394_s9 }
  0x75   :  { %p1510_p6 = pnand %p1508_p5, %p1505_p4 }
  0x77   :  { %1513 = shalt.err (!%p1510_p6)
}
  0x78   :  { %s1514_s1 = scalar_lea.vmem %s140_s5, 16  ;;  %s1518_s24 = scalar_lea.vmem %s140_s5, 32 }
  0x79   :  { %p1515_p7 = scmp.ne.s32.totalorder %s140_s5, %s1514_s1  ;;  %p1519_p8 = scmp.lt.s32.totalorder %s140_s5, %s140_s5 }
  0x7a   :  { %p1520_p9 = scmp.lt.s32.totalorder %s1518_s24, %s1514_s1 }
  0x7c   :  { %p1521_p10 = por %p1520_p9, %p1519_p8 }
  0x7e   :  { %p1522_p11 = pnand %p1521_p10, %p1515_p7 }
  0x80   :  { %1525 = shalt.err (!%p1522_p11)
}
  0x81   :  { %142 = dma.hbm_to_vmem [thread:$0]  %s2394_s9, 16, %s140_s5, [#allocation18]  }
  0x82   :  { %s1526_s29 = scalar_lea.hbm %s2396_s11, 192 }
  0x83   :  { %p1527_p12 = scmp.ne.s32.totalorder %s2396_s11, %s1526_s29  ;;  %p1530_p13 = scmp.lt.u32.totalorder %s1526_s29, %s2396_s11 }
  0x85   :  { %p1532_p0 = pnand %p1530_p13, %p1527_p12 }
  0x87   :  { %1535 = shalt.err (!%p1532_p0)
}
  0x88   :  { %s1536_s22 = scalar_lea.vmem %s2068_s3, 192  ;;  %p1541_p2 = scmp.lt.s32.totalorder %s2068_s3, %s2068_s3 }
  0x89   :  { %p1537_p1 = scmp.ne.s32.totalorder %s2068_s3, %s1536_s22  ;;  %p1542_p3 = scmp.lt.s32.totalorder %s1536_s22, %s1536_s22 }
  0x8b   :  { %p1543_p4 = por %p1542_p3, %p1541_p2 }
  0x8d   :  { %p1544_p5 = pnand %p1543_p4, %p1537_p1 }
  0x8f   :  { %1547 = shalt.err (!%p1544_p5)
}
  0x90   :  { %164 = dma.hbm_to_vmem [thread:$0]  %s2396_s11, 192, %s2068_s3, [#allocation21], %s1858_s30, %s1858_s30, %s1859_s26  }
  0x91   :  { %s1864_s27 = smov [#allocation23]   ;;  %s1865_s1 = smov [#allocation26]  }
  0x92   :  { %s181_s7 = sshll.u32 %s1864_s27, 4  ;;  %s200_s24 = sshll.u32 %s1865_s1, 4  ;;  %s182_s7 = int_to_ptr.vmem [resolvable:$true] %s181_s7  ;;  %s2102_s24 = int_to_ptr.vmem [resolvable:$true] %s200_s24 }
  0x93   :  { %s1548_s2 = scalar_lea.hbm %s2398_s13, 16 }
  0x94   :  { %p1549_p6 = scmp.ne.s32.totalorder %s2398_s13, %s1548_s2  ;;  %p1552_p7 = scmp.lt.u32.totalorder %s1548_s2, %s2398_s13 }
  0x96   :  { %p1554_p8 = pnand %p1552_p7, %p1549_p6 }
  0x98   :  { %1557 = shalt.err (!%p1554_p8)
}
  0x99   :  { %s1558_s11 = scalar_lea.vmem %s182_s7, 16  ;;  %s1562_s3 = scalar_lea.vmem %s182_s7, 32 }
  0x9a   :  { %p1559_p9 = scmp.ne.s32.totalorder %s182_s7, %s1558_s11  ;;  %p1563_p10 = scmp.lt.s32.totalorder %s182_s7, %s182_s7 }
  0x9b   :  { %p1564_p11 = scmp.lt.s32.totalorder %s1562_s3, %s1558_s11 }
  0x9d   :  { %p1565_p12 = por %p1564_p11, %p1563_p10 }
  0x9f   :  { %p1566_p13 = pnand %p1565_p12, %p1559_p9 }
  0xa1   :  { %1569 = shalt.err (!%p1566_p13)
}
  0xa2   :  { %184 = dma.hbm_to_vmem [thread:$0]  %s2398_s13, 16, %s182_s7, [#allocation24]  }
  0xa3   :  { %s1570_s5 = scalar_lea.hbm %s2400_s15, 1024 }
  0xa4   :  { %p1571_p0 = scmp.ne.s32.totalorder %s2400_s15, %s1570_s5  ;;  %p1574_p1 = scmp.lt.u32.totalorder %s1570_s5, %s2400_s15 }
  0xa6   :  { %p1576_p2 = pnand %p1574_p1, %p1571_p0 }
  0xa8   :  { %1579 = shalt.err (!%p1576_p2)
}
  0xa9   :  { %s1580_s2 = scalar_lea.vmem %s2102_s24, 1024  ;;  %p1585_p4 = scmp.lt.s32.totalorder %s2102_s24, %s2102_s24 }
  0xaa   :  { %p1581_p3 = scmp.ne.s32.totalorder %s2102_s24, %s1580_s2  ;;  %p1586_p5 = scmp.lt.s32.totalorder %s1580_s2, %s1580_s2 }
  0xac   :  { %p1587_p6 = por %p1586_p5, %p1585_p4 }
  0xae   :  { %p1588_p7 = pnand %p1587_p6, %p1581_p3 }
  0xb0   :  { %1591 = shalt.err (!%p1588_p7)
}
  0xb1   :  { %206 = dma.hbm_to_vmem [thread:$0]  %s2400_s15, 1024, %s2102_s24, [#allocation27], %s1858_s30, %s1858_s30, %s1859_s26  }
  0xb2   :  { %s1866_s25 = smov [#allocation2]   ;;  %s1867_s23 = smov [#allocation7]  }
  0xb3   :  { %s45_s29 = sshll.u32 %s1866_s25, 4  ;;  %s65_s0 = sshll.u32 %s1867_s23, 4  ;;  %s46_s29 = int_to_ptr.vmem [resolvable:$true] %s45_s29  ;;  %s66_s0 = int_to_ptr.vmem [resolvable:$true] %s65_s0 }
  0xb4   :  { %s2433_s6 = sld [smem:[#allocation43_spill]] }
  0xba   :  { %s1592_s20 = scalar_lea.hbm %s2433_s6, 128 }
  0xbb   :  { %p1593_p8 = scmp.ne.s32.totalorder %s2433_s6, %s1592_s20  ;;  %p1596_p9 = scmp.lt.u32.totalorder %s1592_s20, %s2433_s6 }
  0xbd   :  { %p1598_p10 = pnand %p1596_p9, %p1593_p8 }
  0xbf   :  { %1601 = shalt.err (!%p1598_p10)
}
  0xc0   :  { %s1602_s15 = scalar_lea.vmem %s46_s29, 128  ;;  %p1607_p12 = scmp.lt.s32.totalorder %s46_s29, %s46_s29 }
  0xc1   :  { %p1603_p11 = scmp.ne.s32.totalorder %s46_s29, %s1602_s15  ;;  %p1608_p13 = scmp.lt.s32.totalorder %s1602_s15, %s1602_s15 }
  0xc3   :  { %p1609_p0 = por %p1608_p13, %p1607_p12 }
  0xc5   :  { %p1610_p1 = pnand %p1609_p0, %p1603_p11 }
  0xc7   :  { %1613 = shalt.err (!%p1610_p1)
}
  0xc8   :  { %48 = dma.hbm_to_vmem [thread:$0]  %s2433_s6, 128, %s46_s29, [#allocation3]  }
  0xc9   :  { %s2434_s2 = sld [smem:[#allocation45_spill]] }
  0xcf   :  { %s1614_s13 = scalar_lea.hbm %s2434_s2, 128 }
  0xd0   :  { %p1615_p2 = scmp.ne.s32.totalorder %s2434_s2, %s1614_s13  ;;  %p1618_p3 = scmp.lt.u32.totalorder %s1614_s13, %s2434_s2 }
  0xd2   :  { %p1620_p4 = pnand %p1618_p3, %p1615_p2 }
  0xd4   :  { %1623 = shalt.err (!%p1620_p4)
}
  0xd5   :  { %s1624_s3 = scalar_lea.vmem %s66_s0, 128  ;;  %p1629_p6 = scmp.lt.s32.totalorder %s66_s0, %s66_s0 }
  0xd6   :  { %p1625_p5 = scmp.ne.s32.totalorder %s66_s0, %s1624_s3  ;;  %p1630_p7 = scmp.lt.s32.totalorder %s1624_s3, %s1624_s3 }
  0xd8   :  { %p1631_p8 = por %p1630_p7, %p1629_p6 }
  0xda   :  { %p1632_p9 = pnand %p1631_p8, %p1625_p5 }
  0xdc   :  { %1635 = shalt.err (!%p1632_p9)
}
  0xdd   :  { %68 = dma.hbm_to_vmem [thread:$0]  %s2434_s2, 128, %s66_s0, [#allocation6]  }
  0xde   :  { %s1868_s20 = smov [#allocation10]   ;;  %s1869_s9 = smov [#allocation13]  }
  0xdf   :  { %s87_s22 = sshll.u32 %s1868_s20, 4  ;;  %s107_s5 = sshll.u32 %s1869_s9, 4  ;;  %s88_s22 = int_to_ptr.vmem [resolvable:$true] %s87_s22  ;;  %s108_s5 = int_to_ptr.vmem [resolvable:$true] %s107_s5 }
  0xe0   :  { %s2435_s24 = sld [smem:[#allocation47_spill]] }
  0xe6   :  { %s1636_s1 = scalar_lea.hbm %s2435_s24, 16 }
  0xe7   :  { %p1637_p10 = scmp.ne.s32.totalorder %s2435_s24, %s1636_s1  ;;  %p1640_p11 = scmp.lt.u32.totalorder %s1636_s1, %s2435_s24 }
  0xe9   :  { %p1642_p12 = pnand %p1640_p11, %p1637_p10 }
  0xeb   :  { %1645 = shalt.err (!%p1642_p12)
}
  0xec   :  { %s1646_s0 = scalar_lea.vmem %s88_s22, 16  ;;  %s1650_s2 = scalar_lea.vmem %s88_s22, 32 }
  0xed   :  { %p1647_p13 = scmp.ne.s32.totalorder %s88_s22, %s1646_s0  ;;  %p1651_p0 = scmp.lt.s32.totalorder %s88_s22, %s88_s22 }
  0xee   :  { %p1652_p1 = scmp.lt.s32.totalorder %s1650_s2, %s1646_s0 }
  0xf0   :  { %p1653_p2 = por %p1652_p1, %p1651_p0 }
  0xf2   :  { %p1654_p3 = pnand %p1653_p2, %p1647_p13 }
  0xf4   :  { %1657 = shalt.err (!%p1654_p3)
}
  0xf5   :  { %90 = dma.hbm_to_vmem [thread:$0]  %s2435_s24, 16, %s88_s22, [#allocation9]  }
  0xf6   :  { %s2436_s29 = sld [smem:[#allocation49_spill]] }
  0xfc   :  { %s1658_s6 = scalar_lea.hbm %s2436_s29, 16 }
  0xfd   :  { %p1659_p4 = scmp.ne.s32.totalorder %s2436_s29, %s1658_s6  ;;  %p1662_p5 = scmp.lt.u32.totalorder %s1658_s6, %s2436_s29 }
  0xff   :  { %p1664_p6 = pnand %p1662_p5, %p1659_p4 }
 0x101   :  { %1667 = shalt.err (!%p1664_p6)
}
 0x102   :  { %s1668_s1 = scalar_lea.vmem %s108_s5, 16  ;;  %s1672_s28 = scalar_lea.vmem %s108_s5, 32 }
 0x103   :  { %p1669_p7 = scmp.ne.s32.totalorder %s108_s5, %s1668_s1  ;;  %p1673_p8 = scmp.lt.s32.totalorder %s108_s5, %s108_s5 }
 0x104   :  { %p1674_p9 = scmp.lt.s32.totalorder %s1672_s28, %s1668_s1 }
 0x106   :  { %p1675_p10 = por %p1674_p9, %p1673_p8 }
 0x108   :  { %p1676_p11 = pnand %p1675_p10, %p1669_p7 }
 0x10a   :  { %1679 = shalt.err (!%p1676_p11)
}
 0x10b   :  { %110 = dma.hbm_to_vmem [thread:$0]  %s2436_s29, 16, %s108_s5, [#allocation12]  }
 0x10c   :  { %s1870_s4 = smov [#allocation16]   ;;  %s1871_s7 = smov [#allocation19]  }
 0x10d   :  { %s129_s13 = sshll.u32 %s1870_s4, 4  ;;  %s149_s0 = sshll.u32 %s1871_s7, 4  ;;  %s130_s13 = int_to_ptr.vmem [resolvable:$true] %s129_s13  ;;  %s150_s0 = int_to_ptr.vmem [resolvable:$true] %s149_s0 }
 0x10e   :  { %s1680_s23 = scalar_lea.hbm %s2393_s8, 16 }
 0x10f   :  { %p1681_p12 = scmp.ne.s32.totalorder %s2393_s8, %s1680_s23  ;;  %p1684_p13 = scmp.lt.u32.totalorder %s1680_s23, %s2393_s8 }
 0x111   :  { %p1686_p0 = pnand %p1684_p13, %p1681_p12 }
 0x113   :  { %1689 = shalt.err (!%p1686_p0)
}
 0x114   :  { %s1690_s5 = scalar_lea.vmem %s130_s13, 16  ;;  %s1694_s29 = scalar_lea.vmem %s130_s13, 32 }
 0x115   :  { %p1691_p1 = scmp.ne.s32.totalorder %s130_s13, %s1690_s5  ;;  %p1695_p2 = scmp.lt.s32.totalorder %s130_s13, %s130_s13 }
 0x116   :  { %p1696_p3 = scmp.lt.s32.totalorder %s1694_s29, %s1690_s5 }
 0x118   :  { %p1697_p4 = por %p1696_p3, %p1695_p2 }
 0x11a   :  { %p1698_p5 = pnand %p1697_p4, %p1691_p1 }
 0x11c   :  { %1701 = shalt.err (!%p1698_p5)
}
 0x11d   :  { %132 = dma.hbm_to_vmem [thread:$0]  %s2393_s8, 16, %s130_s13, [#allocation15]  }
 0x11e   :  { %s1702_s28 = scalar_lea.hbm %s2395_s10, 16 }
 0x11f   :  { %p1703_p6 = scmp.ne.s32.totalorder %s2395_s10, %s1702_s28  ;;  %p1706_p7 = scmp.lt.u32.totalorder %s1702_s28, %s2395_s10 }
 0x121   :  { %p1708_p8 = pnand %p1706_p7, %p1703_p6 }
 0x123   :  { %1711 = shalt.err (!%p1708_p8)
}
 0x124   :  { %s1712_s2 = scalar_lea.vmem %s150_s0, 16  ;;  %s1716_s25 = scalar_lea.vmem %s150_s0, 32 }
 0x125   :  { %p1713_p9 = scmp.ne.s32.totalorder %s150_s0, %s1712_s2  ;;  %p1717_p10 = scmp.lt.s32.totalorder %s150_s0, %s150_s0 }
 0x126   :  { %p1718_p11 = scmp.lt.s32.totalorder %s1716_s25, %s1712_s2 }
 0x128   :  { %p1719_p12 = por %p1718_p11, %p1717_p10 }
 0x12a   :  { %p1720_p13 = pnand %p1719_p12, %p1713_p9 }
 0x12c   :  { %1723 = shalt.err (!%p1720_p13)
}
 0x12d   :  { %152 = dma.hbm_to_vmem [thread:$0]  %s2395_s10, 16, %s150_s0, [#allocation18]  }
 0x12e   :  { %s1872_s23 = smov [#allocation22]   ;;  %s1873_s3 = smov [#allocation25]  }
 0x12f   :  { %s171_s11 = sshll.u32 %s1872_s23, 4  ;;  %s191_s6 = sshll.u32 %s1873_s3, 4  ;;  %s172_s11 = int_to_ptr.vmem [resolvable:$true] %s171_s11  ;;  %s192_s6 = int_to_ptr.vmem [resolvable:$true] %s191_s6 }
 0x130   :  { %s1724_s29 = scalar_lea.hbm %s2397_s12, 16 }
 0x131   :  { %p1725_p0 = scmp.ne.s32.totalorder %s2397_s12, %s1724_s29  ;;  %p1728_p1 = scmp.lt.u32.totalorder %s1724_s29, %s2397_s12 }
 0x133   :  { %p1730_p2 = pnand %p1728_p1, %p1725_p0 }
 0x135   :  { %1733 = shalt.err (!%p1730_p2)
}
 0x136   :  { %s1734_s10 = scalar_lea.vmem %s172_s11, 16  ;;  %s1738_s0 = scalar_lea.vmem %s172_s11, 32 }
 0x137   :  { %p1735_p3 = scmp.ne.s32.totalorder %s172_s11, %s1734_s10  ;;  %p1739_p4 = scmp.lt.s32.totalorder %s172_s11, %s172_s11 }
 0x138   :  { %p1740_p5 = scmp.lt.s32.totalorder %s1738_s0, %s1734_s10 }
 0x13a   :  { %p1741_p6 = por %p1740_p5, %p1739_p4 }
 0x13c   :  { %p1742_p7 = pnand %p1741_p6, %p1735_p3 }
 0x13e   :  { %1745 = shalt.err (!%p1742_p7)
}
 0x13f   :  { %174 = dma.hbm_to_vmem [thread:$0]  %s2397_s12, 16, %s172_s11, [#allocation21]  }
 0x140   :  { %s1746_s7 = scalar_lea.hbm %s2399_s14, 16 }
 0x141   :  { %p1747_p8 = scmp.ne.s32.totalorder %s2399_s14, %s1746_s7  ;;  %p1750_p9 = scmp.lt.u32.totalorder %s1746_s7, %s2399_s14 }
 0x143   :  { %p1752_p10 = pnand %p1750_p9, %p1747_p8 }
 0x145   :  { %1755 = shalt.err (!%p1752_p10)
}
 0x146   :  { %s1756_s23 = scalar_lea.vmem %s192_s6, 16  ;;  %s1760_s3 = scalar_lea.vmem %s192_s6, 32 }
 0x147   :  { %p1757_p11 = scmp.ne.s32.totalorder %s192_s6, %s1756_s23  ;;  %p1761_p12 = scmp.lt.s32.totalorder %s192_s6, %s192_s6 }
 0x148   :  { %p1762_p13 = scmp.lt.s32.totalorder %s1760_s3, %s1756_s23 }
 0x14a   :  { %p1763_p0 = por %p1762_p13, %p1761_p12 }
 0x14c   :  { %p1764_p1 = pnand %p1763_p0, %p1757_p11 }
 0x14e   :  { %1767 = shalt.err (!%p1764_p1)
}
 0x14f   :  { %194 = dma.hbm_to_vmem [thread:$0]  %s2399_s14, 16, %s192_s6, [#allocation24]  }
 0x150   :  { %s1874_s20 = smov [#allocation28]   ;;  %s1875_s29 = smov [#allocation29]  }
 0x151   :  { %s212_s5 = sshll.u32 %s1874_s20, 4  ;;  %s232_s9 = sshll.u32 %s1875_s29, 4  ;;  %s213_s5 = int_to_ptr.vmem [resolvable:$true] %s212_s5  ;;  %s2232_s9 = int_to_ptr.vmem [resolvable:$true] %s232_s9 }
 0x152   :  { %s1768_s1 = scalar_lea.hbm %s2401_s16, 1024 }
 0x153   :  { %p1769_p2 = scmp.ne.s32.totalorder %s2401_s16, %s1768_s1  ;;  %p1772_p3 = scmp.lt.u32.totalorder %s1768_s1, %s2401_s16 }
 0x155   :  { %p1774_p4 = pnand %p1772_p3, %p1769_p2 }
 0x157   :  { %1777 = shalt.err (!%p1774_p4)
}
 0x158   :  { %s1778_s14 = scalar_lea.vmem %s213_s5, 1024  ;;  %p1783_p6 = scmp.lt.s32.totalorder %s213_s5, %s213_s5 }
 0x159   :  { %p1779_p5 = scmp.ne.s32.totalorder %s213_s5, %s1778_s14  ;;  %p1784_p7 = scmp.lt.s32.totalorder %s1778_s14, %s1778_s14 }
 0x15b   :  { %p1785_p8 = por %p1784_p7, %p1783_p6 }
 0x15d   :  { %p1786_p9 = pnand %p1785_p8, %p1779_p5 }
 0x15f   :  { %1789 = shalt.err (!%p1786_p9)
}
 0x160   :  { %218 = dma.hbm_to_vmem [thread:$0]  %s2401_s16, 1024, %s213_s5, [#allocation27], %s1858_s30, %s1858_s30, %s1859_s26  }
 0x161   :  { %s1790_s2 = scalar_lea.hbm %s2406_s21, 1024 }
 0x162   :  { %p1791_p10 = scmp.ne.s32.totalorder %s2406_s21, %s1790_s2  ;;  %p1794_p11 = scmp.lt.u32.totalorder %s1790_s2, %s2406_s21 }
 0x164   :  { %p1796_p12 = pnand %p1794_p11, %p1791_p10 }
 0x166   :  { %1799 = shalt.err (!%p1796_p12)
}
 0x167   :  { %s1800_s3 = scalar_lea.vmem %s2232_s9, 1024  ;;  %p1805_p0 = scmp.lt.s32.totalorder %s2232_s9, %s2232_s9 }
 0x168   :  { %p1801_p13 = scmp.ne.s32.totalorder %s2232_s9, %s1800_s3  ;;  %p1806_p1 = scmp.lt.s32.totalorder %s1800_s3, %s1800_s3 }
 0x16a   :  { %p1807_p2 = por %p1806_p1, %p1805_p0 }
 0x16c   :  { %p1808_p3 = pnand %p1807_p2, %p1801_p13 }
 0x16e   :  { %1811 = shalt.err (!%p1808_p3)
}
 0x16f   :  { %238 = dma.hbm_to_vmem [thread:$0]  %s2406_s21, 1024, %s2232_s9, [#allocation30], %s1858_s30, %s1858_s30, %s1859_s26  }
 0x170   :  { %1834 = dma.done.wait [#allocation3], 128  }
 0x171   :  { %1835 = vsyncadd [#allocation3], 4294967168 }
 0x172   :  { %1836 = dma.done.wait [#allocation6], 256  }
 0x173   :  { %1837 = vsyncadd [#allocation6], 4294967040 }
 0x174   :  { %1838 = dma.done.wait [#allocation9], 528  }
 0x175   :  { %1839 = vsyncadd [#allocation9], 4294966768 }
 0x176   :  { %1840 = dma.done.wait [#allocation12], 32  }
 0x177   :  { %1841 = vsyncadd [#allocation12], 4294967264 }
 0x178   :  { %1842 = dma.done.wait [#allocation15], 528  }
 0x179   :  { %1843 = vsyncadd [#allocation15], 4294966768 }
 0x17a   :  { %1844 = dma.done.wait [#allocation18], 32  }
 0x17b   :  { %1845 = vsyncadd [#allocation18], 4294967264 }
 0x17c   :  { %1846 = dma.done.wait [#allocation21], 208  }
 0x17d   :  { %1847 = vsyncadd [#allocation21], 4294967088 }
 0x17e   :  { %1848 = dma.done.wait [#allocation24], 32  }
 0x17f   :  { %1849 = vsyncadd [#allocation24], 4294967264 }
 0x180   :  { %1850 = dma.done.wait [#allocation27], 2048  }
 0x181   :  { %1851 = vsyncadd [#allocation27], 4294965248 }
 0x182   :  { %1852 = dma.done.wait [#allocation30], 1024  }
 0x183   :  { %1853 = vsyncadd [#allocation30], 4294966272  ;;  %v1876_v0 = vmov 0.0   ;;  %vm1877_vm0 = vmmov 0   ;;  %v1366_v1 = vld [vmem:[#allocation8] sm:$0xff]   ;;  %v1368_v3 = vld [vmem:[#allocation8 + $0x8] sm:$0xff]  }
 0x184   :  { %1230 = vmatprep.subr.bf16.mxu0 %v1876_v0  ;;  %1242 = vmatprep.subr.bf16.mxu1 %v1876_v0  ;;  %v1367_v2 = vld [vmem:[#allocation14] sm:$0xff]   ;;  %v1369_v4 = vld [vmem:[#allocation14 + $0x8] sm:$0xff]   ;;  %v1371_v6 = vld [vmem:[#allocation14 + $0x10] sm:$0xff]   ;;  %vm337_vm1 = vcmask 523264   ;;  %vm763_vm2 = vcmask 1042432   ;;  %vm764_vm3 = vcmask 1043456  }
 0x185   :  { %1238 = vmatprep.mubr.msk.bf16.mxu0 %vm1877_vm0, %v1876_v0  ;;  %1250 = vmatprep.mubr.msk.bf16.mxu1 %vm1877_vm0, %v1876_v0  ;;  %v1370_v5 = vld [vmem:[#allocation8 + $0x10] sm:$0xff]   ;;  %v1372_v7 = vld [vmem:[#allocation8 + $0x18] sm:$0xff]   ;;  %v296_v8 = vld [vmem:[#allocation2] sm:$0xff]  ;;  %vm759_vm4 = vcmask 187392   ;;  %s2437_s2 = sld [smem:[#allocation51_spill]]  ;;  %s2438_s13 = sld [smem:[#allocation52_spill]] }
 0x186   :  { %1231 = vmatpush3.bf16.msra.mxu0 %v1366_v1  ;;  %1243 = vmatpush3.bf16.msra.mxu1 %v1367_v2  ;;  %v1373_v9 = vld [vmem:[#allocation14 + $0x18] sm:$0xff]   ;;  %v430_v10 = vld [vmem:[#allocation5] sm:$0xff]  ;;  %v297_v11 = vpack.c.bf16 %v296_v8, %v296_v8  ;;  %v1131_v14 = vld [vmem:[#allocation16] ss:$0 sm:$0xff]  ;;  %s1879_s23 = smov [#allocation31]  }
 0x187   :  { %1232 = vmatprep.subr.bf16.mxu0 %v1876_v0  ;;  %1244 = vmatprep.subr.bf16.mxu1 %v1876_v0  ;;  %v431_v12 = vpack.c.bf16 %v430_v10, %v430_v10  ;;  %v1123_v13 = vld [vmem:[#allocation10] ss:$0 sm:$0xff]  ;;  %v1376_v31 = vld [vmem:[#allocation28 + $0x8] sm:$0xff]   ;;  %v1378_v33 = vld [vmem:[#allocation28 + $0x10] sm:$0xff]   ;;  %s1105_s3 = sshll.u32 %s1879_s23, 4  ;;  %s1106_s3 = int_to_ptr.vmem [resolvable:$true] %s1105_s3 }
 0x188   :  { %v1374_v29 = vld [vmem:[#allocation28] sm:$0xff]   ;;  %v1377_v32 = vld [vmem:[#allocation26 + $0x8] sm:$0xff]   ;;  %v1379_v34 = vld [vmem:[#allocation26 + $0x10] sm:$0xff]   ;;  %p1817_p5 = scmp.lt.s32.totalorder %s1106_s3, %s1106_s3 }
 0x189   :  { %v1375_v30 = vld [vmem:[#allocation26] sm:$0xff]   ;;  %v1380_v35 = vld [vmem:[#allocation28 + $0x18] sm:$0xff]   ;;  %v1384_v39 = vld [vmem:[#allocation28 + $0x28] sm:$0xff]  }
 0x18a   :  { %1233 = vmatpush3.bf16.msra.mxu0 %v1368_v3  ;;  %1245 = vmatpush3.bf16.msra.mxu1 %v1369_v4  ;;  %v1381_v36 = vld [vmem:[#allocation26 + $0x18] sm:$0xff]   ;;  %v1382_v37 = vld [vmem:[#allocation28 + $0x20] sm:$0xff]   ;;  %v1385_v40 = vld [vmem:[#allocation26 + $0x28] sm:$0xff]  }
 0x18b   :  { %1234 = vmatprep.subr.bf16.mxu0 %v1876_v0  ;;  %1246 = vmatprep.subr.bf16.mxu1 %v1876_v0  ;;  %v1383_v38 = vld [vmem:[#allocation26 + $0x20] sm:$0xff]   ;;  %v1386_v41 = vld [vmem:[#allocation28 + $0x30] sm:$0xff]   ;;  %v1388_v43 = vld [vmem:[#allocation28 + $0x38] sm:$0xff]  }
 0x18c   :  { %v1387_v42 = vld [vmem:[#allocation26 + $0x30] sm:$0xff]   ;;  %v1389_v44 = vld [vmem:[#allocation26 + $0x38] sm:$0xff]   ;;  %v1129_v1 = vld [vmem:[#allocation11] ss:$0 sm:$0xff] }
 0x18d   :  { %v1137_v3 = vld [vmem:[#allocation17] ss:$0 sm:$0xff] }
 0x18e   :  { %1235 = vmatpush3.bf16.msra.mxu0 %v1370_v5  ;;  %1247 = vmatpush3.bf16.msra.mxu1 %v1371_v6  ;;  %v1130_v6 = vld [vmem:[#allocation13] ss:$0 sm:$0xff] }
 0x18f   :  { %1236 = vmatprep.subr.bf16.mxu0 %v1876_v0  ;;  %1248 = vmatprep.subr.bf16.mxu1 %v1876_v0 }
 0x192   :  { %1237 = vmatpush3.bf16.msra.mxu0 %v1372_v7  ;;  %1249 = vmatpush3.bf16.msra.mxu1 %v1373_v9  ;;  %v1138_v7 = vld [vmem:[#allocation19] ss:$0 sm:$0xff] }
 0x193   :  { %1254 = vmatprep.subr.bf16.mxu0 %v1876_v0  ;;  %1274 = vmatprep.subr.bf16.mxu1 %v1876_v0 }
 0x195   :  { %1239 = vmatmul.mubr.msk.bf16.vlgmr.msra.gmra.mrb[0].mxu0 %vm337_vm1, %v297_v11  ;;  %1251 = vmatmul.mubr.msk.bf16.vlgmr.msra.gmra.mrb[0].mxu1 %vm337_vm1, %v431_v12  ;;  %v1878_v11 = vmov 65535  }
 0x196   :  { %1270 = vmatprep.mubr.msk.bf16.mxu0 %vm1877_vm0, %v1876_v0  ;;  %1290 = vmatprep.mubr.msk.bf16.mxu1 %vm1877_vm0, %v1876_v0  ;;  %v765_v12 = vsel %vm763_vm2, 4294967295, %v1878_v11  ;;  %v1402_v11 = vld [vmem:[#allocation29 + $0x10] sm:$0xff]  }
 0x197   :  { %1255 = vmatpush3.bf16.msra.mxu0 %v1374_v29  ;;  %1275 = vmatpush3.bf16.msra.mxu1 %v1375_v30 }
 0x198   :  { %1256 = vmatprep.subr.bf16.mxu0 %v1876_v0  ;;  %1276 = vmatprep.subr.bf16.mxu1 %v1876_v0 }
 0x19b   :  { %1257 = vmatpush3.bf16.msra.mxu0 %v1376_v31  ;;  %1277 = vmatpush3.bf16.msra.mxu1 %v1377_v32  ;;  %v1155_v32 = vld [vmem:[#allocation22] ss:$0 sm:$0xff] }
 0x19c   :  { %1258 = vmatprep.subr.bf16.mxu0 %v1876_v0  ;;  %1278 = vmatprep.subr.bf16.mxu1 %v1876_v0 }
 0x19f   :  { %1259 = vmatpush3.bf16.msra.mxu0 %v1378_v33  ;;  %1279 = vmatpush3.bf16.msra.mxu1 %v1379_v34 }
 0x1a0   :  { %1260 = vmatprep.subr.bf16.mxu0 %v1876_v0  ;;  %1280 = vmatprep.subr.bf16.mxu1 %v1876_v0 }
 0x1a3   :  { %1261 = vmatpush3.bf16.msra.mxu0 %v1380_v35  ;;  %1281 = vmatpush3.bf16.msra.mxu1 %v1381_v36 }
 0x1a4   :  { %1262 = vmatprep.subr.bf16.mxu0 %v1876_v0  ;;  %1282 = vmatprep.subr.bf16.mxu1 %v1876_v0 }
 0x1a7   :  { %1263 = vmatpush3.bf16.msra.mxu0 %v1382_v37  ;;  %1283 = vmatpush3.bf16.msra.mxu1 %v1383_v38 }
 0x1a8   :  { %1264 = vmatprep.subr.bf16.mxu0 %v1876_v0  ;;  %1284 = vmatprep.subr.bf16.mxu1 %v1876_v0 }
 0x1ab   :  { %1265 = vmatpush3.bf16.msra.mxu0 %v1384_v39  ;;  %1285 = vmatpush3.bf16.msra.mxu1 %v1385_v40  ;;  %v1393_v40 = vld [vmem:[%s2402_s17 + $0x8] sm:$0xff]  }
 0x1ac   :  { %1266 = vmatprep.subr.bf16.mxu0 %v1876_v0  ;;  %1286 = vmatprep.subr.bf16.mxu1 %v1876_v0 }
 0x1af   :  { %1267 = vmatpush3.bf16.msra.mxu0 %v1386_v41  ;;  %1287 = vmatpush3.bf16.msra.mxu1 %v1387_v42  ;;  %v1394_v41 = vld [vmem:[%s2402_s17 + $0x10] sm:$0xff]   ;;  %v1395_v42 = vld [vmem:[%s2402_s17 + $0x18] sm:$0xff]  }
 0x1b0   :  { %1268 = vmatprep.subr.bf16.mxu0 %v1876_v0  ;;  %1288 = vmatprep.subr.bf16.mxu1 %v1876_v0 }
 0x1b3   :  { %1269 = vmatpush3.bf16.msra.mxu0 %v1388_v43  ;;  %1289 = vmatpush3.bf16.msra.mxu1 %v1389_v44  ;;  %v1396_v43 = vld [vmem:[%s2402_s17 + $0x20] sm:$0xff]   ;;  %v1397_v44 = vld [vmem:[%s2402_s17 + $0x28] sm:$0xff]  }
 0x1b4   :  { %1294 = vmatprep.subr.bf16.mxu0 %v1876_v0  ;;  %1302 = vmatprep.subr.bf16.mxu1 %v1876_v0 }
 0x268   :  { %v375_v15 = vpop.f32.mrb[0].mxu0  ;;  %v508_v17 = vpop.f32.mrb[0].mxu1 }
 0x269   :  { %v376_v16 = vadd.f32 %v1123_v13, %v375_v15  ;;  %v1240_v18 = vpop.f32.mrb[1].mxu0  ;;  %v509_v19 = vadd.f32 %v1131_v14, %v508_v17  ;;  %v1252_v20 = vpop.f32.mrb[1].mxu1  ;;  %v1390_v15 = vld [vmem:[#allocation20] sm:$0xff]  }
 0x26a   :  { %v378_v21 = vpop.f32.mrb[2].mxu0  ;;  %v511_v23 = vpop.f32.mrb[2].mxu1  ;;  %v766_v18 = vsel %vm764_vm3, %v765_v12, 0  ;;  %v738_v20 = vld [vmem:[#allocation7] sm:$0xff] }
 0x26b   :  { %v2287_v22 = vmax.f32 %v376_v16, 0.0  ;;  %v1241_v24 = vpop.f32.mrb[3].mxu0  ;;  %v2289_v25 = vmax.f32 %v509_v19, 0.0  ;;  %v1253_v26 = vpop.f32.mrb[3].mxu1  ;;  %v1391_v16 = vld [vmem:[#allocation20 + $0x8] ss:$0 sps:$4 sm:$0xff]   ;;  %v739_v21 = vpack.c.bf16 %v738_v20, %v738_v20 }
 0x26c   :  { %v768_v19 = vand.u32 %v1391_v16, %v766_v18  ;;  %v1403_v12 = vld [vmem:[#allocation29 + $0x18] sm:$0xff]  }
 0x26d   :  { %384 = vadd.xlane.f32.xlu1 %v2287_v22  ;;  %v388_v27 = vmul.f32 %v2287_v22, %v2287_v22  ;;  %517 = vadd.xlane.f32.xlu0 %v2289_v25  ;;  %v520_v28 = vmul.f32 %v2289_v25, %v2289_v25  ;;  %v1407_v16 = vld [vmem:[#allocation29 + $0x38] sm:$0xff]  }
 0x271   :  { %389 = vadd.xlane.f32.xlu1 %v388_v27  ;;  %521 = vadd.xlane.f32.xlu0 %v520_v28 }
 0x2fa   :  { %v385_v45 = vpop.xlane.xlu1 %384  ;;  %v518_v46 = vpop.xlane.xlu0 %517 }
 0x2fb   :  { %v387_v47 = vmul.f32 0.0078125, %v385_v45  ;;  %v519_v48 = vmul.f32 0.0078125, %v518_v46  ;;  %v1398_v45 = vld [vmem:[%s2402_s17 + $0x30] sm:$0xff]   ;;  %v1399_v46 = vld [vmem:[%s2402_s17 + $0x38] sm:$0xff]  }
 0x2fd   :  { %v392_v49 = vmul.f32 %v387_v47, %v387_v47  ;;  %v524_v53 = vmul.f32 %v519_v48, %v519_v48  ;;  %v395_v61 = vsub.f32 %v2287_v22, %v387_v47  ;;  %v527_v63 = vsub.f32 %v2289_v25, %v519_v48  ;;  %v1392_v22 = vld [vmem:[%s2402_s17] sm:$0xff]  }
 0x2fe   :  { %v390_v50 = vpop.xlane.xlu1 %389  ;;  %v522_v51 = vpop.xlane.xlu0 %521 }
 0x2ff   :  { %v391_v52 = vmul.f32 0.0078125, %v390_v50  ;;  %v523_v54 = vmul.f32 0.0078125, %v522_v51 }
 0x301   :  { %v393_v55 = vsub.f32 %v391_v52, %v392_v49  ;;  %v525_v56 = vsub.f32 %v523_v54, %v524_v53 }
 0x303   :  { %v394_v57 = vmax.f32 %v393_v55, 0.0  ;;  %v526_v58 = vmax.f32 %v525_v56, 0.0 }
 0x305   :  { %v396_v59 = vadd.f32 1e-05, %v394_v57  ;;  %v528_v60 = vadd.f32 1e-05, %v526_v58  ;;  %v1159_v57 = vld [vmem:[#allocation23] ss:$0 sm:$0xff] }
 0x307   :  { %1408 = vrsqrt.f32 %v396_v59  ;;  %v1160_v59 = vld [vmem:[#allocation25] ss:$0 sm:$0xff] }
 0x308   :  { %1410 = vrsqrt.f32 %v528_v60 }
 0x311   :  { %v1409_v62 = vpop.eup %1408 }
 0x312   :  { %v1411_v2 = vpop.eup %1410  ;;  %v398_v4 = vmul.f32 %v1409_v62, %v395_v61 }
 0x313   :  { %v530_v5 = vmul.f32 %v1411_v2, %v527_v63  ;;  %v1400_v63 = vld [vmem:[#allocation29] sm:$0xff]   ;;  %v1169_v2 = vld [vmem:[%s2403_s18] ss:$0 sm:$0xff] }
 0x314   :  { %v405_v8 = vmul.f32 %v1129_v1, %v398_v4 }
 0x315   :  { %v537_v9 = vmul.f32 %v1137_v3, %v530_v5 }
 0x316   :  { %v412_v10 = vadd.f32 %v1130_v6, %v405_v8 }
 0x317   :  { %v544_v13 = vadd.f32 %v1138_v7, %v537_v9 }
 0x318   :  { %v413_v14 = vpack.c.bf16 %v412_v10, %v412_v10  ;;  %v1401_v10 = vld [vmem:[#allocation29 + $0x8] sm:$0xff]  }
 0x319   :  { %v545_v17 = vpack.c.bf16 %v544_v13, %v544_v13  ;;  %v1404_v13 = vld [vmem:[#allocation29 + $0x20] sm:$0xff]  }
 0x31a   :  { %1291 = vmatmul.mubr.bf16.vlgmr.msra.gmra.mrb[4].mxu1 %v413_v14  ;;  %v1405_v14 = vld [vmem:[#allocation29 + $0x28] sm:$0xff]  }
 0x31b   :  { %1271 = vmatmul.mubr.bf16.vlgmr.msra.gmra.mrb[4].mxu0 %v545_v17  ;;  %1318 = vmatprep.mubr.msk.bf16.mxu1 %vm1877_vm0, %v1876_v0 }
 0x31c   :  { %1295 = vmatpush3.bf16.msra.mxu0 %v1390_v15  ;;  %1298 = vmatprep.mubr.msk.bf16.mxu0 %vm1877_vm0, %v1876_v0  ;;  %v1406_v15 = vld [vmem:[#allocation29 + $0x30] sm:$0xff]  }
 0x31d   :  { %1296 = vmatprep.subr.bf16.mxu0 %v1876_v0  ;;  %1303 = vmatpush3.bf16.msra.mxu1 %v1392_v22 }
 0x31e   :  { %1304 = vmatprep.subr.bf16.mxu1 %v1876_v0 }
 0x320   :  { %1297 = vmatpush3.bf16.msra.mxu0 %v768_v19 }
 0x321   :  { %1322 = vmatprep.subr.bf16.mxu0 %v1876_v0  ;;  %1305 = vmatpush3.bf16.msra.mxu1 %v1393_v40 }
 0x322   :  { %1306 = vmatprep.subr.bf16.mxu1 %v1876_v0 }
 0x323   :  { %1299 = vmatmul.mubr.msk.bf16.vlgmr.msra.gmra.mrb[8].mxu0 %vm759_vm4, %v739_v21 }
 0x324   :  { %1338 = vmatprep.mubr.msk.bf16.mxu0 %vm1877_vm0, %v1876_v0  ;;  %1323 = vmatpush3.bf16.msra.mxu0 %v1400_v63 }
 0x325   :  { %1307 = vmatpush3.bf16.msra.mxu1 %v1394_v41  ;;  %1324 = vmatprep.subr.bf16.mxu0 %v1876_v0 }
 0x326   :  { %1308 = vmatprep.subr.bf16.mxu1 %v1876_v0 }
 0x328   :  { %1325 = vmatpush3.bf16.msra.mxu0 %v1401_v10 }
 0x329   :  { %1309 = vmatpush3.bf16.msra.mxu1 %v1395_v42  ;;  %1326 = vmatprep.subr.bf16.mxu0 %v1876_v0 }
 0x32a   :  { %1310 = vmatprep.subr.bf16.mxu1 %v1876_v0 }
 0x32c   :  { %1327 = vmatpush3.bf16.msra.mxu0 %v1402_v11 }
 0x32d   :  { %1311 = vmatpush3.bf16.msra.mxu1 %v1396_v43  ;;  %1328 = vmatprep.subr.bf16.mxu0 %v1876_v0 }
 0x32e   :  { %1312 = vmatprep.subr.bf16.mxu1 %v1876_v0 }
 0x330   :  { %1329 = vmatpush3.bf16.msra.mxu0 %v1403_v12 }
 0x331   :  { %1313 = vmatpush3.bf16.msra.mxu1 %v1397_v44  ;;  %1330 = vmatprep.subr.bf16.mxu0 %v1876_v0 }
 0x332   :  { %1314 = vmatprep.subr.bf16.mxu1 %v1876_v0 }
 0x334   :  { %1331 = vmatpush3.bf16.msra.mxu0 %v1404_v13 }
 0x335   :  { %1315 = vmatpush3.bf16.msra.mxu1 %v1398_v45  ;;  %1332 = vmatprep.subr.bf16.mxu0 %v1876_v0 }
 0x336   :  { %1316 = vmatprep.subr.bf16.mxu1 %v1876_v0 }
 0x338   :  { %1333 = vmatpush3.bf16.msra.mxu0 %v1405_v14 }
 0x339   :  { %1317 = vmatpush3.bf16.msra.mxu1 %v1399_v46  ;;  %1334 = vmatprep.subr.bf16.mxu0 %v1876_v0 }
 0x33c   :  { %1335 = vmatpush3.bf16.msra.mxu0 %v1406_v15 }
 0x33d   :  { %1336 = vmatprep.subr.bf16.mxu0 %v1876_v0  ;;  %v1171_v0 = vld [vmem:[%s2437_s2] ss:$0 sm:$0xff] }
 0x340   :  { %1337 = vmatpush3.bf16.msra.mxu0 %v1407_v16 }
 0x3ed   :  { %v732_v23 = vpop.f32.mrb[4].mxu1 }
 0x3ee   :  { %v644_v24 = vpop.f32.mrb[4].mxu0  ;;  %v1292_v25 = vpop.f32.mrb[5].mxu1 }
 0x3ef   :  { %v733_v26 = vadd.f32 %v732_v23, %v644_v24  ;;  %v1272_v27 = vpop.f32.mrb[5].mxu0  ;;  %v735_v28 = vpop.f32.mrb[6].mxu1 }
 0x3f0   :  { %v647_v29 = vpop.f32.mrb[6].mxu0  ;;  %v1293_v30 = vpop.f32.mrb[7].mxu1  ;;  %v1170_v27 = vld [vmem:[%s2404_s19] ss:$0 sm:$0xff]  ;;  %s1812_s19 = scalar_lea.vmem %s1106_s3, 128 }
 0x3f1   :  { %v1273_v31 = vpop.f32.mrb[7].mxu0  ;;  %p1813_p4 = scmp.ne.s32.totalorder %s1106_s3, %s1812_s19  ;;  %p1818_p6 = scmp.lt.s32.totalorder %s1812_s19, %s1812_s19 }
 0x3f3   :  { %p1819_p7 = por %p1818_p6, %p1817_p5 }
 0x3f5   :  { %p1820_p8 = pnand %p1819_p7, %p1813_p4 }
 0x3f6   :  { %v804_v33 = vpop.f32.mrb[8].mxu0 }
 0x3f7   :  { %v805_v34 = vadd.f32 %v1155_v32, %v804_v33  ;;  %v1300_v35 = vpop.f32.mrb[9].mxu0  ;;  %v1172_v32 = vld [vmem:[%s2438_s13] ss:$0 sm:$0xff] }
 0x3f8   :  { %v807_v36 = vpop.f32.mrb[10].mxu0 }
 0x3f9   :  { %v812_v37 = vmax.f32 %v805_v34, 0.0  ;;  %v1301_v38 = vpop.f32.mrb[11].mxu0 }
 0x3fb   :  { %813 = vadd.xlane.f32.xlu0 %v812_v37  ;;  %v816_v39 = vmul.f32 %v812_v37, %v812_v37 }
 0x3fd   :  { %817 = vadd.xlane.f32.xlu1 %v816_v39 }
 0x488   :  { %v814_v47 = vpop.xlane.xlu0 %813 }
 0x489   :  { %v815_v48 = vmul.f32 0.0078125, %v814_v47 }
 0x48a   :  { %v818_v49 = vpop.xlane.xlu1 %817 }
 0x48b   :  { %v820_v50 = vmul.f32 %v815_v48, %v815_v48  ;;  %v819_v51 = vmul.f32 0.0078125, %v818_v49  ;;  %v823_v55 = vsub.f32 %v812_v37, %v815_v48 }
 0x48d   :  { %v821_v52 = vsub.f32 %v819_v51, %v820_v50 }
 0x48f   :  { %v822_v53 = vmax.f32 %v821_v52, 0.0 }
 0x491   :  { %v824_v54 = vadd.f32 1e-05, %v822_v53 }
 0x493   :  { %1412 = vrsqrt.f32 %v824_v54 }
 0x49d   :  { %v1413_v56 = vpop.eup %1412 }
 0x49e   :  { %v826_v58 = vmul.f32 %v1413_v56, %v823_v55 }
 0x4a0   :  { %v833_v60 = vmul.f32 %v1159_v57, %v826_v58 }
 0x4a2   :  { %v840_v61 = vadd.f32 %v1160_v59, %v833_v60 }
 0x4a4   :  { %v841_v62 = vpack.c.bf16 %v840_v61, %v840_v61 }
 0x4a6   :  { %1319 = vmatmul.mubr.bf16.vlgmr.msra.gmra.mrb[8].mxu1 %v841_v62 }
 0x579   :  { %v940_v1 = vpop.f32.mrb[8].mxu1 }
 0x57a   :  { %v946_v3 = vadd.f32 %v940_v1, %v733_v26  ;;  %v1320_v4 = vpop.f32.mrb[9].mxu1 }
 0x57b   :  { %v943_v5 = vpop.f32.mrb[10].mxu1 }
 0x57c   :  { %v954_v6 = vadd.f32 %v1169_v2, %v946_v3  ;;  %v1321_v7 = vpop.f32.mrb[11].mxu1 }
 0x57e   :  { %v957_v8 = vmax.f32 %v954_v6, 0.0 }
 0x580   :  { %958 = vadd.xlane.f32.xlu0 %v957_v8  ;;  %v961_v9 = vmul.f32 %v957_v8, %v957_v8 }
 0x582   :  { %962 = vadd.xlane.f32.xlu1 %v961_v9 }
 0x60d   :  { %v959_v17 = vpop.xlane.xlu0 %958 }
 0x60e   :  { %v960_v18 = vmul.f32 0.0078125, %v959_v17 }
 0x60f   :  { %v963_v19 = vpop.xlane.xlu1 %962 }
 0x610   :  { %v965_v20 = vmul.f32 %v960_v18, %v960_v18  ;;  %v964_v21 = vmul.f32 0.0078125, %v963_v19  ;;  %v968_v25 = vsub.f32 %v957_v8, %v960_v18 }
 0x612   :  { %v966_v22 = vsub.f32 %v964_v21, %v965_v20 }
 0x614   :  { %v967_v23 = vmax.f32 %v966_v22, 0.0 }
 0x616   :  { %v969_v24 = vadd.f32 1e-05, %v967_v23 }
 0x618   :  { %1414 = vrsqrt.f32 %v969_v24 }
 0x622   :  { %v1415_v26 = vpop.eup %1414 }
 0x623   :  { %v971_v28 = vmul.f32 %v1415_v26, %v968_v25 }
 0x625   :  { %v978_v29 = vmul.f32 %v1170_v27, %v971_v28 }
 0x627   :  { %v985_v30 = vadd.f32 %v1171_v0, %v978_v29 }
 0x629   :  { %v986_v31 = vpack.c.bf16 %v985_v30, %v985_v30 }
 0x62b   :  { %1339 = vmatmul.mubr.bf16.vlgmr.msra.gmra.mrb[12].mxu0 %v986_v31 }
 0x6fe   :  { %v1092_v33 = vpop.f32.mrb[12].mxu0 }
 0x6ff   :  { %v1093_v34 = vadd.f32 %v1172_v32, %v1092_v33  ;;  %v1340_v35 = vpop.f32.mrb[13].mxu0 }
 0x700   :  { %v1095_v36 = vpop.f32.mrb[14].mxu0 }
 0x701   :  { %1098 = vst [vmem:[#allocation31] sm:$0xff] %v1093_v34  ;;  %v1341_v37 = vpop.f32.mrb[15].mxu0 }
 0x702   :  { %1823 = shalt.err (!%p1820_p8)
}
 0x703   :  { %s2439_s21 = sld [smem:[#allocation53_spill]] }
 0x709   :  { %s1824_s30 = scalar_lea.hbm %s2439_s21, 128 }
 0x70a   :  { %p1825_p9 = scmp.ne.s32.totalorder %s2439_s21, %s1824_s30  ;;  %p1828_p10 = scmp.lt.u32.totalorder %s1824_s30, %s2439_s21 }
 0x70c   :  { %p1830_p11 = pnand %p1828_p10, %p1825_p9 }
 0x70e   :  { %1833 = shalt.err (!%p1830_p11)
}
 0x70f   :  { %1108 = dma.vmem_to_hbm [thread:$0]  %s1106_s3, 128, %s2439_s21, [#allocation4]  }
 0x710   :  { %1854 = dma.done.wait [#allocation4], 128  }
 0x711   :  { %1855 = vsyncadd [#allocation4], 4294967168 }
 0x712   :  { %1112 = vsyncpa [#allocation3], 1 }
 0x713   :  { %1113 = vsyncpa [#allocation6], 1 }
 0x714   :  { %1114 = vsyncpa [#allocation9], 1 }
 0x715   :  { %1115 = vsyncpa [#allocation12], 1 }
 0x716   :  { %1116 = vsyncpa [#allocation15], 1 }
 0x717   :  { %1117 = vsyncpa [#allocation18], 1 }
 0x718   :  { %1118 = vsyncpa [#allocation21], 1 }
 0x719   :  { %1119 = vsyncpa [#allocation24], 1 }
 0x71a   :  { %1120 = vsyncpa [#allocation27], 1 }
 0x71b   :  { %1121 = vsyncpa [#allocation30], 1 }
 0x71c   :  { %1122 = vsyncpa [#allocation4], 1 }

// kernel: tpu_custom_call.1
= control target key start
LH: loop header
LB: loop body
LE: loop exit
PB: predicated region body
PF: predicated region fallthrough
CT: control target
= control target key end

     0   :  { %s2385_s0 = inlined_call_operand.hbm [shape: f32[8,64], index: 0, kind: input, shape index: {}]   ;;  %s2386_s1 = inlined_call_operand.hbm [shape: f32[8,64], index: 1, kind: input, shape index: {}]   ;;  %s2387_s2 = inlined_call_operand.hbm [shape: f32[8,23], index: 2, kind: input, shape index: {}]   ;;  %s2388_s3 = inlined_call_operand.hbm [shape: bf16[64,128], index: 3, kind: input, shape index: {}]   ;;  %s2389_s4 = inlined_call_operand.hbm [shape: f32[1,128], index: 4, kind: input, shape index: {}]   ;;  %s2390_s5 = inlined_call_operand.hbm [shape: f32[1,128], index: 5, kind: input, shape index: {}]   ;;  %s2391_s6 = inlined_call_operand.hbm [shape: f32[1,128], index: 6, kind: input, shape index: {}]   ;;  %s2392_s7 = inlined_call_operand.hbm [shape: bf16[64,128], index: 7, kind: input, shape index: {}]   ;;  %s2393_s8 = inlined_call_operand.hbm [shape: f32[1,128], index: 8, kind: input, shape index: {}]   ;;  %s2394_s9 = inlined_call_operand.hbm [shape: f32[1,128], index: 9, kind: input, shape index: {}]   ;;  %s2395_s10 = inlined_call_operand.hbm [shape: f32[1,128], index: 10, kind: input, shape index: {}]   ;;  %s2396_s11 = inlined_call_operand.hbm [shape: bf16[23,128], index: 11, kind: input, shape index: {}]   ;;  %s2397_s12 = inlined_call_operand.hbm [shape: f32[1,128], index: 12, kind: input, shape index: {}]   ;;  %s2398_s13 = inlined_call_operand.hbm [shape: f32[1,128], index: 13, kind: input, shape index: {}]   ;;  %s2399_s14 = inlined_call_operand.hbm [shape: f32[1,128], index: 14, kind: input, shape index: {}]   ;;  %s2400_s15 = inlined_call_operand.hbm [shape: bf16[128,128], index: 15, kind: input, shape index: {}]   ;;  %s2401_s16 = inlined_call_operand.hbm [shape: bf16[128,128], index: 16, kind: input, shape index: {}]   ;;  %s2402_s17 = inlined_call_operand.vmem [shape: bf16[128,128], index: 17, kind: input, shape index: {}]   ;;  %s2403_s18 = inlined_call_operand.vmem [shape: f32[1,128], index: 18, kind: input, shape index: {}]   ;;  %s2404_s19 = inlined_call_operand.vmem [shape: f32[1,128], index: 19, kind: input, shape index: {}]   ;;  %s2405_s20 = inlined_call_operand.vmem [shape: f32[1,128], index: 20, kind: input, shape index: {}]   ;;  %s2406_s21 = inlined_call_operand.hbm [shape: bf16[128,128], index: 21, kind: input, shape index: {}]   ;;  %s2407_s22 = inlined_call_operand.vmem [shape: f32[1,128], index: 22, kind: input, shape index: {}]   ;;  %s2408_s23 = inlined_call_operand.hbm [shape: f32[8,128], index: 23, kind: output, shape index: {}]  }
   0x1   :  { %2418 = sst [smem:[#allocation43_spill]] %s2385_s0 }
   0x2   :  { %2419 = sst [smem:[#allocation44_spill]] %s2386_s1 }
   0x3   :  { %2420 = sst [smem:[#allocation45_spill]] %s2387_s2 }
   0x4   :  { %2421 = sst [smem:[#allocation46_spill]] %s2388_s3 }
   0x5   :  { %2422 = sst [smem:[#allocation47_spill]] %s2389_s4 }
   0x6   :  { %2423 = sst [smem:[#allocation48_spill]] %s2390_s5 }
   0x7   :  { %2424 = sst [smem:[#allocation49_spill]] %s2391_s6 }
   0x8   :  { %2425 = sst [smem:[#allocation50_spill]] %s2392_s7 }
   0x9   :  { %2426 = sst [smem:[#allocation51_spill]] %s2405_s20 }
   0xa   :  { %2427 = sst [smem:[#allocation52_spill]] %s2407_s22 }
   0xb   :  { %2428 = sst [smem:[#allocation53_spill]] %s2408_s23 }
   0xc   :  { %28 = vsyncpa [#allocation3], 0 }
   0xd   :  { %29 = vsyncpa [#allocation6], 0 }
   0xe   :  { %30 = vsyncpa [#allocation9], 0 }
   0xf   :  { %31 = vsyncpa [#allocation12], 0 }
  0x10   :  { %32 = vsyncpa [#allocation15], 0 }
  0x11   :  { %33 = vsyncpa [#allocation18], 0 }
  0x12   :  { %34 = vsyncpa [#allocation21], 0 }
  0x13   :  { %35 = vsyncpa [#allocation24], 0 }
  0x14   :  { %36 = vsyncpa [#allocation27], 0 }
  0x15   :  { %37 = vsyncpa [#allocation30], 0 }
  0x16   :  { %38 = vsyncpa [#allocation4], 0  ;;  %s1856_s4 = smov [#allocation5]   ;;  %s1857_s24 = smov [#allocation8]  }
  0x17   :  { %s55_s30 = sshll.u32 %s1856_s4, 4  ;;  %s74_s25 = sshll.u32 %s1857_s24, 4  ;;  %s56_s30 = int_to_ptr.vmem [resolvable:$true] %s55_s30  ;;  %s2000_s25 = int_to_ptr.vmem [resolvable:$true] %s74_s25 }
  0x18   :  { %s2429_s26 = sld [smem:[#allocation44_spill]] }
  0x1e   :  { %s1416_s2 = scalar_lea.hbm %s2429_s26, 128 }
  0x1f   :  { %p1417_p0 = scmp.ne.s32.totalorder %s2429_s26, %s1416_s2  ;;  %p1420_p1 = scmp.lt.u32.totalorder %s1416_s2, %s2429_s26 }
  0x21   :  { %p1422_p2 = pnand %p1420_p1, %p1417_p0 }
  0x23   :  { %1425 = shalt.err (!%p1422_p2)
}
  0x24   :  { %s1426_s29 = scalar_lea.vmem %s56_s30, 128  ;;  %p1431_p4 = scmp.lt.s32.totalorder %s56_s30, %s56_s30 }
  0x25   :  { %p1427_p3 = scmp.ne.s32.totalorder %s56_s30, %s1426_s29  ;;  %p1432_p5 = scmp.lt.s32.totalorder %s1426_s29, %s1426_s29 }
  0x27   :  { %p1433_p6 = por %p1432_p5, %p1431_p4 }
  0x29   :  { %p1434_p7 = pnand %p1433_p6, %p1427_p3 }
  0x2b   :  { %1437 = shalt.err (!%p1434_p7)
}
  0x2c   :  { %58 = dma.hbm_to_vmem [thread:$0]  %s2429_s26, 128, %s56_s30, [#allocation6]  }
  0x2d   :  { %s2430_s5 = sld [smem:[#allocation46_spill]] }
  0x33   :  { %s1438_s1 = scalar_lea.hbm %s2430_s5, 512 }
  0x34   :  { %p1439_p8 = scmp.ne.s32.totalorder %s2430_s5, %s1438_s1  ;;  %p1442_p9 = scmp.lt.u32.totalorder %s1438_s1, %s2430_s5 }
  0x36   :  { %p1444_p10 = pnand %p1442_p9, %p1439_p8 }
  0x38   :  { %1447 = shalt.err (!%p1444_p10)
}
  0x39   :  { %s1448_s28 = scalar_lea.vmem %s2000_s25, 512  ;;  %p1453_p12 = scmp.lt.s32.totalorder %s2000_s25, %s2000_s25 }
  0x3a   :  { %p1449_p11 = scmp.ne.s32.totalorder %s2000_s25, %s1448_s28  ;;  %p1454_p13 = scmp.lt.s32.totalorder %s1448_s28, %s1448_s28 }
  0x3c   :  { %p1455_p0 = por %p1454_p13, %p1453_p12 }
  0x3e   :  { %p1456_p1 = pnand %p1455_p0, %p1449_p11 }
  0x40   :  { %1459 = shalt.err (!%p1456_p1)
}
  0x41   :  { %s1858_s30 = smov 64   ;;  %s1859_s26 = smov 4  }
  0x42   :  { %80 = dma.hbm_to_vmem [thread:$0]  %s2430_s5, 512, %s2000_s25, [#allocation9], %s1858_s30, %s1858_s30, %s1859_s26  }
  0x43   :  { %s1860_s0 = smov [#allocation11]   ;;  %s1861_s24 = smov [#allocation14]  }
  0x44   :  { %s97_s4 = sshll.u32 %s1860_s0, 4  ;;  %s116_s1 = sshll.u32 %s1861_s24, 4  ;;  %s98_s4 = int_to_ptr.vmem [resolvable:$true] %s97_s4  ;;  %s2034_s1 = int_to_ptr.vmem [resolvable:$true] %s116_s1 }
  0x45   :  { %s2431_s2 = sld [smem:[#allocation48_spill]] }
  0x4b   :  { %s1460_s7 = scalar_lea.hbm %s2431_s2, 16 }
  0x4c   :  { %p1461_p2 = scmp.ne.s32.totalorder %s2431_s2, %s1460_s7  ;;  %p1464_p3 = scmp.lt.u32.totalorder %s1460_s7, %s2431_s2 }
  0x4e   :  { %p1466_p4 = pnand %p1464_p3, %p1461_p2 }
  0x50   :  { %1469 = shalt.err (!%p1466_p4)
}
  0x51   :  { %s1470_s25 = scalar_lea.vmem %s98_s4, 16  ;;  %s1474_s5 = scalar_lea.vmem %s98_s4, 32 }
  0x52   :  { %p1471_p5 = scmp.ne.s32.totalorder %s98_s4, %s1470_s25  ;;  %p1475_p6 = scmp.lt.s32.totalorder %s98_s4, %s98_s4 }
  0x53   :  { %p1476_p7 = scmp.lt.s32.totalorder %s1474_s5, %s1470_s25 }
  0x55   :  { %p1477_p8 = por %p1476_p7, %p1475_p6 }
  0x57   :  { %p1478_p9 = pnand %p1477_p8, %p1471_p5 }
  0x59   :  { %1481 = shalt.err (!%p1478_p9)
}
  0x5a   :  { %100 = dma.hbm_to_vmem [thread:$0]  %s2431_s2, 16, %s98_s4, [#allocation12]  }
  0x5b   :  { %s2432_s24 = sld [smem:[#allocation50_spill]] }
  0x61   :  { %s1482_s6 = scalar_lea.hbm %s2432_s24, 512 }
  0x62   :  { %p1483_p10 = scmp.ne.s32.totalorder %s2432_s24, %s1482_s6  ;;  %p1486_p11 = scmp.lt.u32.totalorder %s1482_s6, %s2432_s24 }
  0x64   :  { %p1488_p12 = pnand %p1486_p11, %p1483_p10 }
  0x66   :  { %1491 = shalt.err (!%p1488_p12)
}
  0x67   :  { %s1492_s28 = scalar_lea.vmem %s2034_s1, 512  ;;  %p1497_p0 = scmp.lt.s32.totalorder %s2034_s1, %s2034_s1 }
  0x68   :  { %p1493_p13 = scmp.ne.s32.totalorder %s2034_s1, %s1492_s28  ;;  %p1498_p1 = scmp.lt.s32.totalorder %s1492_s28, %s1492_s28 }
  0x6a   :  { %p1499_p2 = por %p1498_p1, %p1497_p0 }
  0x6c   :  { %p1500_p3 = pnand %p1499_p2, %p1493_p13 }
  0x6e   :  { %1503 = shalt.err (!%p1500_p3)
}
  0x6f   :  { %122 = dma.hbm_to_vmem [thread:$0]  %s2432_s24, 512, %s2034_s1, [#allocation15], %s1858_s30, %s1858_s30, %s1859_s26  }
  0x70   :  { %s1862_s25 = smov [#allocation17]   ;;  %s1863_s29 = smov [#allocation20]  }
  0x71   :  { %s139_s5 = sshll.u32 %s1862_s25, 4  ;;  %s158_s3 = sshll.u32 %s1863_s29, 4  ;;  %s140_s5 = int_to_ptr.vmem [resolvable:$true] %s139_s5  ;;  %s2068_s3 = int_to_ptr.vmem [resolvable:$true] %s158_s3 }
  0x72   :  { %s1504_s6 = scalar_lea.hbm %s2394_s9, 16 }
  0x73   :  { %p1505_p4 = scmp.ne.s32.totalorder %s2394_s9, %s1504_s6  ;;  %p1508_p5 = scmp.lt.u32.totalorder %s1504_s6, %s2394_s9 }
  0x75   :  { %p1510_p6 = pnand %p1508_p5, %p1505_p4 }
  0x77   :  { %1513 = shalt.err (!%p1510_p6)
}
  0x78   :  { %s1514_s1 = scalar_lea.vmem %s140_s5, 16  ;;  %s1518_s24 = scalar_lea.vmem %s140_s5, 32 }
  0x79   :  { %p1515_p7 = scmp.ne.s32.totalorder %s140_s5, %s1514_s1  ;;  %p1519_p8 = scmp.lt.s32.totalorder %s140_s5, %s140_s5 }
  0x7a   :  { %p1520_p9 = scmp.lt.s32.totalorder %s1518_s24, %s1514_s1 }
  0x7c   :  { %p1521_p10 = por %p1520_p9, %p1519_p8 }
  0x7e   :  { %p1522_p11 = pnand %p1521_p10, %p1515_p7 }
  0x80   :  { %1525 = shalt.err (!%p1522_p11)
}
  0x81   :  { %142 = dma.hbm_to_vmem [thread:$0]  %s2394_s9, 16, %s140_s5, [#allocation18]  }
  0x82   :  { %s1526_s29 = scalar_lea.hbm %s2396_s11, 192 }
  0x83   :  { %p1527_p12 = scmp.ne.s32.totalorder %s2396_s11, %s1526_s29  ;;  %p1530_p13 = scmp.lt.u32.totalorder %s1526_s29, %s2396_s11 }
  0x85   :  { %p1532_p0 = pnand %p1530_p13, %p1527_p12 }
  0x87   :  { %1535 = shalt.err (!%p1532_p0)
}
  0x88   :  { %s1536_s22 = scalar_lea.vmem %s2068_s3, 192  ;;  %p1541_p2 = scmp.lt.s32.totalorder %s2068_s3, %s2068_s3 }
  0x89   :  { %p1537_p1 = scmp.ne.s32.totalorder %s2068_s3, %s1536_s22  ;;  %p1542_p3 = scmp.lt.s32.totalorder %s1536_s22, %s1536_s22 }
  0x8b   :  { %p1543_p4 = por %p1542_p3, %p1541_p2 }
  0x8d   :  { %p1544_p5 = pnand %p1543_p4, %p1537_p1 }
  0x8f   :  { %1547 = shalt.err (!%p1544_p5)
}
  0x90   :  { %164 = dma.hbm_to_vmem [thread:$0]  %s2396_s11, 192, %s2068_s3, [#allocation21], %s1858_s30, %s1858_s30, %s1859_s26  }
  0x91   :  { %s1864_s27 = smov [#allocation23]   ;;  %s1865_s1 = smov [#allocation26]  }
  0x92   :  { %s181_s7 = sshll.u32 %s1864_s27, 4  ;;  %s200_s24 = sshll.u32 %s1865_s1, 4  ;;  %s182_s7 = int_to_ptr.vmem [resolvable:$true] %s181_s7  ;;  %s2102_s24 = int_to_ptr.vmem [resolvable:$true] %s200_s24 }
  0x93   :  { %s1548_s2 = scalar_lea.hbm %s2398_s13, 16 }
  0x94   :  { %p1549_p6 = scmp.ne.s32.totalorder %s2398_s13, %s1548_s2  ;;  %p1552_p7 = scmp.lt.u32.totalorder %s1548_s2, %s2398_s13 }
  0x96   :  { %p1554_p8 = pnand %p1552_p7, %p1549_p6 }
  0x98   :  { %1557 = shalt.err (!%p1554_p8)
}
  0x99   :  { %s1558_s11 = scalar_lea.vmem %s182_s7, 16  ;;  %s1562_s3 = scalar_lea.vmem %s182_s7, 32 }
  0x9a   :  { %p1559_p9 = scmp.ne.s32.totalorder %s182_s7, %s1558_s11  ;;  %p1563_p10 = scmp.lt.s32.totalorder %s182_s7, %s182_s7 }
  0x9b   :  { %p1564_p11 = scmp.lt.s32.totalorder %s1562_s3, %s1558_s11 }
  0x9d   :  { %p1565_p12 = por %p1564_p11, %p1563_p10 }
  0x9f   :  { %p1566_p13 = pnand %p1565_p12, %p1559_p9 }
  0xa1   :  { %1569 = shalt.err (!%p1566_p13)
}
  0xa2   :  { %184 = dma.hbm_to_vmem [thread:$0]  %s2398_s13, 16, %s182_s7, [#allocation24]  }
  0xa3   :  { %s1570_s5 = scalar_lea.hbm %s2400_s15, 1024 }
  0xa4   :  { %p1571_p0 = scmp.ne.s32.totalorder %s2400_s15, %s1570_s5  ;;  %p1574_p1 = scmp.lt.u32.totalorder %s1570_s5, %s2400_s15 }
  0xa6   :  { %p1576_p2 = pnand %p1574_p1, %p1571_p0 }
  0xa8   :  { %1579 = shalt.err (!%p1576_p2)
}
  0xa9   :  { %s1580_s2 = scalar_lea.vmem %s2102_s24, 1024  ;;  %p1585_p4 = scmp.lt.s32.totalorder %s2102_s24, %s2102_s24 }
  0xaa   :  { %p1581_p3 = scmp.ne.s32.totalorder %s2102_s24, %s1580_s2  ;;  %p1586_p5 = scmp.lt.s32.totalorder %s1580_s2, %s1580_s2 }
  0xac   :  { %p1587_p6 = por %p1586_p5, %p1585_p4 }
  0xae   :  { %p1588_p7 = pnand %p1587_p6, %p1581_p3 }
  0xb0   :  { %1591 = shalt.err (!%p1588_p7)
}
  0xb1   :  { %206 = dma.hbm_to_vmem [thread:$0]  %s2400_s15, 1024, %s2102_s24, [#allocation27], %s1858_s30, %s1858_s30, %s1859_s26  }
  0xb2   :  { %s1866_s25 = smov [#allocation2]   ;;  %s1867_s23 = smov [#allocation7]  }
  0xb3   :  { %s45_s29 = sshll.u32 %s1866_s25, 4  ;;  %s65_s0 = sshll.u32 %s1867_s23, 4  ;;  %s46_s29 = int_to_ptr.vmem [resolvable:$true] %s45_s29  ;;  %s66_s0 = int_to_ptr.vmem [resolvable:$true] %s65_s0 }
  0xb4   :  { %s2433_s6 = sld [smem:[#allocation43_spill]] }
  0xba   :  { %s1592_s20 = scalar_lea.hbm %s2433_s6, 128 }
  0xbb   :  { %p1593_p8 = scmp.ne.s32.totalorder %s2433_s6, %s1592_s20  ;;  %p1596_p9 = scmp.lt.u32.totalorder %s1592_s20, %s2433_s6 }
  0xbd   :  { %p1598_p10 = pnand %p1596_p9, %p1593_p8 }
  0xbf   :  { %1601 = shalt.err (!%p1598_p10)
}
  0xc0   :  { %s1602_s15 = scalar_lea.vmem %s46_s29, 128  ;;  %p1607_p12 = scmp.lt.s32.totalorder %s46_s29, %s46_s29 }
  0xc1   :  { %p1603_p11 = scmp.ne.s32.totalorder %s46_s29, %s1602_s15  ;;  %p1608_p13 = scmp.lt.s32.totalorder %s1602_s15, %s1602_s15 }
  0xc3   :  { %p1609_p0 = por %p1608_p13, %p1607_p12 }
  0xc5   :  { %p1610_p1 = pnand %p1609_p0, %p1603_p11 }
  0xc7   :  { %1613 = shalt.err (!%p1610_p1)
}
  0xc8   :  { %48 = dma.hbm_to_vmem [thread:$0]  %s2433_s6, 128, %s46_s29, [#allocation3]  }
  0xc9   :  { %s2434_s2 = sld [smem:[#allocation45_spill]] }
  0xcf   :  { %s1614_s13 = scalar_lea.hbm %s2434_s2, 128 }
  0xd0   :  { %p1615_p2 = scmp.ne.s32.totalorder %s2434_s2, %s1614_s13  ;;  %p1618_p3 = scmp.lt.u32.totalorder %s1614_s13, %s2434_s2 }
  0xd2   :  { %p1620_p4 = pnand %p1618_p3, %p1615_p2 }
  0xd4   :  { %1623 = shalt.err (!%p1620_p4)
}
  0xd5   :  { %s1624_s3 = scalar_lea.vmem %s66_s0, 128  ;;  %p1629_p6 = scmp.lt.s32.totalorder %s66_s0, %s66_s0 }
  0xd6   :  { %p1625_p5 = scmp.ne.s32.totalorder %s66_s0, %s1624_s3  ;;  %p1630_p7 = scmp.lt.s32.totalorder %s1624_s3, %s1624_s3 }
  0xd8   :  { %p1631_p8 = por %p1630_p7, %p1629_p6 }
  0xda   :  { %p1632_p9 = pnand %p1631_p8, %p1625_p5 }
  0xdc   :  { %1635 = shalt.err (!%p1632_p9)
}
  0xdd   :  { %68 = dma.hbm_to_vmem [thread:$0]  %s2434_s2, 128, %s66_s0, [#allocation6]  }
  0xde   :  { %s1868_s20 = smov [#allocation10]   ;;  %s1869_s9 = smov [#allocation13]  }
  0xdf   :  { %s87_s22 = sshll.u32 %s1868_s20, 4  ;;  %s107_s5 = sshll.u32 %s1869_s9, 4  ;;  %s88_s22 = int_to_ptr.vmem [resolvable:$true] %s87_s22  ;;  %s108_s5 = int_to_ptr.vmem [resolvable:$true] %s107_s5 }
  0xe0   :  { %s2435_s24 = sld [smem:[#allocation47_spill]] }
  0xe6   :  { %s1636_s1 = scalar_lea.hbm %s2435_s24, 16 }
  0xe7   :  { %p1637_p10 = scmp.ne.s32.totalorder %s2435_s24, %s1636_s1  ;;  %p1640_p11 = scmp.lt.u32.totalorder %s1636_s1, %s2435_s24 }
  0xe9   :  { %p1642_p12 = pnand %p1640_p11, %p1637_p10 }
  0xeb   :  { %1645 = shalt.err (!%p1642_p12)
}
  0xec   :  { %s1646_s0 = scalar_lea.vmem %s88_s22, 16  ;;  %s1650_s2 = scalar_lea.vmem %s88_s22, 32 }
  0xed   :  { %p1647_p13 = scmp.ne.s32.totalorder %s88_s22, %s1646_s0  ;;  %p1651_p0 = scmp.lt.s32.totalorder %s88_s22, %s88_s22 }
  0xee   :  { %p1652_p1 = scmp.lt.s32.totalorder %s1650_s2, %s1646_s0 }
  0xf0   :  { %p1653_p2 = por %p1652_p1, %p1651_p0 }
  0xf2   :  { %p1654_p3 = pnand %p1653_p2, %p1647_p13 }
  0xf4   :  { %1657 = shalt.err (!%p1654_p3)
}
  0xf5   :  { %90 = dma.hbm_to_vmem [thread:$0]  %s2435_s24, 16, %s88_s22, [#allocation9]  }
  0xf6   :  { %s2436_s29 = sld [smem:[#allocation49_spill]] }
  0xfc   :  { %s1658_s6 = scalar_lea.hbm %s2436_s29, 16 }
  0xfd   :  { %p1659_p4 = scmp.ne.s32.totalorder %s2436_s29, %s1658_s6  ;;  %p1662_p5 = scmp.lt.u32.totalorder %s1658_s6, %s2436_s29 }
  0xff   :  { %p1664_p6 = pnand %p1662_p5, %p1659_p4 }
 0x101   :  { %1667 = shalt.err (!%p1664_p6)
}
 0x102   :  { %s1668_s1 = scalar_lea.vmem %s108_s5, 16  ;;  %s1672_s28 = scalar_lea.vmem %s108_s5, 32 }
 0x103   :  { %p1669_p7 = scmp.ne.s32.totalorder %s108_s5, %s1668_s1  ;;  %p1673_p8 = scmp.lt.s32.totalorder %s108_s5, %s108_s5 }
 0x104   :  { %p1674_p9 = scmp.lt.s32.totalorder %s1672_s28, %s1668_s1 }
 0x106   :  { %p1675_p10 = por %p1674_p9, %p1673_p8 }
 0x108   :  { %p1676_p11 = pnand %p1675_p10, %p1669_p7 }
 0x10a   :  { %1679 = shalt.err (!%p1676_p11)
}
 0x10b   :  { %110 = dma.hbm_to_vmem [thread:$0]  %s2436_s29, 16, %s108_s5, [#allocation12]  }
 0x10c   :  { %s1870_s4 = smov [#allocation16]   ;;  %s1871_s7 = smov [#allocation19]  }
 0x10d   :  { %s129_s13 = sshll.u32 %s1870_s4, 4  ;;  %s149_s0 = sshll.u32 %s1871_s7, 4  ;;  %s130_s13 = int_to_ptr.vmem [resolvable:$true] %s129_s13  ;;  %s150_s0 = int_to_ptr.vmem [resolvable:$true] %s149_s0 }
 0x10e   :  { %s1680_s23 = scalar_lea.hbm %s2393_s8, 16 }
 0x10f   :  { %p1681_p12 = scmp.ne.s32.totalorder %s2393_s8, %s1680_s23  ;;  %p1684_p13 = scmp.lt.u32.totalorder %s1680_s23, %s2393_s8 }
 0x111   :  { %p1686_p0 = pnand %p1684_p13, %p1681_p12 }
 0x113   :  { %1689 = shalt.err (!%p1686_p0)
}
 0x114   :  { %s1690_s5 = scalar_lea.vmem %s130_s13, 16  ;;  %s1694_s29 = scalar_lea.vmem %s130_s13, 32 }
 0x115   :  { %p1691_p1 = scmp.ne.s32.totalorder %s130_s13, %s1690_s5  ;;  %p1695_p2 = scmp.lt.s32.totalorder %s130_s13, %s130_s13 }
 0x116   :  { %p1696_p3 = scmp.lt.s32.totalorder %s1694_s29, %s1690_s5 }
 0x118   :  { %p1697_p4 = por %p1696_p3, %p1695_p2 }
 0x11a   :  { %p1698_p5 = pnand %p1697_p4, %p1691_p1 }
 0x11c   :  { %1701 = shalt.err (!%p1698_p5)
}
 0x11d   :  { %132 = dma.hbm_to_vmem [thread:$0]  %s2393_s8, 16, %s130_s13, [#allocation15]  }
 0x11e   :  { %s1702_s28 = scalar_lea.hbm %s2395_s10, 16 }
 0x11f   :  { %p1703_p6 = scmp.ne.s32.totalorder %s2395_s10, %s1702_s28  ;;  %p1706_p7 = scmp.lt.u32.totalorder %s1702_s28, %s2395_s10 }
 0x121   :  { %p1708_p8 = pnand %p1706_p7, %p1703_p6 }
 0x123   :  { %1711 = shalt.err (!%p1708_p8)
}
 0x124   :  { %s1712_s2 = scalar_lea.vmem %s150_s0, 16  ;;  %s1716_s25 = scalar_lea.vmem %s150_s0, 32 }
 0x125   :  { %p1713_p9 = scmp.ne.s32.totalorder %s150_s0, %s1712_s2  ;;  %p1717_p10 = scmp.lt.s32.totalorder %s150_s0, %s150_s0 }
 0x126   :  { %p1718_p11 = scmp.lt.s32.totalorder %s1716_s25, %s1712_s2 }
 0x128   :  { %p1719_p12 = por %p1718_p11, %p1717_p10 }
 0x12a   :  { %p1720_p13 = pnand %p1719_p12, %p1713_p9 }
 0x12c   :  { %1723 = shalt.err (!%p1720_p13)
}
 0x12d   :  { %152 = dma.hbm_to_vmem [thread:$0]  %s2395_s10, 16, %s150_s0, [#allocation18]  }
 0x12e   :  { %s1872_s23 = smov [#allocation22]   ;;  %s1873_s3 = smov [#allocation25]  }
 0x12f   :  { %s171_s11 = sshll.u32 %s1872_s23, 4  ;;  %s191_s6 = sshll.u32 %s1873_s3, 4  ;;  %s172_s11 = int_to_ptr.vmem [resolvable:$true] %s171_s11  ;;  %s192_s6 = int_to_ptr.vmem [resolvable:$true] %s191_s6 }
 0x130   :  { %s1724_s29 = scalar_lea.hbm %s2397_s12, 16 }
 0x131   :  { %p1725_p0 = scmp.ne.s32.totalorder %s2397_s12, %s1724_s29  ;;  %p1728_p1 = scmp.lt.u32.totalorder %s1724_s29, %s2397_s12 }
 0x133   :  { %p1730_p2 = pnand %p1728_p1, %p1725_p0 }
 0x135   :  { %1733 = shalt.err (!%p1730_p2)
}
 0x136   :  { %s1734_s10 = scalar_lea.vmem %s172_s11, 16  ;;  %s1738_s0 = scalar_lea.vmem %s172_s11, 32 }
 0x137   :  { %p1735_p3 = scmp.ne.s32.totalorder %s172_s11, %s1734_s10  ;;  %p1739_p4 = scmp.lt.s32.totalorder %s172_s11, %s172_s11 }
 0x138   :  { %p1740_p5 = scmp.lt.s32.totalorder %s1738_s0, %s1734_s10 }
 0x13a   :  { %p1741_p6 = por %p1740_p5, %p1739_p4 }
 0x13c   :  { %p1742_p7 = pnand %p1741_p6, %p1735_p3 }
 0x13e   :  { %1745 = shalt.err (!%p1742_p7)
}
 0x13f   :  { %174 = dma.hbm_to_vmem [thread:$0]  %s2397_s12, 16, %s172_s11, [#allocation21]  }
 0x140   :  { %s1746_s7 = scalar_lea.hbm %s2399_s14, 16 }
 0x141   :  { %p1747_p8 = scmp.ne.s32.totalorder %s2399_s14, %s1746_s7  ;;  %p1750_p9 = scmp.lt.u32.totalorder %s1746_s7, %s2399_s14 }
 0x143   :  { %p1752_p10 = pnand %p1750_p9, %p1747_p8 }
 0x145   :  { %1755 = shalt.err (!%p1752_p10)
}
 0x146   :  { %s1756_s23 = scalar_lea.vmem %s192_s6, 16  ;;  %s1760_s3 = scalar_lea.vmem %s192_s6, 32 }
 0x147   :  { %p1757_p11 = scmp.ne.s32.totalorder %s192_s6, %s1756_s23  ;;  %p1761_p12 = scmp.lt.s32.totalorder %s192_s6, %s192_s6 }
 0x148   :  { %p1762_p13 = scmp.lt.s32.totalorder %s1760_s3, %s1756_s23 }
 0x14a   :  { %p1763_p0 = por %p1762_p13, %p1761_p12 }
 0x14c   :  { %p1764_p1 = pnand %p1763_p0, %p1757_p11 }
 0x14e   :  { %1767 = shalt.err (!%p1764_p1)
}
 0x14f   :  { %194 = dma.hbm_to_vmem [thread:$0]  %s2399_s14, 16, %s192_s6, [#allocation24]  }
 0x150   :  { %s1874_s20 = smov [#allocation28]   ;;  %s1875_s29 = smov [#allocation29]  }
 0x151   :  { %s212_s5 = sshll.u32 %s1874_s20, 4  ;;  %s232_s9 = sshll.u32 %s1875_s29, 4  ;;  %s213_s5 = int_to_ptr.vmem [resolvable:$true] %s212_s5  ;;  %s2232_s9 = int_to_ptr.vmem [resolvable:$true] %s232_s9 }
 0x152   :  { %s1768_s1 = scalar_lea.hbm %s2401_s16, 1024 }
 0x153   :  { %p1769_p2 = scmp.ne.s32.totalorder %s2401_s16, %s1768_s1  ;;  %p1772_p3 = scmp.lt.u32.totalorder %s1768_s1, %s2401_s16 }
 0x155   :  { %p1774_p4 = pnand %p1772_p3, %p1769_p2 }
 0x157   :  { %1777 = shalt.err (!%p1774_p4)
}
 0x158   :  { %s1778_s14 = scalar_lea.vmem %s213_s5, 1024  ;;  %p1783_p6 = scmp.lt.s32.totalorder %s213_s5, %s213_s5 }
 0x159   :  { %p1779_p5 = scmp.ne.s32.totalorder %s213_s5, %s1778_s14  ;;  %p1784_p7 = scmp.lt.s32.totalorder %s1778_s14, %s1778_s14 }
 0x15b   :  { %p1785_p8 = por %p1784_p7, %p1783_p6 }
 0x15d   :  { %p1786_p9 = pnand %p1785_p8, %p1779_p5 }
 0x15f   :  { %1789 = shalt.err (!%p1786_p9)
}
 0x160   :  { %218 = dma.hbm_to_vmem [thread:$0]  %s2401_s16, 1024, %s213_s5, [#allocation27], %s1858_s30, %s1858_s30, %s1859_s26  }
 0x161   :  { %s1790_s2 = scalar_lea.hbm %s2406_s21, 1024 }
 0x162   :  { %p1791_p10 = scmp.ne.s32.totalorder %s2406_s21, %s1790_s2  ;;  %p1794_p11 = scmp.lt.u32.totalorder %s1790_s2, %s2406_s21 }
 0x164   :  { %p1796_p12 = pnand %p1794_p11, %p1791_p10 }
 0x166   :  { %1799 = shalt.err (!%p1796_p12)
}
 0x167   :  { %s1800_s3 = scalar_lea.vmem %s2232_s9, 1024  ;;  %p1805_p0 = scmp.lt.s32.totalorder %s2232_s9, %s2232_s9 }
 0x168   :  { %p1801_p13 = scmp.ne.s32.totalorder %s2232_s9, %s1800_s3  ;;  %p1806_p1 = scmp.lt.s32.totalorder %s1800_s3, %s1800_s3 }
 0x16a   :  { %p1807_p2 = por %p1806_p1, %p1805_p0 }
 0x16c   :  { %p1808_p3 = pnand %p1807_p2, %p1801_p13 }
 0x16e   :  { %1811 = shalt.err (!%p1808_p3)
}
 0x16f   :  { %238 = dma.hbm_to_vmem [thread:$0]  %s2406_s21, 1024, %s2232_s9, [#allocation30], %s1858_s30, %s1858_s30, %s1859_s26  }
 0x170   :  { %1834 = dma.done.wait [#allocation3], 128  }
 0x171   :  { %1835 = vsyncadd [#allocation3], 4294967168 }
 0x172   :  { %1836 = dma.done.wait [#allocation6], 256  }
 0x173   :  { %1837 = vsyncadd [#allocation6], 4294967040 }
 0x174   :  { %1838 = dma.done.wait [#allocation9], 528  }
 0x175   :  { %1839 = vsyncadd [#allocation9], 4294966768 }
 0x176   :  { %1840 = dma.done.wait [#allocation12], 32  }
 0x177   :  { %1841 = vsyncadd [#allocation12], 4294967264 }
 0x178   :  { %1842 = dma.done.wait [#allocation15], 528  }
 0x179   :  { %1843 = vsyncadd [#allocation15], 4294966768 }
 0x17a   :  { %1844 = dma.done.wait [#allocation18], 32  }
 0x17b   :  { %1845 = vsyncadd [#allocation18], 4294967264 }
 0x17c   :  { %1846 = dma.done.wait [#allocation21], 208  }
 0x17d   :  { %1847 = vsyncadd [#allocation21], 4294967088 }
 0x17e   :  { %1848 = dma.done.wait [#allocation24], 32  }
 0x17f   :  { %1849 = vsyncadd [#allocation24], 4294967264 }
 0x180   :  { %1850 = dma.done.wait [#allocation27], 2048  }
 0x181   :  { %1851 = vsyncadd [#allocation27], 4294965248 }
 0x182   :  { %1852 = dma.done.wait [#allocation30], 1024  }
 0x183   :  { %1853 = vsyncadd [#allocation30], 4294966272  ;;  %v1876_v0 = vmov 0.0   ;;  %vm1877_vm0 = vmmov 0   ;;  %v1366_v1 = vld [vmem:[#allocation8] sm:$0xff]   ;;  %v1368_v3 = vld [vmem:[#allocation8 + $0x8] sm:$0xff]  }
 0x184   :  { %1230 = vmatprep.subr.bf16.mxu0 %v1876_v0  ;;  %1242 = vmatprep.subr.bf16.mxu1 %v1876_v0  ;;  %v1367_v2 = vld [vmem:[#allocation14] sm:$0xff]   ;;  %v1369_v4 = vld [vmem:[#allocation14 + $0x8] sm:$0xff]   ;;  %v1371_v6 = vld [vmem:[#allocation14 + $0x10] sm:$0xff]   ;;  %vm337_vm1 = vcmask 523264   ;;  %vm763_vm2 = vcmask 1042432   ;;  %vm764_vm3 = vcmask 1043456  }
 0x185   :  { %1238 = vmatprep.mubr.msk.bf16.mxu0 %vm1877_vm0, %v1876_v0  ;;  %1250 = vmatprep.mubr.msk.bf16.mxu1 %vm1877_vm0, %v1876_v0  ;;  %v1370_v5 = vld [vmem:[#allocation8 + $0x10] sm:$0xff]   ;;  %v1372_v7 = vld [vmem:[#allocation8 + $0x18] sm:$0xff]   ;;  %v296_v8 = vld [vmem:[#allocation2] sm:$0xff]  ;;  %vm759_vm4 = vcmask 187392   ;;  %s2437_s2 = sld [smem:[#allocation51_spill]]  ;;  %s2438_s13 = sld [smem:[#allocation52_spill]] }
 0x186   :  { %1231 = vmatpush3.bf16.msra.mxu0 %v1366_v1  ;;  %1243 = vmatpush3.bf16.msra.mxu1 %v1367_v2  ;;  %v1373_v9 = vld [vmem:[#allocation14 + $0x18] sm:$0xff]   ;;  %v430_v10 = vld [vmem:[#allocation5] sm:$0xff]  ;;  %v297_v11 = vpack.c.bf16 %v296_v8, %v296_v8  ;;  %v1131_v14 = vld [vmem:[#allocation16] ss:$0 sm:$0xff]  ;;  %s1879_s23 = smov [#allocation31]  }
 0x187   :  { %1232 = vmatprep.subr.bf16.mxu0 %v1876_v0  ;;  %1244 = vmatprep.subr.bf16.mxu1 %v1876_v0  ;;  %v431_v12 = vpack.c.bf16 %v430_v10, %v430_v10  ;;  %v1123_v13 = vld [vmem:[#allocation10] ss:$0 sm:$0xff]  ;;  %v1376_v31 = vld [vmem:[#allocation28 + $0x8] sm:$0xff]   ;;  %v1378_v33 = vld [vmem:[#allocation28 + $0x10] sm:$0xff]   ;;  %s1105_s3 = sshll.u32 %s1879_s23, 4  ;;  %s1106_s3 = int_to_ptr.vmem [resolvable:$true] %s1105_s3 }
 0x188   :  { %v1374_v29 = vld [vmem:[#allocation28] sm:$0xff]   ;;  %v1377_v32 = vld [vmem:[#allocation26 + $0x8] sm:$0xff]   ;;  %v1379_v34 = vld [vmem:[#allocation26 + $0x10] sm:$0xff]   ;;  %p1817_p5 = scmp.lt.s32.totalorder %s1106_s3, %s1106_s3 }
 0x189   :  { %v1375_v30 = vld [vmem:[#allocation26] sm:$0xff]   ;;  %v1380_v35 = vld [vmem:[#allocation28 + $0x18] sm:$0xff]   ;;  %v1384_v39 = vld [vmem:[#allocation28 + $0x28] sm:$0xff]  }
 0x18a   :  { %1233 = vmatpush3.bf16.msra.mxu0 %v1368_v3  ;;  %1245 = vmatpush3.bf16.msra.mxu1 %v1369_v4  ;;  %v1381_v36 = vld [vmem:[#allocation26 + $0x18] sm:$0xff]   ;;  %v1382_v37 = vld [vmem:[#allocation28 + $0x20] sm:$0xff]   ;;  %v1385_v40 = vld [vmem:[#allocation26 + $0x28] sm:$0xff]  }
 0x18b   :  { %1234 = vmatprep.subr.bf16.mxu0 %v1876_v0  ;;  %1246 = vmatprep.subr.bf16.mxu1 %v1876_v0  ;;  %v1383_v38 = vld [vmem:[#allocation26 + $0x20] sm:$0xff]   ;;  %v1386_v41 = vld [vmem:[#allocation28 + $0x30] sm:$0xff]   ;;  %v1388_v43 = vld [vmem:[#allocation28 + $0x38] sm:$0xff]  }
 0x18c   :  { %v1387_v42 = vld [vmem:[#allocation26 + $0x30] sm:$0xff]   ;;  %v1389_v44 = vld [vmem:[#allocation26 + $0x38] sm:$0xff]   ;;  %v1129_v1 = vld [vmem:[#allocation11] ss:$0 sm:$0xff] }
 0x18d   :  { %v1137_v3 = vld [vmem:[#allocation17] ss:$0 sm:$0xff] }
 0x18e   :  { %1235 = vmatpush3.bf16.msra.mxu0 %v1370_v5  ;;  %1247 = vmatpush3.bf16.msra.mxu1 %v1371_v6  ;;  %v1130_v6 = vld [vmem:[#allocation13] ss:$0 sm:$0xff] }
 0x18f   :  { %1236 = vmatprep.subr.bf16.mxu0 %v1876_v0  ;;  %1248 = vmatprep.subr.bf16.mxu1 %v1876_v0 }
 0x192   :  { %1237 = vmatpush3.bf16.msra.mxu0 %v1372_v7  ;;  %1249 = vmatpush3.bf16.msra.mxu1 %v1373_v9  ;;  %v1138_v7 = vld [vmem:[#allocation19] ss:$0 sm:$0xff] }
 0x193   :  { %1254 = vmatprep.subr.bf16.mxu0 %v1876_v0  ;;  %1274 = vmatprep.subr.bf16.mxu1 %v1876_v0 }
 0x195   :  { %1239 = vmatmul.mubr.msk.bf16.vlgmr.msra.gmra.mrb[0].mxu0 %vm337_vm1, %v297_v11  ;;  %1251 = vmatmul.mubr.msk.bf16.vlgmr.msra.gmra.mrb[0].mxu1 %vm337_vm1, %v431_v12  ;;  %v1878_v11 = vmov 65535  }
 0x196   :  { %1270 = vmatprep.mubr.msk.bf16.mxu0 %vm1877_vm0, %v1876_v0  ;;  %1290 = vmatprep.mubr.msk.bf16.mxu1 %vm1877_vm0, %v1876_v0  ;;  %v765_v12 = vsel %vm763_vm2, 4294967295, %v1878_v11  ;;  %v1402_v11 = vld [vmem:[#allocation29 + $0x10] sm:$0xff]  }
 0x197   :  { %1255 = vmatpush3.bf16.msra.mxu0 %v1374_v29  ;;  %1275 = vmatpush3.bf16.msra.mxu1 %v1375_v30 }
 0x198   :  { %1256 = vmatprep.subr.bf16.mxu0 %v1876_v0  ;;  %1276 = vmatprep.subr.bf16.mxu1 %v1876_v0 }
 0x19b   :  { %1257 = vmatpush3.bf16.msra.mxu0 %v1376_v31  ;;  %1277 = vmatpush3.bf16.msra.mxu1 %v1377_v32  ;;  %v1155_v32 = vld [vmem:[#allocation22] ss:$0 sm:$0xff] }
 0x19c   :  { %1258 = vmatprep.subr.bf16.mxu0 %v1876_v0  ;;  %1278 = vmatprep.subr.bf16.mxu1 %v1876_v0 }
 0x19f   :  { %1259 = vmatpush3.bf16.msra.mxu0 %v1378_v33  ;;  %1279 = vmatpush3.bf16.msra.mxu1 %v1379_v34 }
 0x1a0   :  { %1260 = vmatprep.subr.bf16.mxu0 %v1876_v0  ;;  %1280 = vmatprep.subr.bf16.mxu1 %v1876_v0 }
 0x1a3   :  { %1261 = vmatpush3.bf16.msra.mxu0 %v1380_v35  ;;  %1281 = vmatpush3.bf16.msra.mxu1 %v1381_v36 }
 0x1a4   :  { %1262 = vmatprep.subr.bf16.mxu0 %v1876_v0  ;;  %1282 = vmatprep.subr.bf16.mxu1 %v1876_v0 }
 0x1a7   :  { %1263 = vmatpush3.bf16.msra.mxu0 %v1382_v37  ;;  %1283 = vmatpush3.bf16.msra.mxu1 %v1383_v38 }
 0x1a8   :  { %1264 = vmatprep.subr.bf16.mxu0 %v1876_v0  ;;  %1284 = vmatprep.subr.bf16.mxu1 %v1876_v0 }
 0x1ab   :  { %1265 = vmatpush3.bf16.msra.mxu0 %v1384_v39  ;;  %1285 = vmatpush3.bf16.msra.mxu1 %v1385_v40  ;;  %v1393_v40 = vld [vmem:[%s2402_s17 + $0x8] sm:$0xff]  }
 0x1ac   :  { %1266 = vmatprep.subr.bf16.mxu0 %v1876_v0  ;;  %1286 = vmatprep.subr.bf16.mxu1 %v1876_v0 }
 0x1af   :  { %1267 = vmatpush3.bf16.msra.mxu0 %v1386_v41  ;;  %1287 = vmatpush3.bf16.msra.mxu1 %v1387_v42  ;;  %v1394_v41 = vld [vmem:[%s2402_s17 + $0x10] sm:$0xff]   ;;  %v1395_v42 = vld [vmem:[%s2402_s17 + $0x18] sm:$0xff]  }
 0x1b0   :  { %1268 = vmatprep.subr.bf16.mxu0 %v1876_v0  ;;  %1288 = vmatprep.subr.bf16.mxu1 %v1876_v0 }
 0x1b3   :  { %1269 = vmatpush3.bf16.msra.mxu0 %v1388_v43  ;;  %1289 = vmatpush3.bf16.msra.mxu1 %v1389_v44  ;;  %v1396_v43 = vld [vmem:[%s2402_s17 + $0x20] sm:$0xff]   ;;  %v1397_v44 = vld [vmem:[%s2402_s17 + $0x28] sm:$0xff]  }
 0x1b4   :  { %1294 = vmatprep.subr.bf16.mxu0 %v1876_v0  ;;  %1302 = vmatprep.subr.bf16.mxu1 %v1876_v0 }
 0x268   :  { %v375_v15 = vpop.f32.mrb[0].mxu0  ;;  %v508_v17 = vpop.f32.mrb[0].mxu1 }
 0x269   :  { %v376_v16 = vadd.f32 %v1123_v13, %v375_v15  ;;  %v1240_v18 = vpop.f32.mrb[1].mxu0  ;;  %v509_v19 = vadd.f32 %v1131_v14, %v508_v17  ;;  %v1252_v20 = vpop.f32.mrb[1].mxu1  ;;  %v1390_v15 = vld [vmem:[#allocation20] sm:$0xff]  }
 0x26a   :  { %v378_v21 = vpop.f32.mrb[2].mxu0  ;;  %v511_v23 = vpop.f32.mrb[2].mxu1  ;;  %v766_v18 = vsel %vm764_vm3, %v765_v12, 0  ;;  %v738_v20 = vld [vmem:[#allocation7] sm:$0xff] }
 0x26b   :  { %v2287_v22 = vmax.f32 %v376_v16, 0.0  ;;  %v1241_v24 = vpop.f32.mrb[3].mxu0  ;;  %v2289_v25 = vmax.f32 %v509_v19, 0.0  ;;  %v1253_v26 = vpop.f32.mrb[3].mxu1  ;;  %v1391_v16 = vld [vmem:[#allocation20 + $0x8] ss:$0 sps:$4 sm:$0xff]   ;;  %v739_v21 = vpack.c.bf16 %v738_v20, %v738_v20 }
 0x26c   :  { %v768_v19 = vand.u32 %v1391_v16, %v766_v18  ;;  %v1403_v12 = vld [vmem:[#allocation29 + $0x18] sm:$0xff]  }
 0x26d   :  { %384 = vadd.xlane.f32.xlu1 %v2287_v22  ;;  %v388_v27 = vmul.f32 %v2287_v22, %v2287_v22  ;;  %517 = vadd.xlane.f32.xlu0 %v2289_v25  ;;  %v520_v28 = vmul.f32 %v2289_v25, %v2289_v25  ;;  %v1407_v16 = vld [vmem:[#allocation29 + $0x38] sm:$0xff]  }
 0x271   :  { %389 = vadd.xlane.f32.xlu1 %v388_v27  ;;  %521 = vadd.xlane.f32.xlu0 %v520_v28 }
 0x2fa   :  { %v385_v45 = vpop.xlane.xlu1 %384  ;;  %v518_v46 = vpop.xlane.xlu0 %517 }
 0x2fb   :  { %v387_v47 = vmul.f32 0.0078125, %v385_v45  ;;  %v519_v48 = vmul.f32 0.0078125, %v518_v46  ;;  %v1398_v45 = vld [vmem:[%s2402_s17 + $0x30] sm:$0xff]   ;;  %v1399_v46 = vld [vmem:[%s2402_s17 + $0x38] sm:$0xff]  }
 0x2fd   :  { %v392_v49 = vmul.f32 %v387_v47, %v387_v47  ;;  %v524_v53 = vmul.f32 %v519_v48, %v519_v48  ;;  %v395_v61 = vsub.f32 %v2287_v22, %v387_v47  ;;  %v527_v63 = vsub.f32 %v2289_v25, %v519_v48  ;;  %v1392_v22 = vld [vmem:[%s2402_s17] sm:$0xff]  }
 0x2fe   :  { %v390_v50 = vpop.xlane.xlu1 %389  ;;  %v522_v51 = vpop.xlane.xlu0 %521 }
 0x2ff   :  { %v391_v52 = vmul.f32 0.0078125, %v390_v50  ;;  %v523_v54 = vmul.f32 0.0078125, %v522_v51 }
 0x301   :  { %v393_v55 = vsub.f32 %v391_v52, %v392_v49  ;;  %v525_v56 = vsub.f32 %v523_v54, %v524_v53 }
 0x303   :  { %v394_v57 = vmax.f32 %v393_v55, 0.0  ;;  %v526_v58 = vmax.f32 %v525_v56, 0.0 }
 0x305   :  { %v396_v59 = vadd.f32 1e-05, %v394_v57  ;;  %v528_v60 = vadd.f32 1e-05, %v526_v58  ;;  %v1159_v57 = vld [vmem:[#allocation23] ss:$0 sm:$0xff] }
 0x307   :  { %1408 = vrsqrt.f32 %v396_v59  ;;  %v1160_v59 = vld [vmem:[#allocation25] ss:$0 sm:$0xff] }
 0x308   :  { %1410 = vrsqrt.f32 %v528_v60 }
 0x311   :  { %v1409_v62 = vpop.eup %1408 }
 0x312   :  { %v1411_v2 = vpop.eup %1410  ;;  %v398_v4 = vmul.f32 %v1409_v62, %v395_v61 }
 0x313   :  { %v530_v5 = vmul.f32 %v1411_v2, %v527_v63  ;;  %v1400_v63 = vld [vmem:[#allocation29] sm:$0xff]   ;;  %v1169_v2 = vld [vmem:[%s2403_s18] ss:$0 sm:$0xff] }
 0x314   :  { %v405_v8 = vmul.f32 %v1129_v1, %v398_v4 }
 0x315   :  { %v537_v9 = vmul.f32 %v1137_v3, %v530_v5 }
 0x316   :  { %v412_v10 = vadd.f32 %v1130_v6, %v405_v8 }
 0x317   :  { %v544_v13 = vadd.f32 %v1138_v7, %v537_v9 }
 0x318   :  { %v413_v14 = vpack.c.bf16 %v412_v10, %v412_v10  ;;  %v1401_v10 = vld [vmem:[#allocation29 + $0x8] sm:$0xff]  }
 0x319   :  { %v545_v17 = vpack.c.bf16 %v544_v13, %v544_v13  ;;  %v1404_v13 = vld [vmem:[#allocation29 + $0x20] sm:$0xff]  }
 0x31a   :  { %1291 = vmatmul.mubr.bf16.vlgmr.msra.gmra.mrb[4].mxu1 %v413_v14  ;;  %v1405_v14 = vld [vmem:[#allocation29 + $0x28] sm:$0xff]  }
 0x31b   :  { %1271 = vmatmul.mubr.bf16.vlgmr.msra.gmra.mrb[4].mxu0 %v545_v17  ;;  %1318 = vmatprep.mubr.msk.bf16.mxu1 %vm1877_vm0, %v1876_v0 }
 0x31c   :  { %1295 = vmatpush3.bf16.msra.mxu0 %v1390_v15  ;;  %1298 = vmatprep.mubr.msk.bf16.mxu0 %vm1877_vm0, %v1876_v0  ;;  %v1406_v15 = vld [vmem:[#allocation29 + $0x30] sm:$0xff]  }
 0x31d   :  { %1296 = vmatprep.subr.bf16.mxu0 %v1876_v0  ;;  %1303 = vmatpush3.bf16.msra.mxu1 %v1392_v22 }
 0x31e   :  { %1304 = vmatprep.subr.bf16.mxu1 %v1876_v0 }
 0x320   :  { %1297 = vmatpush3.bf16.msra.mxu0 %v768_v19 }
 0x321   :  { %1322 = vmatprep.subr.bf16.mxu0 %v1876_v0  ;;  %1305 = vmatpush3.bf16.msra.mxu1 %v1393_v40 }
 0x322   :  { %1306 = vmatprep.subr.bf16.mxu1 %v1876_v0 }
 0x323   :  { %1299 = vmatmul.mubr.msk.bf16.vlgmr.msra.gmra.mrb[8].mxu0 %vm759_vm4, %v739_v21 }
 0x324   :  { %1338 = vmatprep.mubr.msk.bf16.mxu0 %vm1877_vm0, %v1876_v0  ;;  %1323 = vmatpush3.bf16.msra.mxu0 %v1400_v63 }
 0x325   :  { %1307 = vmatpush3.bf16.msra.mxu1 %v1394_v41  ;;  %1324 = vmatprep.subr.bf16.mxu0 %v1876_v0 }
 0x326   :  { %1308 = vmatprep.subr.bf16.mxu1 %v1876_v0 }
 0x328   :  { %1325 = vmatpush3.bf16.msra.mxu0 %v1401_v10 }
 0x329   :  { %1309 = vmatpush3.bf16.msra.mxu1 %v1395_v42  ;;  %1326 = vmatprep.subr.bf16.mxu0 %v1876_v0 }
 0x32a   :  { %1310 = vmatprep.subr.bf16.mxu1 %v1876_v0 }
 0x32c   :  { %1327 = vmatpush3.bf16.msra.mxu0 %v1402_v11 }
 0x32d   :  { %1311 = vmatpush3.bf16.msra.mxu1 %v1396_v43  ;;  %1328 = vmatprep.subr.bf16.mxu0 %v1876_v0 }
 0x32e   :  { %1312 = vmatprep.subr.bf16.mxu1 %v1876_v0 }
 0x330   :  { %1329 = vmatpush3.bf16.msra.mxu0 %v1403_v12 }
 0x331   :  { %1313 = vmatpush3.bf16.msra.mxu1 %v1397_v44  ;;  %1330 = vmatprep.subr.bf16.mxu0 %v1876_v0 }
 0x332   :  { %1314 = vmatprep.subr.bf16.mxu1 %v1876_v0 }
 0x334   :  { %1331 = vmatpush3.bf16.msra.mxu0 %v1404_v13 }
 0x335   :  { %1315 = vmatpush3.bf16.msra.mxu1 %v1398_v45  ;;  %1332 = vmatprep.subr.bf16.mxu0 %v1876_v0 }
 0x336   :  { %1316 = vmatprep.subr.bf16.mxu1 %v1876_v0 }
 0x338   :  { %1333 = vmatpush3.bf16.msra.mxu0 %v1405_v14 }
 0x339   :  { %1317 = vmatpush3.bf16.msra.mxu1 %v1399_v46  ;;  %1334 = vmatprep.subr.bf16.mxu0 %v1876_v0 }
 0x33c   :  { %1335 = vmatpush3.bf16.msra.mxu0 %v1406_v15 }
 0x33d   :  { %1336 = vmatprep.subr.bf16.mxu0 %v1876_v0  ;;  %v1171_v0 = vld [vmem:[%s2437_s2] ss:$0 sm:$0xff] }
 0x340   :  { %1337 = vmatpush3.bf16.msra.mxu0 %v1407_v16 }
 0x3ed   :  { %v732_v23 = vpop.f32.mrb[4].mxu1 }
 0x3ee   :  { %v644_v24 = vpop.f32.mrb[4].mxu0  ;;  %v1292_v25 = vpop.f32.mrb[5].mxu1 }
 0x3ef   :  { %v733_v26 = vadd.f32 %v732_v23, %v644_v24  ;;  %v1272_v27 = vpop.f32.mrb[5].mxu0  ;;  %v735_v28 = vpop.f32.mrb[6].mxu1 }
 0x3f0   :  { %v647_v29 = vpop.f32.mrb[6].mxu0  ;;  %v1293_v30 = vpop.f32.mrb[7].mxu1  ;;  %v1170_v27 = vld [vmem:[%s2404_s19] ss:$0 sm:$0xff]  ;;  %s1812_s19 = scalar_lea.vmem %s1106_s3, 128 }
 0x3f1   :  { %v1273_v31 = vpop.f32.mrb[7].mxu0  ;;  %p1813_p4 = scmp.ne.s32.totalorder %s1106_s3, %s1812_s19  ;;  %p1818_p6 = scmp.lt.s32.totalorder %s1812_s19, %s1812_s19 }
 0x3f3   :  { %p1819_p7 = por %p1818_p6, %p1817_p5 }
 0x3f5   :  { %p1820_p8 = pnand %p1819_p7, %p1813_p4 }
 0x3f6   :  { %v804_v33 = vpop.f32.mrb[8].mxu0 }
 0x3f7   :  { %v805_v34 = vadd.f32 %v1155_v32, %v804_v33  ;;  %v1300_v35 = vpop.f32.mrb[9].mxu0  ;;  %v1172_v32 = vld [vmem:[%s2438_s13] ss:$0 sm:$0xff] }
 0x3f8   :  { %v807_v36 = vpop.f32.mrb[10].mxu0 }
 0x3f9   :  { %v812_v37 = vmax.f32 %v805_v34, 0.0  ;;  %v1301_v38 = vpop.f32.mrb[11].mxu0 }
 0x3fb   :  { %813 = vadd.xlane.f32.xlu0 %v812_v37  ;;  %v816_v39 = vmul.f32 %v812_v37, %v812_v37 }
 0x3fd   :  { %817 = vadd.xlane.f32.xlu1 %v816_v39 }
 0x488   :  { %v814_v47 = vpop.xlane.xlu0 %813 }
 0x489   :  { %v815_v48 = vmul.f32 0.0078125, %v814_v47 }
 0x48a   :  { %v818_v49 = vpop.xlane.xlu1 %817 }
 0x48b   :  { %v820_v50 = vmul.f32 %v815_v48, %v815_v48  ;;  %v819_v51 = vmul.f32 0.0078125, %v818_v49  ;;  %v823_v55 = vsub.f32 %v812_v37, %v815_v48 }
 0x48d   :  { %v821_v52 = vsub.f32 %v819_v51, %v820_v50 }
 0x48f   :  { %v822_v53 = vmax.f32 %v821_v52, 0.0 }
 0x491   :  { %v824_v54 = vadd.f32 1e-05, %v822_v53 }
 0x493   :  { %1412 = vrsqrt.f32 %v824_v54 }
 0x49d   :  { %v1413_v56 = vpop.eup %1412 }
 0x49e   :  { %v826_v58 = vmul.f32 %v1413_v56, %v823_v55 }
 0x4a0   :  { %v833_v60 = vmul.f32 %v1159_v57, %v826_v58 }
 0x4a2   :  { %v840_v61 = vadd.f32 %v1160_v59, %v833_v60 }
 0x4a4   :  { %v841_v62 = vpack.c.bf16 %v840_v61, %v840_v61 }
 0x4a6   :  { %1319 = vmatmul.mubr.bf16.vlgmr.msra.gmra.mrb[8].mxu1 %v841_v62 }
 0x579   :  { %v940_v1 = vpop.f32.mrb[8].mxu1 }
 0x57a   :  { %v946_v3 = vadd.f32 %v940_v1, %v733_v26  ;;  %v1320_v4 = vpop.f32.mrb[9].mxu1 }
 0x57b   :  { %v943_v5 = vpop.f32.mrb[10].mxu1 }
 0x57c   :  { %v954_v6 = vadd.f32 %v1169_v2, %v946_v3  ;;  %v1321_v7 = vpop.f32.mrb[11].mxu1 }
 0x57e   :  { %v957_v8 = vmax.f32 %v954_v6, 0.0 }
 0x580   :  { %958 = vadd.xlane.f32.xlu0 %v957_v8  ;;  %v961_v9 = vmul.f32 %v957_v8, %v957_v8 }
 0x582   :  { %962 = vadd.xlane.f32.xlu1 %v961_v9 }
 0x60d   :  { %v959_v17 = vpop.xlane.xlu0 %958 }
 0x60e   :  { %v960_v18 = vmul.f32 0.0078125, %v959_v17 }
 0x60f   :  { %v963_v19 = vpop.xlane.xlu1 %962 }
 0x610   :  { %v965_v20 = vmul.f32 %v960_v18, %v960_v18  ;;  %v964_v21 = vmul.f32 0.0078125, %v963_v19  ;;  %v968_v25 = vsub.f32 %v957_v8, %v960_v18 }
 0x612   :  { %v966_v22 = vsub.f32 %v964_v21, %v965_v20 }
 0x614   :  { %v967_v23 = vmax.f32 %v966_v22, 0.0 }
 0x616   :  { %v969_v24 = vadd.f32 1e-05, %v967_v23 }
 0x618   :  { %1414 = vrsqrt.f32 %v969_v24 }
 0x622   :  { %v1415_v26 = vpop.eup %1414 }
 0x623   :  { %v971_v28 = vmul.f32 %v1415_v26, %v968_v25 }
 0x625   :  { %v978_v29 = vmul.f32 %v1170_v27, %v971_v28 }
 0x627   :  { %v985_v30 = vadd.f32 %v1171_v0, %v978_v29 }
 0x629   :  { %v986_v31 = vpack.c.bf16 %v985_v30, %v985_v30 }
 0x62b   :  { %1339 = vmatmul.mubr.bf16.vlgmr.msra.gmra.mrb[12].mxu0 %v986_v31 }
 0x6fe   :  { %v1092_v33 = vpop.f32.mrb[12].mxu0 }
 0x6ff   :  { %v1093_v34 = vadd.f32 %v1172_v32, %v1092_v33  ;;  %v1340_v35 = vpop.f32.mrb[13].mxu0 }
 0x700   :  { %v1095_v36 = vpop.f32.mrb[14].mxu0 }
 0x701   :  { %1098 = vst [vmem:[#allocation31] sm:$0xff] %v1093_v34  ;;  %v1341_v37 = vpop.f32.mrb[15].mxu0 }
 0x702   :  { %1823 = shalt.err (!%p1820_p8)
}
 0x703   :  { %s2439_s21 = sld [smem:[#allocation53_spill]] }
 0x709   :  { %s1824_s30 = scalar_lea.hbm %s2439_s21, 128 }
 0x70a   :  { %p1825_p9 = scmp.ne.s32.totalorder %s2439_s21, %s1824_s30  ;;  %p1828_p10 = scmp.lt.u32.totalorder %s1824_s30, %s2439_s21 }
 0x70c   :  { %p1830_p11 = pnand %p1828_p10, %p1825_p9 }
 0x70e   :  { %1833 = shalt.err (!%p1830_p11)
}
 0x70f   :  { %1108 = dma.vmem_to_hbm [thread:$0]  %s1106_s3, 128, %s2439_s21, [#allocation4]  }
 0x710   :  { %1854 = dma.done.wait [#allocation4], 128  }
 0x711   :  { %1855 = vsyncadd [#allocation4], 4294967168 }
 0x712   :  { %1112 = vsyncpa [#allocation3], 1 }
 0x713   :  { %1113 = vsyncpa [#allocation6], 1 }
 0x714   :  { %1114 = vsyncpa [#allocation9], 1 }
 0x715   :  { %1115 = vsyncpa [#allocation12], 1 }
 0x716   :  { %1116 = vsyncpa [#allocation15], 1 }
 0x717   :  { %1117 = vsyncpa [#allocation18], 1 }
 0x718   :  { %1118 = vsyncpa [#allocation21], 1 }
 0x719   :  { %1119 = vsyncpa [#allocation24], 1 }
 0x71a   :  { %1120 = vsyncpa [#allocation27], 1 }
 0x71b   :  { %1121 = vsyncpa [#allocation30], 1 }
 0x71c   :  { %1122 = vsyncpa [#allocation4], 1 }

</bundles_post_ra>
